<compile_context>
chip_gen: v5e
topology: v5e:2x2
jax: 0.10.0
libtpu: 0.0.40
codegen_flags: <defaults>
</compile_context>

<pallas_src>
import functools

import jax
import jax.numpy as jnp
from jax.experimental import pallas as pl
from jax.experimental.pallas import tpu as pltpu

HP = 128            # per-gate lane block (padded to full vreg lane width)
GW = 3 * HP         # combined gate width [r | z | n], both directions packed


# ----------------------------------------------------------------------------
# Fused whole-model kernel
# ----------------------------------------------------------------------------
def gru_model_kernel(x_ref,                                       # (T, BP, E)
                     wih0_ref, whh0_ref, bih0_ref, bhh0_ref,      # layer 0 packed
                     wia1_ref, wib1_ref, whh1_ref, bih1_ref, bhh1_ref,  # layer 1 packed
                     w1_ref, b1_ref, w2_ref, b2_ref,              # MLP head (padded)
                     o_ref,                                       # (BP, 128)
                     gi_scr,                                      # (T, BP, GW) reused by both layers
                     seqf_scr, seqb_scr,                          # (T, BP, HP) layer-0 outputs
                     *, seq_len, hidden):
    T = seq_len
    H = hidden
    BP = x_ref.shape[1]
    E = x_ref.shape[2]

    # Hoisted lane mask: within each 128-lane gate group, lanes [0,H) belong to
    # the forward direction, [H,2H) to the backward direction, the rest is pad.
    lane = jax.lax.broadcasted_iota(jnp.int32, (BP, GW), 1)
    fwd_mask = (lane % HP) < H

    def bidi_recurrence(whh, bhh, store_layer0_outputs):
        """Run fwd (t = 0..T-1) and bwd (t = T-1..0) directions of one GRU
        layer on a single stacked hidden state (fwd lanes [0,H), bwd [H,2H));
        gi_scr holds the hoisted input projections in natural time order."""
        def step(s, h):
            # fwd gate lanes come from time s, bwd gate lanes from time T-1-s.
            gi = jnp.where(fwd_mask, gi_scr[s], gi_scr[T - 1 - s])
            gh = jnp.dot(h, whh, preferred_element_type=jnp.float32) + bhh
            r = jax.nn.sigmoid(gi[:, 0:HP] + gh[:, 0:HP])            # lane-aligned slices
            z = jax.nn.sigmoid(gi[:, HP:2 * HP] + gh[:, HP:2 * HP])
            n = jnp.tanh(gi[:, 2 * HP:3 * HP] + r * gh[:, 2 * HP:3 * HP])
            h_new = (1.0 - z) * n + z * h
            if store_layer0_outputs:
                seqf_scr[s] = h_new            # h_f(s)       lives in lanes [0,H)
                seqb_scr[T - 1 - s] = h_new    # h_b(T-1-s)   lives in lanes [H,2H)
            return h_new

        h0 = jnp.zeros((BP, HP), jnp.float32)
        # TODO(synk): for large T switch unroll=True to a small factor (2-4).
        return jax.lax.fori_loop(0, T, step, h0, unroll=True)

    # -------------------- layer 0: hoisted input projection -------------------
    x2d = x_ref[...].reshape(T * BP, E)
    gi0 = jnp.dot(x2d, wih0_ref[...], preferred_element_type=jnp.float32) + bih0_ref[...]
    gi_scr[...] = gi0.reshape(T, BP, GW)

    bhh0 = jnp.broadcast_to(bhh0_ref[...], (BP, GW))
    bidi_recurrence(whh0_ref[...], bhh0, store_layer0_outputs=True)

    # -------------------- layer 1: hoisted input projection -------------------
    seqf2d = seqf_scr[...].reshape(T * BP, HP)
    seqb2d = seqb_scr[...].reshape(T * BP, HP)
    gi1 = (jnp.dot(seqf2d, wia1_ref[...], preferred_element_type=jnp.float32)
           + jnp.dot(seqb2d, wib1_ref[...], preferred_element_type=jnp.float32)
           + bih1_ref[...])
    gi_scr[...] = gi1.reshape(T, BP, GW)

    bhh1 = jnp.broadcast_to(bhh1_ref[...], (BP, GW))
    h1 = bidi_recurrence(whh1_ref[...], bhh1, store_layer0_outputs=False)
    # h1 lanes [0,H) = final fwd hidden (h[-2]); lanes [H,2H) = final bwd hidden (h[-1]).

    # --------- MLP head on cat(h[-2], h[-1]) (padded to 128 output lanes) ------
    hid = jnp.dot(h1, w1_ref[...], preferred_element_type=jnp.float32) + b1_ref[...]
    hid = jnp.maximum(hid, 0.0)                      # ReLU (Dropouts are identity)
    o_ref[...] = jnp.dot(hid, w2_ref[...], preferred_element_type=jnp.float32) + b2_ref[...]


# ----------------------------------------------------------------------------
# Wrapper
# ----------------------------------------------------------------------------
def gru_model_forward(x_ids, params, *, hidden):
    """x_ids: (B, T) int32 token ids. Returns (B, 5) logits."""
    B, T = x_ids.shape
    emb = params["embedding"]
    E = emb.shape[1]
    BP = ((B + 7) // 8) * 8                          # pad batch to a full sublane tile

    # Direct time-major gather (no (B,T,E)->(T,B,E) transpose copy); padded
    # batch rows use token 0 and are sliced off the result.
    ids_tm = jnp.zeros((T, BP), jnp.int32).at[:, :B].set(x_ids.T)
    x_tm = jnp.take(emb, ids_tm, axis=0)             # (T, BP, E)

    kernel = functools.partial(gru_model_kernel, seq_len=T, hidden=hidden)
    vmem = pl.BlockSpec(memory_space=pltpu.MemorySpace.VMEM)

    flops = 2 * (T * BP * E * GW                     # layer-0 input projection
                 + 2 * T * BP * HP * GW              # layer-1 input projections
                 + 2 * T * BP * HP * GW              # recurrent matmuls (2 layers)
                 + BP * HP * 128 + BP * 128 * 128)   # MLP head
    param_keys = ("wih0", "whh0", "bih0", "bhh0", "wia1", "wib1", "whh1",
                  "bih1", "bhh1", "w1", "b1", "w2", "b2")
    bytes_accessed = 4 * (T * BP * E + sum(int(params[k].size) for k in param_keys)
                          + BP * 128)

    out = pl.pallas_call(
        kernel,
        out_shape=jax.ShapeDtypeStruct((BP, 128), jnp.float32),
        in_specs=[vmem] * 14,
        out_specs=vmem,
        scratch_shapes=[
            pltpu.VMEM((T, BP, GW), jnp.float32),    # hoisted gate projections (reused)
            pltpu.VMEM((T, BP, HP), jnp.float32),    # layer-0 outputs, fwd time index
            pltpu.VMEM((T, BP, HP), jnp.float32),    # layer-0 outputs, bwd time index
        ],
        compiler_params=pltpu.CompilerParams(vmem_limit_bytes=64 * 1024 * 1024),
        cost_estimate=pl.CostEstimate(flops=flops,
                                      transcendentals=6 * T * BP * HP,
                                      bytes_accessed=bytes_accessed),
    )(x_tm,
      params["wih0"], params["whh0"], params["bih0"], params["bhh0"],
      params["wia1"], params["wib1"], params["whh1"], params["bih1"], params["bhh1"],
      params["w1"], params["b1"], params["w2"], params["b2"])
    return out[:B, :5]


# ----------------------------------------------------------------------------
# Deterministic parameter initialization + lane-aligned packing
# ----------------------------------------------------------------------------
def _init_gru_dir(key, d_in, hidden):
    k = 1.0 / jnp.sqrt(jnp.float32(hidden))
    k0, k1, k2, k3 = jax.random.split(key, 4)
    w_ih = jax.random.uniform(k0, (d_in, 3 * hidden), jnp.float32, -k, k)
    w_hh = jax.random.uniform(k1, (hidden, 3 * hidden), jnp.float32, -k, k)
    b_ih = jax.random.uniform(k2, (1, 3 * hidden), jnp.float32, -k, k)
    b_hh = jax.random.uniform(k3, (1, 3 * hidden), jnp.float32, -k, k)
    return w_ih, w_hh, b_ih, b_hh


def _pack_gate_cols(w_f, w_b, h):
    """(rows, 3h) [r|z|n] per direction -> (rows, 3*128): [r_f r_b 0|z_f z_b 0|n_f n_b 0]."""
    rows = w_f.shape[0]
    out = jnp.zeros((rows, GW), jnp.float32)
    for g in range(3):
        out = out.at[:, g * HP:g * HP + h].set(w_f[:, g * h:(g + 1) * h])
        out = out.at[:, g * HP + h:g * HP + 2 * h].set(w_b[:, g * h:(g + 1) * h])
    return out


def _pack_whh(whh_f, whh_b, h):
    """Block-diagonal combined recurrent weights: rows 0:h = fwd h, rows h:2h = bwd h."""
    out = jnp.zeros((HP, GW), jnp.float32)
    for g in range(3):
        out = out.at[0:h, g * HP:g * HP + h].set(whh_f[:, g * h:(g + 1) * h])
        out = out.at[h:2 * h, g * HP + h:g * HP + 2 * h].set(whh_b[:, g * h:(g + 1) * h])
    return out


def _pack_wih1(wih1_f, wih1_b, h):
    """Layer-1 input weights split over the two layer-0 output scratches.
    wa multiplies seqf_scr[t] (h_f(t) in lanes 0:h); wb multiplies seqb_scr[t]
    (h_b(t) in lanes h:2h). Zero rows mask out the wrong-time lanes."""
    wa = jnp.zeros((HP, GW), jnp.float32)
    wb = jnp.zeros((HP, GW), jnp.float32)
    wa = wa.at[0:h].set(_pack_gate_cols(wih1_f[0:h], wih1_b[0:h], h))
    wb = wb.at[h:2 * h].set(_pack_gate_cols(wih1_f[h:2 * h], wih1_b[h:2 * h], h))
    return wa, wb


def init_params(key, emb_len, emb_dim, out_dim):
    H = out_dim
    keys = jax.random.split(key, 8)
    params = {"embedding": jax.random.normal(keys[0], (emb_len, emb_dim), jnp.float32)}
    l0f = _init_gru_dir(keys[1], emb_dim, H)
    l0b = _init_gru_dir(keys[2], emb_dim, H)
    l1f = _init_gru_dir(keys[3], 2 * H, H)
    l1b = _init_gru_dir(keys[4], 2 * H, H)

    params["wih0"] = _pack_gate_cols(l0f[0], l0b[0], H)        # (E, 384)
    params["whh0"] = _pack_whh(l0f[1], l0b[1], H)              # (128, 384)
    params["bih0"] = _pack_gate_cols(l0f[2], l0b[2], H)        # (1, 384)
    params["bhh0"] = _pack_gate_cols(l0f[3], l0b[3], H)

    wa, wb = _pack_wih1(l1f[0], l1b[0], H)
    params["wia1"] = wa                                        # (128, 384)
    params["wib1"] = wb                                        # (128, 384)
    params["whh1"] = _pack_whh(l1f[1], l1b[1], H)
    params["bih1"] = _pack_gate_cols(l1f[2], l1b[2], H)
    params["bhh1"] = _pack_gate_cols(l1f[3], l1b[3], H)

    k1 = 1.0 / jnp.sqrt(jnp.float32(2 * H))
    w1 = jax.random.uniform(keys[5], (2 * H, 64), jnp.float32, -k1, k1)
    b1 = jax.random.uniform(keys[6], (1, 64), jnp.float32, -k1, k1)
    k2 = 1.0 / jnp.sqrt(jnp.float32(64))
    w2 = jax.random.uniform(keys[7], (64, 5), jnp.float32, -k2, k2)
    b2 = jnp.zeros((1, 5), jnp.float32)
    # Lane-padded MLP head (final logits live in output lanes 0:5).
    params["w1"] = jnp.zeros((HP, 128), jnp.float32).at[0:2 * H, 0:64].set(w1)
    params["b1"] = jnp.zeros((1, 128), jnp.float32).at[:, 0:64].set(b1)
    params["w2"] = jnp.zeros((128, 128), jnp.float32).at[0:64, 0:5].set(w2)
    params["b2"] = jnp.zeros((1, 128), jnp.float32).at[:, 0:5].set(b2)
    return params


# ----------------------------------------------------------------------------
if __name__ == "__main__":
    EMB_LEN, EMB_DIM, OUT_DIM = 100, 32, 32
    B, T = 2, 8

    key = jax.random.PRNGKey(0)
    kp, kx = jax.random.split(key)
    params = init_params(kp, EMB_LEN, EMB_DIM, OUT_DIM)
    x_ids = jax.random.randint(kx, (B, T), 0, EMB_LEN, dtype=jnp.int32)

    fwd = jax.jit(functools.partial(gru_model_forward, hidden=OUT_DIM))
    out = jax.block_until_ready(fwd(x_ids, params))
    assert out.shape == (B, 5), out.shape
    assert jnp.all(jnp.isfinite(out))
    print("KERNEL_OK")
</pallas_src>

<mosaic_0001>
module attributes {stable_mosaic.version = 11 : i64} {
  func.func @gru_model_kernel(%arg0: memref<8x8x32xf32, #tpu.memory_space<vmem>>, %arg1: memref<32x384xf32, #tpu.memory_space<vmem>>, %arg2: memref<128x384xf32, #tpu.memory_space<vmem>>, %arg3: memref<1x384xf32, #tpu.memory_space<vmem>>, %arg4: memref<1x384xf32, #tpu.memory_space<vmem>>, %arg5: memref<128x384xf32, #tpu.memory_space<vmem>>, %arg6: memref<128x384xf32, #tpu.memory_space<vmem>>, %arg7: memref<128x384xf32, #tpu.memory_space<vmem>>, %arg8: memref<1x384xf32, #tpu.memory_space<vmem>>, %arg9: memref<1x384xf32, #tpu.memory_space<vmem>>, %arg10: memref<128x128xf32, #tpu.memory_space<vmem>>, %arg11: memref<1x128xf32, #tpu.memory_space<vmem>>, %arg12: memref<128x128xf32, #tpu.memory_space<vmem>>, %arg13: memref<1x128xf32, #tpu.memory_space<vmem>>, %arg14: memref<8x128xf32, #tpu.memory_space<vmem>>, %arg15: memref<8x8x384xf32, #tpu.memory_space<vmem>>, %arg16: memref<8x8x128xf32, #tpu.memory_space<vmem>>, %arg17: memref<8x8x128xf32, #tpu.memory_space<vmem>>) attributes {dimension_semantics = [], scalar_prefetch = 0 : i64, scratch_operands = 3 : i64, tpu.core_type = #tpu.core_type<tc>} {
    %0 = tpu.iota {dimensions = array<i32: 1>} : vector<8x384xi32>
    %c128_i32 = arith.constant 128 : i32
    %c0_i32 = arith.constant 0 : i32
    %1 = arith.cmpi eq, %c128_i32, %c0_i32 : i32
    %c1_i32 = arith.constant 1 : i32
    %2 = arith.select %1, %c1_i32, %c128_i32 : i32
    %3 = vector.broadcast %2 : i32 to vector<8x384xi32>
    %4 = arith.remsi %0, %3 : vector<8x384xi32>
    %c0_i32_0 = arith.constant 0 : i32
    %5 = vector.broadcast %c0_i32_0 : i32 to vector<8x384xi32>
    %6 = arith.cmpi ne, %4, %5 : vector<8x384xi32>
    %c0_i32_1 = arith.constant 0 : i32
    %7 = vector.broadcast %c0_i32_1 : i32 to vector<8x384xi32>
    %8 = arith.cmpi slt, %4, %7 : vector<8x384xi32>
    %c0_i32_2 = arith.constant 0 : i32
    %9 = arith.cmpi slt, %2, %c0_i32_2 : i32
    %10 = vector.broadcast %9 : i1 to vector<8x384xi1>
    %11 = vector.broadcast %10 : vector<8x384xi1> to vector<8x384xi1>
    %12 = arith.xori %8, %11 : vector<8x384xi1>
    %13 = arith.andi %12, %6 : vector<8x384xi1>
    %14 = vector.broadcast %2 : i32 to vector<8x384xi32>
    %15 = arith.addi %4, %14 : vector<8x384xi32>
    %16 = arith.select %13, %15, %4 : vector<8x384xi1>, vector<8x384xi32>
    %c32_i32 = arith.constant 32 : i32
    %17 = vector.broadcast %c32_i32 : i32 to vector<8x384xi32>
    %18 = arith.cmpi slt, %16, %17 : vector<8x384xi32>
    %c0 = arith.constant 0 : index
    %c0_3 = arith.constant 0 : index
    %c0_4 = arith.constant 0 : index
    %19 = vector.load %arg0[%c0, %c0_3, %c0_4] : memref<8x8x32xf32, #tpu.memory_space<vmem>>, vector<8x8x32xf32>
    %20 = vector.shape_cast %19 : vector<8x8x32xf32> to vector<64x32xf32>
    %c0_5 = arith.constant 0 : index
    %c0_6 = arith.constant 0 : index
    %21 = vector.load %arg1[%c0_5, %c0_6] : memref<32x384xf32, #tpu.memory_space<vmem>>, vector<32x384xf32>
    %cst = arith.constant dense<0.000000e+00> : vector<64x384xf32>
    %22 = tpu.matmul %20, %21, %cst {dimension_numbers = #tpu.dot_dimension_numbers<[1], [0], [0], [1], [0, 0, 1, 1], [], []>} : vector<64x32xf32>, vector<32x384xf32>, vector<64x384xf32> -> vector<64x384xf32>
    %c0_7 = arith.constant 0 : index
    %c0_8 = arith.constant 0 : index
    %23 = vector.load %arg3[%c0_7, %c0_8] : memref<1x384xf32, #tpu.memory_space<vmem>>, vector<1x384xf32>
    %24 = vector.broadcast %23 : vector<1x384xf32> to vector<64x384xf32>
    %25 = arith.addf %22, %24 : vector<64x384xf32>
    %26 = vector.shape_cast %25 : vector<64x384xf32> to vector<8x8x384xf32>
    %c0_9 = arith.constant 0 : index
    %c0_10 = arith.constant 0 : index
    %c0_11 = arith.constant 0 : index
    %27 = vector.load %arg15[%c0_9, %c0_10, %c0_11] : memref<8x8x384xf32, #tpu.memory_space<vmem>>, vector<8x8x384xf32>
    tpu.vector_store %arg15[%c0_9, %c0_10, %c0_11], %26 {strides = array<i32>} : memref<8x8x384xf32, #tpu.memory_space<vmem>>, vector<8x8x384xf32>,
    %c0_12 = arith.constant 0 : index
    %c0_13 = arith.constant 0 : index
    %28 = vector.load %arg4[%c0_12, %c0_13] : memref<1x384xf32, #tpu.memory_space<vmem>>, vector<1x384xf32>
    %29 = vector.shape_cast %28 : vector<1x384xf32> to vector<1x384xf32>
    %30 = vector.broadcast %29 : vector<1x384xf32> to vector<8x384xf32>
    %c0_14 = arith.constant 0 : index
    %c0_15 = arith.constant 0 : index
    %31 = vector.load %arg2[%c0_14, %c0_15] : memref<128x384xf32, #tpu.memory_space<vmem>>, vector<128x384xf32>
    %cst_16 = arith.constant 0.000000e+00 : f32
    %32 = vector.broadcast %cst_16 : f32 to vector<8x128xf32>
    %c0_i32_17 = arith.constant 0 : i32
    %33 = arith.index_cast %c0_i32_17 : i32 to index
    %c0_18 = arith.constant 0 : index
    %c0_19 = arith.constant 0 : index
    %34 = vector.load %arg15[%33, %c0_18, %c0_19] : memref<8x8x384xf32, #tpu.memory_space<vmem>>, vector<1x8x384xf32>
    %35 = vector.shape_cast %34 : vector<1x8x384xf32> to vector<8x384xf32>
    %c7_i32 = arith.constant 7 : i32
    %36 = arith.subi %c7_i32, %c0_i32_17 : i32
    %37 = arith.index_cast %36 : i32 to index
    %c0_20 = arith.constant 0 : index
    %c0_21 = arith.constant 0 : index
    %38 = vector.load %arg15[%37, %c0_20, %c0_21] : memref<8x8x384xf32, #tpu.memory_space<vmem>>, vector<1x8x384xf32>
    %39 = vector.shape_cast %38 : vector<1x8x384xf32> to vector<8x384xf32>
    %40 = arith.select %18, %35, %39 : vector<8x384xi1>, vector<8x384xf32>
    %cst_22 = arith.constant dense<0.000000e+00> : vector<8x384xf32>
    %41 = tpu.matmul %32, %31, %cst_22 {dimension_numbers = #tpu.dot_dimension_numbers<[1], [0], [0], [1], [0, 0, 1, 1], [], []>} : vector<8x128xf32>, vector<128x384xf32>, vector<8x384xf32> -> vector<8x384xf32>
    %42 = arith.addf %41, %30 : vector<8x384xf32>
    %43 = vector.extract_strided_slice %40 {offsets = [0, 0], sizes = [8, 128], strides = [1, 1]} : vector<8x384xf32> to vector<8x128xf32>
    %44 = vector.extract_strided_slice %42 {offsets = [0, 0], sizes = [8, 128], strides = [1, 1]} : vector<8x384xf32> to vector<8x128xf32>
    %45 = arith.addf %43, %44 : vector<8x128xf32>
    %46 = arith.negf %45 : vector<8x128xf32>
    %47 = math.exp %46 : vector<8x128xf32>
    %cst_23 = arith.constant 1.000000e+00 : f32
    %48 = vector.broadcast %cst_23 : f32 to vector<8x128xf32>
    %49 = arith.addf %48, %47 : vector<8x128xf32>
    %50 = arith.divf %48, %49 : vector<8x128xf32>
    %51 = vector.extract_strided_slice %40 {offsets = [0, 128], sizes = [8, 128], strides = [1, 1]} : vector<8x384xf32> to vector<8x128xf32>
    %52 = vector.extract_strided_slice %42 {offsets = [0, 128], sizes = [8, 128], strides = [1, 1]} : vector<8x384xf32> to vector<8x128xf32>
    %53 = arith.addf %51, %52 : vector<8x128xf32>
    %54 = arith.negf %53 : vector<8x128xf32>
    %55 = math.exp %54 : vector<8x128xf32>
    %cst_24 = arith.constant 1.000000e+00 : f32
    %56 = vector.broadcast %cst_24 : f32 to vector<8x128xf32>
    %57 = arith.addf %56, %55 : vector<8x128xf32>
    %58 = arith.divf %56, %57 : vector<8x128xf32>
    %59 = vector.extract_strided_slice %40 {offsets = [0, 256], sizes = [8, 128], strides = [1, 1]} : vector<8x384xf32> to vector<8x128xf32>
    %60 = vector.extract_strided_slice %42 {offsets = [0, 256], sizes = [8, 128], strides = [1, 1]} : vector<8x384xf32> to vector<8x128xf32>
    %61 = arith.mulf %50, %60 : vector<8x128xf32>
    %62 = arith.addf %59, %61 : vector<8x128xf32>
    %63 = math.tanh %62 : vector<8x128xf32>
    %cst_25 = arith.constant 1.000000e+00 : f32
    %64 = vector.broadcast %cst_25 : f32 to vector<8x128xf32>
    %65 = arith.subf %64, %58 : vector<8x128xf32>
    %66 = arith.mulf %65, %63 : vector<8x128xf32>
    %67 = arith.mulf %58, %32 : vector<8x128xf32>
    %68 = arith.addf %66, %67 : vector<8x128xf32>
    %69 = arith.index_cast %c0_i32_17 : i32 to index
    %c0_26 = arith.constant 0 : index
    %c0_27 = arith.constant 0 : index
    %70 = vector.load %arg16[%69, %c0_26, %c0_27] : memref<8x8x128xf32, #tpu.memory_space<vmem>>, vector<1x8x128xf32>
    %71 = vector.shape_cast %70 : vector<1x8x128xf32> to vector<8x128xf32>
    %72 = vector.shape_cast %68 : vector<8x128xf32> to vector<1x8x128xf32>
    tpu.vector_store %arg16[%69, %c0_26, %c0_27], %72 {strides = array<i32>} : memref<8x8x128xf32, #tpu.memory_space<vmem>>, vector<1x8x128xf32>,
    %c7_i32_28 = arith.constant 7 : i32
    %73 = arith.subi %c7_i32_28, %c0_i32_17 : i32
    %74 = arith.index_cast %73 : i32 to index
    %c0_29 = arith.constant 0 : index
    %c0_30 = arith.constant 0 : index
    %75 = vector.load %arg17[%74, %c0_29, %c0_30] : memref<8x8x128xf32, #tpu.memory_space<vmem>>, vector<1x8x128xf32>
    %76 = vector.shape_cast %75 : vector<1x8x128xf32> to vector<8x128xf32>
    %77 = vector.shape_cast %68 : vector<8x128xf32> to vector<1x8x128xf32>
    tpu.vector_store %arg17[%74, %c0_29, %c0_30], %77 {strides = array<i32>} : memref<8x8x128xf32, #tpu.memory_space<vmem>>, vector<1x8x128xf32>,
    %c1_i32_31 = arith.constant 1 : i32
    %78 = arith.index_cast %c1_i32_31 : i32 to index
    %c0_32 = arith.constant 0 : index
    %c0_33 = arith.constant 0 : index
    %79 = vector.load %arg15[%78, %c0_32, %c0_33] : memref<8x8x384xf32, #tpu.memory_space<vmem>>, vector<1x8x384xf32>
    %80 = vector.shape_cast %79 : vector<1x8x384xf32> to vector<8x384xf32>
    %c7_i32_34 = arith.constant 7 : i32
    %81 = arith.subi %c7_i32_34, %c1_i32_31 : i32
    %82 = arith.index_cast %81 : i32 to index
    %c0_35 = arith.constant 0 : index
    %c0_36 = arith.constant 0 : index
    %83 = vector.load %arg15[%82, %c0_35, %c0_36] : memref<8x8x384xf32, #tpu.memory_space<vmem>>, vector<1x8x384xf32>
    %84 = vector.shape_cast %83 : vector<1x8x384xf32> to vector<8x384xf32>
    %85 = arith.select %18, %80, %84 : vector<8x384xi1>, vector<8x384xf32>
    %cst_37 = arith.constant dense<0.000000e+00> : vector<8x384xf32>
    %86 = tpu.matmul %68, %31, %cst_37 {dimension_numbers = #tpu.dot_dimension_numbers<[1], [0], [0], [1], [0, 0, 1, 1], [], []>} : vector<8x128xf32>, vector<128x384xf32>, vector<8x384xf32> -> vector<8x384xf32>
    %87 = arith.addf %86, %30 : vector<8x384xf32>
    %88 = vector.extract_strided_slice %85 {offsets = [0, 0], sizes = [8, 128], strides = [1, 1]} : vector<8x384xf32> to vector<8x128xf32>
    %89 = vector.extract_strided_slice %87 {offsets = [0, 0], sizes = [8, 128], strides = [1, 1]} : vector<8x384xf32> to vector<8x128xf32>
    %90 = arith.addf %88, %89 : vector<8x128xf32>
    %91 = arith.negf %90 : vector<8x128xf32>
    %92 = math.exp %91 : vector<8x128xf32>
    %cst_38 = arith.constant 1.000000e+00 : f32
    %93 = vector.broadcast %cst_38 : f32 to vector<8x128xf32>
    %94 = arith.addf %93, %92 : vector<8x128xf32>
    %95 = arith.divf %93, %94 : vector<8x128xf32>
    %96 = vector.extract_strided_slice %85 {offsets = [0, 128], sizes = [8, 128], strides = [1, 1]} : vector<8x384xf32> to vector<8x128xf32>
    %97 = vector.extract_strided_slice %87 {offsets = [0, 128], sizes = [8, 128], strides = [1, 1]} : vector<8x384xf32> to vector<8x128xf32>
    %98 = arith.addf %96, %97 : vector<8x128xf32>
    %99 = arith.negf %98 : vector<8x128xf32>
    %100 = math.exp %99 : vector<8x128xf32>
    %cst_39 = arith.constant 1.000000e+00 : f32
    %101 = vector.broadcast %cst_39 : f32 to vector<8x128xf32>
    %102 = arith.addf %101, %100 : vector<8x128xf32>
    %103 = arith.divf %101, %102 : vector<8x128xf32>
    %104 = vector.extract_strided_slice %85 {offsets = [0, 256], sizes = [8, 128], strides = [1, 1]} : vector<8x384xf32> to vector<8x128xf32>
    %105 = vector.extract_strided_slice %87 {offsets = [0, 256], sizes = [8, 128], strides = [1, 1]} : vector<8x384xf32> to vector<8x128xf32>
    %106 = arith.mulf %95, %105 : vector<8x128xf32>
    %107 = arith.addf %104, %106 : vector<8x128xf32>
    %108 = math.tanh %107 : vector<8x128xf32>
    %cst_40 = arith.constant 1.000000e+00 : f32
    %109 = vector.broadcast %cst_40 : f32 to vector<8x128xf32>
    %110 = arith.subf %109, %103 : vector<8x128xf32>
    %111 = arith.mulf %110, %108 : vector<8x128xf32>
    %112 = arith.mulf %103, %68 : vector<8x128xf32>
    %113 = arith.addf %111, %112 : vector<8x128xf32>
    %114 = arith.index_cast %c1_i32_31 : i32 to index
    %c0_41 = arith.constant 0 : index
    %c0_42 = arith.constant 0 : index
    %115 = vector.load %arg16[%114, %c0_41, %c0_42] : memref<8x8x128xf32, #tpu.memory_space<vmem>>, vector<1x8x128xf32>
    %116 = vector.shape_cast %115 : vector<1x8x128xf32> to vector<8x128xf32>
    %117 = vector.shape_cast %113 : vector<8x128xf32> to vector<1x8x128xf32>
    tpu.vector_store %arg16[%114, %c0_41, %c0_42], %117 {strides = array<i32>} : memref<8x8x128xf32, #tpu.memory_space<vmem>>, vector<1x8x128xf32>,
    %c7_i32_43 = arith.constant 7 : i32
    %118 = arith.subi %c7_i32_43, %c1_i32_31 : i32
    %119 = arith.index_cast %118 : i32 to index
    %c0_44 = arith.constant 0 : index
    %c0_45 = arith.constant 0 : index
    %120 = vector.load %arg17[%119, %c0_44, %c0_45] : memref<8x8x128xf32, #tpu.memory_space<vmem>>, vector<1x8x128xf32>
    %121 = vector.shape_cast %120 : vector<1x8x128xf32> to vector<8x128xf32>
    %122 = vector.shape_cast %113 : vector<8x128xf32> to vector<1x8x128xf32>
    tpu.vector_store %arg17[%119, %c0_44, %c0_45], %122 {strides = array<i32>} : memref<8x8x128xf32, #tpu.memory_space<vmem>>, vector<1x8x128xf32>,
    %c2_i32 = arith.constant 2 : i32
    %123 = arith.index_cast %c2_i32 : i32 to index
    %c0_46 = arith.constant 0 : index
    %c0_47 = arith.constant 0 : index
    %124 = vector.load %arg15[%123, %c0_46, %c0_47] : memref<8x8x384xf32, #tpu.memory_space<vmem>>, vector<1x8x384xf32>
    %125 = vector.shape_cast %124 : vector<1x8x384xf32> to vector<8x384xf32>
    %c7_i32_48 = arith.constant 7 : i32
    %126 = arith.subi %c7_i32_48, %c2_i32 : i32
    %127 = arith.index_cast %126 : i32 to index
    %c0_49 = arith.constant 0 : index
    %c0_50 = arith.constant 0 : index
    %128 = vector.load %arg15[%127, %c0_49, %c0_50] : memref<8x8x384xf32, #tpu.memory_space<vmem>>, vector<1x8x384xf32>
    %129 = vector.shape_cast %128 : vector<1x8x384xf32> to vector<8x384xf32>
    %130 = arith.select %18, %125, %129 : vector<8x384xi1>, vector<8x384xf32>
    %cst_51 = arith.constant dense<0.000000e+00> : vector<8x384xf32>
    %131 = tpu.matmul %113, %31, %cst_51 {dimension_numbers = #tpu.dot_dimension_numbers<[1], [0], [0], [1], [0, 0, 1, 1], [], []>} : vector<8x128xf32>, vector<128x384xf32>, vector<8x384xf32> -> vector<8x384xf32>
    %132 = arith.addf %131, %30 : vector<8x384xf32>
    %133 = vector.extract_strided_slice %130 {offsets = [0, 0], sizes = [8, 128], strides = [1, 1]} : vector<8x384xf32> to vector<8x128xf32>
    %134 = vector.extract_strided_slice %132 {offsets = [0, 0], sizes = [8, 128], strides = [1, 1]} : vector<8x384xf32> to vector<8x128xf32>
    %135 = arith.addf %133, %134 : vector<8x128xf32>
    %136 = arith.negf %135 : vector<8x128xf32>
    %137 = math.exp %136 : vector<8x128xf32>
    %cst_52 = arith.constant 1.000000e+00 : f32
    %138 = vector.broadcast %cst_52 : f32 to vector<8x128xf32>
    %139 = arith.addf %138, %137 : vector<8x128xf32>
    %140 = arith.divf %138, %139 : vector<8x128xf32>
    %141 = vector.extract_strided_slice %130 {offsets = [0, 128], sizes = [8, 128], strides = [1, 1]} : vector<8x384xf32> to vector<8x128xf32>
    %142 = vector.extract_strided_slice %132 {offsets = [0, 128], sizes = [8, 128], strides = [1, 1]} : vector<8x384xf32> to vector<8x128xf32>
    %143 = arith.addf %141, %142 : vector<8x128xf32>
    %144 = arith.negf %143 : vector<8x128xf32>
    %145 = math.exp %144 : vector<8x128xf32>
    %cst_53 = arith.constant 1.000000e+00 : f32
    %146 = vector.broadcast %cst_53 : f32 to vector<8x128xf32>
    %147 = arith.addf %146, %145 : vector<8x128xf32>
    %148 = arith.divf %146, %147 : vector<8x128xf32>
    %149 = vector.extract_strided_slice %130 {offsets = [0, 256], sizes = [8, 128], strides = [1, 1]} : vector<8x384xf32> to vector<8x128xf32>
    %150 = vector.extract_strided_slice %132 {offsets = [0, 256], sizes = [8, 128], strides = [1, 1]} : vector<8x384xf32> to vector<8x128xf32>
    %151 = arith.mulf %140, %150 : vector<8x128xf32>
    %152 = arith.addf %149, %151 : vector<8x128xf32>
    %153 = math.tanh %152 : vector<8x128xf32>
    %cst_54 = arith.constant 1.000000e+00 : f32
    %154 = vector.broadcast %cst_54 : f32 to vector<8x128xf32>
    %155 = arith.subf %154, %148 : vector<8x128xf32>
    %156 = arith.mulf %155, %153 : vector<8x128xf32>
    %157 = arith.mulf %148, %113 : vector<8x128xf32>
    %158 = arith.addf %156, %157 : vector<8x128xf32>
    %159 = arith.index_cast %c2_i32 : i32 to index
    %c0_55 = arith.constant 0 : index
    %c0_56 = arith.constant 0 : index
    %160 = vector.load %arg16[%159, %c0_55, %c0_56] : memref<8x8x128xf32, #tpu.memory_space<vmem>>, vector<1x8x128xf32>
    %161 = vector.shape_cast %160 : vector<1x8x128xf32> to vector<8x128xf32>
    %162 = vector.shape_cast %158 : vector<8x128xf32> to vector<1x8x128xf32>
    tpu.vector_store %arg16[%159, %c0_55, %c0_56], %162 {strides = array<i32>} : memref<8x8x128xf32, #tpu.memory_space<vmem>>, vector<1x8x128xf32>,
    %c7_i32_57 = arith.constant 7 : i32
    %163 = arith.subi %c7_i32_57, %c2_i32 : i32
    %164 = arith.index_cast %163 : i32 to index
    %c0_58 = arith.constant 0 : index
    %c0_59 = arith.constant 0 : index
    %165 = vector.load %arg17[%164, %c0_58, %c0_59] : memref<8x8x128xf32, #tpu.memory_space<vmem>>, vector<1x8x128xf32>
    %166 = vector.shape_cast %165 : vector<1x8x128xf32> to vector<8x128xf32>
    %167 = vector.shape_cast %158 : vector<8x128xf32> to vector<1x8x128xf32>
    tpu.vector_store %arg17[%164, %c0_58, %c0_59], %167 {strides = array<i32>} : memref<8x8x128xf32, #tpu.memory_space<vmem>>, vector<1x8x128xf32>,
    %c3_i32 = arith.constant 3 : i32
    %168 = arith.index_cast %c3_i32 : i32 to index
    %c0_60 = arith.constant 0 : index
    %c0_61 = arith.constant 0 : index
    %169 = vector.load %arg15[%168, %c0_60, %c0_61] : memref<8x8x384xf32, #tpu.memory_space<vmem>>, vector<1x8x384xf32>
    %170 = vector.shape_cast %169 : vector<1x8x384xf32> to vector<8x384xf32>
    %c7_i32_62 = arith.constant 7 : i32
    %171 = arith.subi %c7_i32_62, %c3_i32 : i32
    %172 = arith.index_cast %171 : i32 to index
    %c0_63 = arith.constant 0 : index
    %c0_64 = arith.constant 0 : index
    %173 = vector.load %arg15[%172, %c0_63, %c0_64] : memref<8x8x384xf32, #tpu.memory_space<vmem>>, vector<1x8x384xf32>
    %174 = vector.shape_cast %173 : vector<1x8x384xf32> to vector<8x384xf32>
    %175 = arith.select %18, %170, %174 : vector<8x384xi1>, vector<8x384xf32>
    %cst_65 = arith.constant dense<0.000000e+00> : vector<8x384xf32>
    %176 = tpu.matmul %158, %31, %cst_65 {dimension_numbers = #tpu.dot_dimension_numbers<[1], [0], [0], [1], [0, 0, 1, 1], [], []>} : vector<8x128xf32>, vector<128x384xf32>, vector<8x384xf32> -> vector<8x384xf32>
    %177 = arith.addf %176, %30 : vector<8x384xf32>
    %178 = vector.extract_strided_slice %175 {offsets = [0, 0], sizes = [8, 128], strides = [1, 1]} : vector<8x384xf32> to vector<8x128xf32>
    %179 = vector.extract_strided_slice %177 {offsets = [0, 0], sizes = [8, 128], strides = [1, 1]} : vector<8x384xf32> to vector<8x128xf32>
    %180 = arith.addf %178, %179 : vector<8x128xf32>
    %181 = arith.negf %180 : vector<8x128xf32>
    %182 = math.exp %181 : vector<8x128xf32>
    %cst_66 = arith.constant 1.000000e+00 : f32
    %183 = vector.broadcast %cst_66 : f32 to vector<8x128xf32>
    %184 = arith.addf %183, %182 : vector<8x128xf32>
    %185 = arith.divf %183, %184 : vector<8x128xf32>
    %186 = vector.extract_strided_slice %175 {offsets = [0, 128], sizes = [8, 128], strides = [1, 1]} : vector<8x384xf32> to vector<8x128xf32>
    %187 = vector.extract_strided_slice %177 {offsets = [0, 128], sizes = [8, 128], strides = [1, 1]} : vector<8x384xf32> to vector<8x128xf32>
    %188 = arith.addf %186, %187 : vector<8x128xf32>
    %189 = arith.negf %188 : vector<8x128xf32>
    %190 = math.exp %189 : vector<8x128xf32>
    %cst_67 = arith.constant 1.000000e+00 : f32
    %191 = vector.broadcast %cst_67 : f32 to vector<8x128xf32>
    %192 = arith.addf %191, %190 : vector<8x128xf32>
    %193 = arith.divf %191, %192 : vector<8x128xf32>
    %194 = vector.extract_strided_slice %175 {offsets = [0, 256], sizes = [8, 128], strides = [1, 1]} : vector<8x384xf32> to vector<8x128xf32>
    %195 = vector.extract_strided_slice %177 {offsets = [0, 256], sizes = [8, 128], strides = [1, 1]} : vector<8x384xf32> to vector<8x128xf32>
    %196 = arith.mulf %185, %195 : vector<8x128xf32>
    %197 = arith.addf %194, %196 : vector<8x128xf32>
    %198 = math.tanh %197 : vector<8x128xf32>
    %cst_68 = arith.constant 1.000000e+00 : f32
    %199 = vector.broadcast %cst_68 : f32 to vector<8x128xf32>
    %200 = arith.subf %199, %193 : vector<8x128xf32>
    %201 = arith.mulf %200, %198 : vector<8x128xf32>
    %202 = arith.mulf %193, %158 : vector<8x128xf32>
    %203 = arith.addf %201, %202 : vector<8x128xf32>
    %204 = arith.index_cast %c3_i32 : i32 to index
    %c0_69 = arith.constant 0 : index
    %c0_70 = arith.constant 0 : index
    %205 = vector.load %arg16[%204, %c0_69, %c0_70] : memref<8x8x128xf32, #tpu.memory_space<vmem>>, vector<1x8x128xf32>
    %206 = vector.shape_cast %205 : vector<1x8x128xf32> to vector<8x128xf32>
    %207 = vector.shape_cast %203 : vector<8x128xf32> to vector<1x8x128xf32>
    tpu.vector_store %arg16[%204, %c0_69, %c0_70], %207 {strides = array<i32>} : memref<8x8x128xf32, #tpu.memory_space<vmem>>, vector<1x8x128xf32>,
    %c7_i32_71 = arith.constant 7 : i32
    %208 = arith.subi %c7_i32_71, %c3_i32 : i32
    %209 = arith.index_cast %208 : i32 to index
    %c0_72 = arith.constant 0 : index
    %c0_73 = arith.constant 0 : index
    %210 = vector.load %arg17[%209, %c0_72, %c0_73] : memref<8x8x128xf32, #tpu.memory_space<vmem>>, vector<1x8x128xf32>
    %211 = vector.shape_cast %210 : vector<1x8x128xf32> to vector<8x128xf32>
    %212 = vector.shape_cast %203 : vector<8x128xf32> to vector<1x8x128xf32>
    tpu.vector_store %arg17[%209, %c0_72, %c0_73], %212 {strides = array<i32>} : memref<8x8x128xf32, #tpu.memory_space<vmem>>, vector<1x8x128xf32>,
    %c4_i32 = arith.constant 4 : i32
    %213 = arith.index_cast %c4_i32 : i32 to index
    %c0_74 = arith.constant 0 : index
    %c0_75 = arith.constant 0 : index
    %214 = vector.load %arg15[%213, %c0_74, %c0_75] : memref<8x8x384xf32, #tpu.memory_space<vmem>>, vector<1x8x384xf32>
    %215 = vector.shape_cast %214 : vector<1x8x384xf32> to vector<8x384xf32>
    %c7_i32_76 = arith.constant 7 : i32
    %216 = arith.subi %c7_i32_76, %c4_i32 : i32
    %217 = arith.index_cast %216 : i32 to index
    %c0_77 = arith.constant 0 : index
    %c0_78 = arith.constant 0 : index
    %218 = vector.load %arg15[%217, %c0_77, %c0_78] : memref<8x8x384xf32, #tpu.memory_space<vmem>>, vector<1x8x384xf32>
    %219 = vector.shape_cast %218 : vector<1x8x384xf32> to vector<8x384xf32>
    %220 = arith.select %18, %215, %219 : vector<8x384xi1>, vector<8x384xf32>
    %cst_79 = arith.constant dense<0.000000e+00> : vector<8x384xf32>
    %221 = tpu.matmul %203, %31, %cst_79 {dimension_numbers = #tpu.dot_dimension_numbers<[1], [0], [0], [1], [0, 0, 1, 1], [], []>} : vector<8x128xf32>, vector<128x384xf32>, vector<8x384xf32> -> vector<8x384xf32>
    %222 = arith.addf %221, %30 : vector<8x384xf32>
    %223 = vector.extract_strided_slice %220 {offsets = [0, 0], sizes = [8, 128], strides = [1, 1]} : vector<8x384xf32> to vector<8x128xf32>
    %224 = vector.extract_strided_slice %222 {offsets = [0, 0], sizes = [8, 128], strides = [1, 1]} : vector<8x384xf32> to vector<8x128xf32>
    %225 = arith.addf %223, %224 : vector<8x128xf32>
    %226 = arith.negf %225 : vector<8x128xf32>
    %227 = math.exp %226 : vector<8x128xf32>
    %cst_80 = arith.constant 1.000000e+00 : f32
    %228 = vector.broadcast %cst_80 : f32 to vector<8x128xf32>
    %229 = arith.addf %228, %227 : vector<8x128xf32>
    %230 = arith.divf %228, %229 : vector<8x128xf32>
    %231 = vector.extract_strided_slice %220 {offsets = [0, 128], sizes = [8, 128], strides = [1, 1]} : vector<8x384xf32> to vector<8x128xf32>
    %232 = vector.extract_strided_slice %222 {offsets = [0, 128], sizes = [8, 128], strides = [1, 1]} : vector<8x384xf32> to vector<8x128xf32>
    %233 = arith.addf %231, %232 : vector<8x128xf32>
    %234 = arith.negf %233 : vector<8x128xf32>
    %235 = math.exp %234 : vector<8x128xf32>
    %cst_81 = arith.constant 1.000000e+00 : f32
    %236 = vector.broadcast %cst_81 : f32 to vector<8x128xf32>
    %237 = arith.addf %236, %235 : vector<8x128xf32>
    %238 = arith.divf %236, %237 : vector<8x128xf32>
    %239 = vector.extract_strided_slice %220 {offsets = [0, 256], sizes = [8, 128], strides = [1, 1]} : vector<8x384xf32> to vector<8x128xf32>
    %240 = vector.extract_strided_slice %222 {offsets = [0, 256], sizes = [8, 128], strides = [1, 1]} : vector<8x384xf32> to vector<8x128xf32>
    %241 = arith.mulf %230, %240 : vector<8x128xf32>
    %242 = arith.addf %239, %241 : vector<8x128xf32>
    %243 = math.tanh %242 : vector<8x128xf32>
    %cst_82 = arith.constant 1.000000e+00 : f32
    %244 = vector.broadcast %cst_82 : f32 to vector<8x128xf32>
    %245 = arith.subf %244, %238 : vector<8x128xf32>
    %246 = arith.mulf %245, %243 : vector<8x128xf32>
    %247 = arith.mulf %238, %203 : vector<8x128xf32>
    %248 = arith.addf %246, %247 : vector<8x128xf32>
    %249 = arith.index_cast %c4_i32 : i32 to index
    %c0_83 = arith.constant 0 : index
    %c0_84 = arith.constant 0 : index
    %250 = vector.load %arg16[%249, %c0_83, %c0_84] : memref<8x8x128xf32, #tpu.memory_space<vmem>>, vector<1x8x128xf32>
    %251 = vector.shape_cast %250 : vector<1x8x128xf32> to vector<8x128xf32>
    %252 = vector.shape_cast %248 : vector<8x128xf32> to vector<1x8x128xf32>
    tpu.vector_store %arg16[%249, %c0_83, %c0_84], %252 {strides = array<i32>} : memref<8x8x128xf32, #tpu.memory_space<vmem>>, vector<1x8x128xf32>,
    %c7_i32_85 = arith.constant 7 : i32
    %253 = arith.subi %c7_i32_85, %c4_i32 : i32
    %254 = arith.index_cast %253 : i32 to index
    %c0_86 = arith.constant 0 : index
    %c0_87 = arith.constant 0 : index
    %255 = vector.load %arg17[%254, %c0_86, %c0_87] : memref<8x8x128xf32, #tpu.memory_space<vmem>>, vector<1x8x128xf32>
    %256 = vector.shape_cast %255 : vector<1x8x128xf32> to vector<8x128xf32>
    %257 = vector.shape_cast %248 : vector<8x128xf32> to vector<1x8x128xf32>
    tpu.vector_store %arg17[%254, %c0_86, %c0_87], %257 {strides = array<i32>} : memref<8x8x128xf32, #tpu.memory_space<vmem>>, vector<1x8x128xf32>,
    %c5_i32 = arith.constant 5 : i32
    %258 = arith.index_cast %c5_i32 : i32 to index
    %c0_88 = arith.constant 0 : index
    %c0_89 = arith.constant 0 : index
    %259 = vector.load %arg15[%258, %c0_88, %c0_89] : memref<8x8x384xf32, #tpu.memory_space<vmem>>, vector<1x8x384xf32>
    %260 = vector.shape_cast %259 : vector<1x8x384xf32> to vector<8x384xf32>
    %c7_i32_90 = arith.constant 7 : i32
    %261 = arith.subi %c7_i32_90, %c5_i32 : i32
    %262 = arith.index_cast %261 : i32 to index
    %c0_91 = arith.constant 0 : index
    %c0_92 = arith.constant 0 : index
    %263 = vector.load %arg15[%262, %c0_91, %c0_92] : memref<8x8x384xf32, #tpu.memory_space<vmem>>, vector<1x8x384xf32>
    %264 = vector.shape_cast %263 : vector<1x8x384xf32> to vector<8x384xf32>
    %265 = arith.select %18, %260, %264 : vector<8x384xi1>, vector<8x384xf32>
    %cst_93 = arith.constant dense<0.000000e+00> : vector<8x384xf32>
    %266 = tpu.matmul %248, %31, %cst_93 {dimension_numbers = #tpu.dot_dimension_numbers<[1], [0], [0], [1], [0, 0, 1, 1], [], []>} : vector<8x128xf32>, vector<128x384xf32>, vector<8x384xf32> -> vector<8x384xf32>
    %267 = arith.addf %266, %30 : vector<8x384xf32>
    %268 = vector.extract_strided_slice %265 {offsets = [0, 0], sizes = [8, 128], strides = [1, 1]} : vector<8x384xf32> to vector<8x128xf32>
    %269 = vector.extract_strided_slice %267 {offsets = [0, 0], sizes = [8, 128], strides = [1, 1]} : vector<8x384xf32> to vector<8x128xf32>
    %270 = arith.addf %268, %269 : vector<8x128xf32>
    %271 = arith.negf %270 : vector<8x128xf32>
    %272 = math.exp %271 : vector<8x128xf32>
    %cst_94 = arith.constant 1.000000e+00 : f32
    %273 = vector.broadcast %cst_94 : f32 to vector<8x128xf32>
    %274 = arith.addf %273, %272 : vector<8x128xf32>
    %275 = arith.divf %273, %274 : vector<8x128xf32>
    %276 = vector.extract_strided_slice %265 {offsets = [0, 128], sizes = [8, 128], strides = [1, 1]} : vector<8x384xf32> to vector<8x128xf32>
    %277 = vector.extract_strided_slice %267 {offsets = [0, 128], sizes = [8, 128], strides = [1, 1]} : vector<8x384xf32> to vector<8x128xf32>
    %278 = arith.addf %276, %277 : vector<8x128xf32>
    %279 = arith.negf %278 : vector<8x128xf32>
    %280 = math.exp %279 : vector<8x128xf32>
    %cst_95 = arith.constant 1.000000e+00 : f32
    %281 = vector.broadcast %cst_95 : f32 to vector<8x128xf32>
    %282 = arith.addf %281, %280 : vector<8x128xf32>
    %283 = arith.divf %281, %282 : vector<8x128xf32>
    %284 = vector.extract_strided_slice %265 {offsets = [0, 256], sizes = [8, 128], strides = [1, 1]} : vector<8x384xf32> to vector<8x128xf32>
    %285 = vector.extract_strided_slice %267 {offsets = [0, 256], sizes = [8, 128], strides = [1, 1]} : vector<8x384xf32> to vector<8x128xf32>
    %286 = arith.mulf %275, %285 : vector<8x128xf32>
    %287 = arith.addf %284, %286 : vector<8x128xf32>
    %288 = math.tanh %287 : vector<8x128xf32>
    %cst_96 = arith.constant 1.000000e+00 : f32
    %289 = vector.broadcast %cst_96 : f32 to vector<8x128xf32>
    %290 = arith.subf %289, %283 : vector<8x128xf32>
    %291 = arith.mulf %290, %288 : vector<8x128xf32>
    %292 = arith.mulf %283, %248 : vector<8x128xf32>
    %293 = arith.addf %291, %292 : vector<8x128xf32>
    %294 = arith.index_cast %c5_i32 : i32 to index
    %c0_97 = arith.constant 0 : index
    %c0_98 = arith.constant 0 : index
    %295 = vector.load %arg16[%294, %c0_97, %c0_98] : memref<8x8x128xf32, #tpu.memory_space<vmem>>, vector<1x8x128xf32>
    %296 = vector.shape_cast %295 : vector<1x8x128xf32> to vector<8x128xf32>
    %297 = vector.shape_cast %293 : vector<8x128xf32> to vector<1x8x128xf32>
    tpu.vector_store %arg16[%294, %c0_97, %c0_98], %297 {strides = array<i32>} : memref<8x8x128xf32, #tpu.memory_space<vmem>>, vector<1x8x128xf32>,
    %c7_i32_99 = arith.constant 7 : i32
    %298 = arith.subi %c7_i32_99, %c5_i32 : i32
    %299 = arith.index_cast %298 : i32 to index
    %c0_100 = arith.constant 0 : index
    %c0_101 = arith.constant 0 : index
    %300 = vector.load %arg17[%299, %c0_100, %c0_101] : memref<8x8x128xf32, #tpu.memory_space<vmem>>, vector<1x8x128xf32>
    %301 = vector.shape_cast %300 : vector<1x8x128xf32> to vector<8x128xf32>
    %302 = vector.shape_cast %293 : vector<8x128xf32> to vector<1x8x128xf32>
    tpu.vector_store %arg17[%299, %c0_100, %c0_101], %302 {strides = array<i32>} : memref<8x8x128xf32, #tpu.memory_space<vmem>>, vector<1x8x128xf32>,
    %c6_i32 = arith.constant 6 : i32
    %303 = arith.index_cast %c6_i32 : i32 to index
    %c0_102 = arith.constant 0 : index
    %c0_103 = arith.constant 0 : index
    %304 = vector.load %arg15[%303, %c0_102, %c0_103] : memref<8x8x384xf32, #tpu.memory_space<vmem>>, vector<1x8x384xf32>
    %305 = vector.shape_cast %304 : vector<1x8x384xf32> to vector<8x384xf32>
    %c7_i32_104 = arith.constant 7 : i32
    %306 = arith.subi %c7_i32_104, %c6_i32 : i32
    %307 = arith.index_cast %306 : i32 to index
    %c0_105 = arith.constant 0 : index
    %c0_106 = arith.constant 0 : index
    %308 = vector.load %arg15[%307, %c0_105, %c0_106] : memref<8x8x384xf32, #tpu.memory_space<vmem>>, vector<1x8x384xf32>
    %309 = vector.shape_cast %308 : vector<1x8x384xf32> to vector<8x384xf32>
    %310 = arith.select %18, %305, %309 : vector<8x384xi1>, vector<8x384xf32>
    %cst_107 = arith.constant dense<0.000000e+00> : vector<8x384xf32>
    %311 = tpu.matmul %293, %31, %cst_107 {dimension_numbers = #tpu.dot_dimension_numbers<[1], [0], [0], [1], [0, 0, 1, 1], [], []>} : vector<8x128xf32>, vector<128x384xf32>, vector<8x384xf32> -> vector<8x384xf32>
    %312 = arith.addf %311, %30 : vector<8x384xf32>
    %313 = vector.extract_strided_slice %310 {offsets = [0, 0], sizes = [8, 128], strides = [1, 1]} : vector<8x384xf32> to vector<8x128xf32>
    %314 = vector.extract_strided_slice %312 {offsets = [0, 0], sizes = [8, 128], strides = [1, 1]} : vector<8x384xf32> to vector<8x128xf32>
    %315 = arith.addf %313, %314 : vector<8x128xf32>
    %316 = arith.negf %315 : vector<8x128xf32>
    %317 = math.exp %316 : vector<8x128xf32>
    %cst_108 = arith.constant 1.000000e+00 : f32
    %318 = vector.broadcast %cst_108 : f32 to vector<8x128xf32>
    %319 = arith.addf %318, %317 : vector<8x128xf32>
    %320 = arith.divf %318, %319 : vector<8x128xf32>
    %321 = vector.extract_strided_slice %310 {offsets = [0, 128], sizes = [8, 128], strides = [1, 1]} : vector<8x384xf32> to vector<8x128xf32>
    %322 = vector.extract_strided_slice %312 {offsets = [0, 128], sizes = [8, 128], strides = [1, 1]} : vector<8x384xf32> to vector<8x128xf32>
    %323 = arith.addf %321, %322 : vector<8x128xf32>
    %324 = arith.negf %323 : vector<8x128xf32>
    %325 = math.exp %324 : vector<8x128xf32>
    %cst_109 = arith.constant 1.000000e+00 : f32
    %326 = vector.broadcast %cst_109 : f32 to vector<8x128xf32>
    %327 = arith.addf %326, %325 : vector<8x128xf32>
    %328 = arith.divf %326, %327 : vector<8x128xf32>
    %329 = vector.extract_strided_slice %310 {offsets = [0, 256], sizes = [8, 128], strides = [1, 1]} : vector<8x384xf32> to vector<8x128xf32>
    %330 = vector.extract_strided_slice %312 {offsets = [0, 256], sizes = [8, 128], strides = [1, 1]} : vector<8x384xf32> to vector<8x128xf32>
    %331 = arith.mulf %320, %330 : vector<8x128xf32>
    %332 = arith.addf %329, %331 : vector<8x128xf32>
    %333 = math.tanh %332 : vector<8x128xf32>
    %cst_110 = arith.constant 1.000000e+00 : f32
    %334 = vector.broadcast %cst_110 : f32 to vector<8x128xf32>
    %335 = arith.subf %334, %328 : vector<8x128xf32>
    %336 = arith.mulf %335, %333 : vector<8x128xf32>
    %337 = arith.mulf %328, %293 : vector<8x128xf32>
    %338 = arith.addf %336, %337 : vector<8x128xf32>
    %339 = arith.index_cast %c6_i32 : i32 to index
    %c0_111 = arith.constant 0 : index
    %c0_112 = arith.constant 0 : index
    %340 = vector.load %arg16[%339, %c0_111, %c0_112] : memref<8x8x128xf32, #tpu.memory_space<vmem>>, vector<1x8x128xf32>
    %341 = vector.shape_cast %340 : vector<1x8x128xf32> to vector<8x128xf32>
    %342 = vector.shape_cast %338 : vector<8x128xf32> to vector<1x8x128xf32>
    tpu.vector_store %arg16[%339, %c0_111, %c0_112], %342 {strides = array<i32>} : memref<8x8x128xf32, #tpu.memory_space<vmem>>, vector<1x8x128xf32>,
    %c7_i32_113 = arith.constant 7 : i32
    %343 = arith.subi %c7_i32_113, %c6_i32 : i32
    %344 = arith.index_cast %343 : i32 to index
    %c0_114 = arith.constant 0 : index
    %c0_115 = arith.constant 0 : index
    %345 = vector.load %arg17[%344, %c0_114, %c0_115] : memref<8x8x128xf32, #tpu.memory_space<vmem>>, vector<1x8x128xf32>
    %346 = vector.shape_cast %345 : vector<1x8x128xf32> to vector<8x128xf32>
    %347 = vector.shape_cast %338 : vector<8x128xf32> to vector<1x8x128xf32>
    tpu.vector_store %arg17[%344, %c0_114, %c0_115], %347 {strides = array<i32>} : memref<8x8x128xf32, #tpu.memory_space<vmem>>, vector<1x8x128xf32>,
    %c7_i32_116 = arith.constant 7 : i32
    %348 = arith.index_cast %c7_i32_116 : i32 to index
    %c0_117 = arith.constant 0 : index
    %c0_118 = arith.constant 0 : index
    %349 = vector.load %arg15[%348, %c0_117, %c0_118] : memref<8x8x384xf32, #tpu.memory_space<vmem>>, vector<1x8x384xf32>
    %350 = vector.shape_cast %349 : vector<1x8x384xf32> to vector<8x384xf32>
    %c7_i32_119 = arith.constant 7 : i32
    %351 = arith.subi %c7_i32_119, %c7_i32_116 : i32
    %352 = arith.index_cast %351 : i32 to index
    %c0_120 = arith.constant 0 : index
    %c0_121 = arith.constant 0 : index
    %353 = vector.load %arg15[%352, %c0_120, %c0_121] : memref<8x8x384xf32, #tpu.memory_space<vmem>>, vector<1x8x384xf32>
    %354 = vector.shape_cast %353 : vector<1x8x384xf32> to vector<8x384xf32>
    %355 = arith.select %18, %350, %354 : vector<8x384xi1>, vector<8x384xf32>
    %cst_122 = arith.constant dense<0.000000e+00> : vector<8x384xf32>
    %356 = tpu.matmul %338, %31, %cst_122 {dimension_numbers = #tpu.dot_dimension_numbers<[1], [0], [0], [1], [0, 0, 1, 1], [], []>} : vector<8x128xf32>, vector<128x384xf32>, vector<8x384xf32> -> vector<8x384xf32>
    %357 = arith.addf %356, %30 : vector<8x384xf32>
    %358 = vector.extract_strided_slice %355 {offsets = [0, 0], sizes = [8, 128], strides = [1, 1]} : vector<8x384xf32> to vector<8x128xf32>
    %359 = vector.extract_strided_slice %357 {offsets = [0, 0], sizes = [8, 128], strides = [1, 1]} : vector<8x384xf32> to vector<8x128xf32>
    %360 = arith.addf %358, %359 : vector<8x128xf32>
    %361 = arith.negf %360 : vector<8x128xf32>
    %362 = math.exp %361 : vector<8x128xf32>
    %cst_123 = arith.constant 1.000000e+00 : f32
    %363 = vector.broadcast %cst_123 : f32 to vector<8x128xf32>
    %364 = arith.addf %363, %362 : vector<8x128xf32>
    %365 = arith.divf %363, %364 : vector<8x128xf32>
    %366 = vector.extract_strided_slice %355 {offsets = [0, 128], sizes = [8, 128], strides = [1, 1]} : vector<8x384xf32> to vector<8x128xf32>
    %367 = vector.extract_strided_slice %357 {offsets = [0, 128], sizes = [8, 128], strides = [1, 1]} : vector<8x384xf32> to vector<8x128xf32>
    %368 = arith.addf %366, %367 : vector<8x128xf32>
    %369 = arith.negf %368 : vector<8x128xf32>
    %370 = math.exp %369 : vector<8x128xf32>
    %cst_124 = arith.constant 1.000000e+00 : f32
    %371 = vector.broadcast %cst_124 : f32 to vector<8x128xf32>
    %372 = arith.addf %371, %370 : vector<8x128xf32>
    %373 = arith.divf %371, %372 : vector<8x128xf32>
    %374 = vector.extract_strided_slice %355 {offsets = [0, 256], sizes = [8, 128], strides = [1, 1]} : vector<8x384xf32> to vector<8x128xf32>
    %375 = vector.extract_strided_slice %357 {offsets = [0, 256], sizes = [8, 128], strides = [1, 1]} : vector<8x384xf32> to vector<8x128xf32>
    %376 = arith.mulf %365, %375 : vector<8x128xf32>
    %377 = arith.addf %374, %376 : vector<8x128xf32>
    %378 = math.tanh %377 : vector<8x128xf32>
    %cst_125 = arith.constant 1.000000e+00 : f32
    %379 = vector.broadcast %cst_125 : f32 to vector<8x128xf32>
    %380 = arith.subf %379, %373 : vector<8x128xf32>
    %381 = arith.mulf %380, %378 : vector<8x128xf32>
    %382 = arith.mulf %373, %338 : vector<8x128xf32>
    %383 = arith.addf %381, %382 : vector<8x128xf32>
    %384 = arith.index_cast %c7_i32_116 : i32 to index
    %c0_126 = arith.constant 0 : index
    %c0_127 = arith.constant 0 : index
    %385 = vector.load %arg16[%384, %c0_126, %c0_127] : memref<8x8x128xf32, #tpu.memory_space<vmem>>, vector<1x8x128xf32>
    %386 = vector.shape_cast %385 : vector<1x8x128xf32> to vector<8x128xf32>
    %387 = vector.shape_cast %383 : vector<8x128xf32> to vector<1x8x128xf32>
    tpu.vector_store %arg16[%384, %c0_126, %c0_127], %387 {strides = array<i32>} : memref<8x8x128xf32, #tpu.memory_space<vmem>>, vector<1x8x128xf32>,
    %c7_i32_128 = arith.constant 7 : i32
    %388 = arith.subi %c7_i32_128, %c7_i32_116 : i32
    %389 = arith.index_cast %388 : i32 to index
    %c0_129 = arith.constant 0 : index
    %c0_130 = arith.constant 0 : index
    %390 = vector.load %arg17[%389, %c0_129, %c0_130] : memref<8x8x128xf32, #tpu.memory_space<vmem>>, vector<1x8x128xf32>
    %391 = vector.shape_cast %390 : vector<1x8x128xf32> to vector<8x128xf32>
    %392 = vector.shape_cast %383 : vector<8x128xf32> to vector<1x8x128xf32>
    tpu.vector_store %arg17[%389, %c0_129, %c0_130], %392 {strides = array<i32>} : memref<8x8x128xf32, #tpu.memory_space<vmem>>, vector<1x8x128xf32>,
    %c8_i32 = arith.constant 8 : i32
    %c0_131 = arith.constant 0 : index
    %c0_132 = arith.constant 0 : index
    %c0_133 = arith.constant 0 : index
    %393 = vector.load %arg16[%c0_131, %c0_132, %c0_133] : memref<8x8x128xf32, #tpu.memory_space<vmem>>, vector<8x8x128xf32>
    %394 = vector.shape_cast %393 : vector<8x8x128xf32> to vector<64x128xf32>
    %c0_134 = arith.constant 0 : index
    %c0_135 = arith.constant 0 : index
    %c0_136 = arith.constant 0 : index
    %395 = vector.load %arg17[%c0_134, %c0_135, %c0_136] : memref<8x8x128xf32, #tpu.memory_space<vmem>>, vector<8x8x128xf32>
    %396 = vector.shape_cast %395 : vector<8x8x128xf32> to vector<64x128xf32>
    %c0_137 = arith.constant 0 : index
    %c0_138 = arith.constant 0 : index
    %397 = vector.load %arg5[%c0_137, %c0_138] : memref<128x384xf32, #tpu.memory_space<vmem>>, vector<128x384xf32>
    %cst_139 = arith.constant dense<0.000000e+00> : vector<64x384xf32>
    %398 = tpu.matmul %394, %397, %cst_139 {dimension_numbers = #tpu.dot_dimension_numbers<[1], [0], [0], [1], [0, 0, 1, 1], [], []>} : vector<64x128xf32>, vector<128x384xf32>, vector<64x384xf32> -> vector<64x384xf32>
    %c0_140 = arith.constant 0 : index
    %c0_141 = arith.constant 0 : index
    %399 = vector.load %arg6[%c0_140, %c0_141] : memref<128x384xf32, #tpu.memory_space<vmem>>, vector<128x384xf32>
    %cst_142 = arith.constant dense<0.000000e+00> : vector<64x384xf32>
    %400 = tpu.matmul %396, %399, %cst_142 {dimension_numbers = #tpu.dot_dimension_numbers<[1], [0], [0], [1], [0, 0, 1, 1], [], []>} : vector<64x128xf32>, vector<128x384xf32>, vector<64x384xf32> -> vector<64x384xf32>
    %401 = arith.addf %398, %400 : vector<64x384xf32>
    %c0_143 = arith.constant 0 : index
    %c0_144 = arith.constant 0 : index
    %402 = vector.load %arg8[%c0_143, %c0_144] : memref<1x384xf32, #tpu.memory_space<vmem>>, vector<1x384xf32>
    %403 = vector.broadcast %402 : vector<1x384xf32> to vector<64x384xf32>
    %404 = arith.addf %401, %403 : vector<64x384xf32>
    %405 = vector.shape_cast %404 : vector<64x384xf32> to vector<8x8x384xf32>
    %c0_145 = arith.constant 0 : index
    %c0_146 = arith.constant 0 : index
    %c0_147 = arith.constant 0 : index
    %406 = vector.load %arg15[%c0_145, %c0_146, %c0_147] : memref<8x8x384xf32, #tpu.memory_space<vmem>>, vector<8x8x384xf32>
    tpu.vector_store %arg15[%c0_145, %c0_146, %c0_147], %405 {strides = array<i32>} : memref<8x8x384xf32, #tpu.memory_space<vmem>>, vector<8x8x384xf32>,
    %c0_148 = arith.constant 0 : index
    %c0_149 = arith.constant 0 : index
    %407 = vector.load %arg9[%c0_148, %c0_149] : memref<1x384xf32, #tpu.memory_space<vmem>>, vector<1x384xf32>
    %408 = vector.shape_cast %407 : vector<1x384xf32> to vector<1x384xf32>
    %409 = vector.broadcast %408 : vector<1x384xf32> to vector<8x384xf32>
    %c0_150 = arith.constant 0 : index
    %c0_151 = arith.constant 0 : index
    %410 = vector.load %arg7[%c0_150, %c0_151] : memref<128x384xf32, #tpu.memory_space<vmem>>, vector<128x384xf32>
    %cst_152 = arith.constant 0.000000e+00 : f32
    %411 = vector.broadcast %cst_152 : f32 to vector<8x128xf32>
    %c0_i32_153 = arith.constant 0 : i32
    %412 = arith.index_cast %c0_i32_153 : i32 to index
    %c0_154 = arith.constant 0 : index
    %c0_155 = arith.constant 0 : index
    %413 = vector.load %arg15[%412, %c0_154, %c0_155] : memref<8x8x384xf32, #tpu.memory_space<vmem>>, vector<1x8x384xf32>
    %414 = vector.shape_cast %413 : vector<1x8x384xf32> to vector<8x384xf32>
    %c7_i32_156 = arith.constant 7 : i32
    %415 = arith.subi %c7_i32_156, %c0_i32_153 : i32
    %416 = arith.index_cast %415 : i32 to index
    %c0_157 = arith.constant 0 : index
    %c0_158 = arith.constant 0 : index
    %417 = vector.load %arg15[%416, %c0_157, %c0_158] : memref<8x8x384xf32, #tpu.memory_space<vmem>>, vector<1x8x384xf32>
    %418 = vector.shape_cast %417 : vector<1x8x384xf32> to vector<8x384xf32>
    %419 = arith.select %18, %414, %418 : vector<8x384xi1>, vector<8x384xf32>
    %cst_159 = arith.constant dense<0.000000e+00> : vector<8x384xf32>
    %420 = tpu.matmul %411, %410, %cst_159 {dimension_numbers = #tpu.dot_dimension_numbers<[1], [0], [0], [1], [0, 0, 1, 1], [], []>} : vector<8x128xf32>, vector<128x384xf32>, vector<8x384xf32> -> vector<8x384xf32>
    %421 = arith.addf %420, %409 : vector<8x384xf32>
    %422 = vector.extract_strided_slice %419 {offsets = [0, 0], sizes = [8, 128], strides = [1, 1]} : vector<8x384xf32> to vector<8x128xf32>
    %423 = vector.extract_strided_slice %421 {offsets = [0, 0], sizes = [8, 128], strides = [1, 1]} : vector<8x384xf32> to vector<8x128xf32>
    %424 = arith.addf %422, %423 : vector<8x128xf32>
    %425 = arith.negf %424 : vector<8x128xf32>
    %426 = math.exp %425 : vector<8x128xf32>
    %cst_160 = arith.constant 1.000000e+00 : f32
    %427 = vector.broadcast %cst_160 : f32 to vector<8x128xf32>
    %428 = arith.addf %427, %426 : vector<8x128xf32>
    %429 = arith.divf %427, %428 : vector<8x128xf32>
    %430 = vector.extract_strided_slice %419 {offsets = [0, 128], sizes = [8, 128], strides = [1, 1]} : vector<8x384xf32> to vector<8x128xf32>
    %431 = vector.extract_strided_slice %421 {offsets = [0, 128], sizes = [8, 128], strides = [1, 1]} : vector<8x384xf32> to vector<8x128xf32>
    %432 = arith.addf %430, %431 : vector<8x128xf32>
    %433 = arith.negf %432 : vector<8x128xf32>
    %434 = math.exp %433 : vector<8x128xf32>
    %cst_161 = arith.constant 1.000000e+00 : f32
    %435 = vector.broadcast %cst_161 : f32 to vector<8x128xf32>
    %436 = arith.addf %435, %434 : vector<8x128xf32>
    %437 = arith.divf %435, %436 : vector<8x128xf32>
    %438 = vector.extract_strided_slice %419 {offsets = [0, 256], sizes = [8, 128], strides = [1, 1]} : vector<8x384xf32> to vector<8x128xf32>
    %439 = vector.extract_strided_slice %421 {offsets = [0, 256], sizes = [8, 128], strides = [1, 1]} : vector<8x384xf32> to vector<8x128xf32>
    %440 = arith.mulf %429, %439 : vector<8x128xf32>
    %441 = arith.addf %438, %440 : vector<8x128xf32>
    %442 = math.tanh %441 : vector<8x128xf32>
    %cst_162 = arith.constant 1.000000e+00 : f32
    %443 = vector.broadcast %cst_162 : f32 to vector<8x128xf32>
    %444 = arith.subf %443, %437 : vector<8x128xf32>
    %445 = arith.mulf %444, %442 : vector<8x128xf32>
    %446 = arith.mulf %437, %411 : vector<8x128xf32>
    %447 = arith.addf %445, %446 : vector<8x128xf32>
    %c1_i32_163 = arith.constant 1 : i32
    %448 = arith.index_cast %c1_i32_163 : i32 to index
    %c0_164 = arith.constant 0 : index
    %c0_165 = arith.constant 0 : index
    %449 = vector.load %arg15[%448, %c0_164, %c0_165] : memref<8x8x384xf32, #tpu.memory_space<vmem>>, vector<1x8x384xf32>
    %450 = vector.shape_cast %449 : vector<1x8x384xf32> to vector<8x384xf32>
    %c7_i32_166 = arith.constant 7 : i32
    %451 = arith.subi %c7_i32_166, %c1_i32_163 : i32
    %452 = arith.index_cast %451 : i32 to index
    %c0_167 = arith.constant 0 : index
    %c0_168 = arith.constant 0 : index
    %453 = vector.load %arg15[%452, %c0_167, %c0_168] : memref<8x8x384xf32, #tpu.memory_space<vmem>>, vector<1x8x384xf32>
    %454 = vector.shape_cast %453 : vector<1x8x384xf32> to vector<8x384xf32>
    %455 = arith.select %18, %450, %454 : vector<8x384xi1>, vector<8x384xf32>
    %cst_169 = arith.constant dense<0.000000e+00> : vector<8x384xf32>
    %456 = tpu.matmul %447, %410, %cst_169 {dimension_numbers = #tpu.dot_dimension_numbers<[1], [0], [0], [1], [0, 0, 1, 1], [], []>} : vector<8x128xf32>, vector<128x384xf32>, vector<8x384xf32> -> vector<8x384xf32>
    %457 = arith.addf %456, %409 : vector<8x384xf32>
    %458 = vector.extract_strided_slice %455 {offsets = [0, 0], sizes = [8, 128], strides = [1, 1]} : vector<8x384xf32> to vector<8x128xf32>
    %459 = vector.extract_strided_slice %457 {offsets = [0, 0], sizes = [8, 128], strides = [1, 1]} : vector<8x384xf32> to vector<8x128xf32>
    %460 = arith.addf %458, %459 : vector<8x128xf32>
    %461 = arith.negf %460 : vector<8x128xf32>
    %462 = math.exp %461 : vector<8x128xf32>
    %cst_170 = arith.constant 1.000000e+00 : f32
    %463 = vector.broadcast %cst_170 : f32 to vector<8x128xf32>
    %464 = arith.addf %463, %462 : vector<8x128xf32>
    %465 = arith.divf %463, %464 : vector<8x128xf32>
    %466 = vector.extract_strided_slice %455 {offsets = [0, 128], sizes = [8, 128], strides = [1, 1]} : vector<8x384xf32> to vector<8x128xf32>
    %467 = vector.extract_strided_slice %457 {offsets = [0, 128], sizes = [8, 128], strides = [1, 1]} : vector<8x384xf32> to vector<8x128xf32>
    %468 = arith.addf %466, %467 : vector<8x128xf32>
    %469 = arith.negf %468 : vector<8x128xf32>
    %470 = math.exp %469 : vector<8x128xf32>
    %cst_171 = arith.constant 1.000000e+00 : f32
    %471 = vector.broadcast %cst_171 : f32 to vector<8x128xf32>
    %472 = arith.addf %471, %470 : vector<8x128xf32>
    %473 = arith.divf %471, %472 : vector<8x128xf32>
    %474 = vector.extract_strided_slice %455 {offsets = [0, 256], sizes = [8, 128], strides = [1, 1]} : vector<8x384xf32> to vector<8x128xf32>
    %475 = vector.extract_strided_slice %457 {offsets = [0, 256], sizes = [8, 128], strides = [1, 1]} : vector<8x384xf32> to vector<8x128xf32>
    %476 = arith.mulf %465, %475 : vector<8x128xf32>
    %477 = arith.addf %474, %476 : vector<8x128xf32>
    %478 = math.tanh %477 : vector<8x128xf32>
    %cst_172 = arith.constant 1.000000e+00 : f32
    %479 = vector.broadcast %cst_172 : f32 to vector<8x128xf32>
    %480 = arith.subf %479, %473 : vector<8x128xf32>
    %481 = arith.mulf %480, %478 : vector<8x128xf32>
    %482 = arith.mulf %473, %447 : vector<8x128xf32>
    %483 = arith.addf %481, %482 : vector<8x128xf32>
    %c2_i32_173 = arith.constant 2 : i32
    %484 = arith.index_cast %c2_i32_173 : i32 to index
    %c0_174 = arith.constant 0 : index
    %c0_175 = arith.constant 0 : index
    %485 = vector.load %arg15[%484, %c0_174, %c0_175] : memref<8x8x384xf32, #tpu.memory_space<vmem>>, vector<1x8x384xf32>
    %486 = vector.shape_cast %485 : vector<1x8x384xf32> to vector<8x384xf32>
    %c7_i32_176 = arith.constant 7 : i32
    %487 = arith.subi %c7_i32_176, %c2_i32_173 : i32
    %488 = arith.index_cast %487 : i32 to index
    %c0_177 = arith.constant 0 : index
    %c0_178 = arith.constant 0 : index
    %489 = vector.load %arg15[%488, %c0_177, %c0_178] : memref<8x8x384xf32, #tpu.memory_space<vmem>>, vector<1x8x384xf32>
    %490 = vector.shape_cast %489 : vector<1x8x384xf32> to vector<8x384xf32>
    %491 = arith.select %18, %486, %490 : vector<8x384xi1>, vector<8x384xf32>
    %cst_179 = arith.constant dense<0.000000e+00> : vector<8x384xf32>
    %492 = tpu.matmul %483, %410, %cst_179 {dimension_numbers = #tpu.dot_dimension_numbers<[1], [0], [0], [1], [0, 0, 1, 1], [], []>} : vector<8x128xf32>, vector<128x384xf32>, vector<8x384xf32> -> vector<8x384xf32>
    %493 = arith.addf %492, %409 : vector<8x384xf32>
    %494 = vector.extract_strided_slice %491 {offsets = [0, 0], sizes = [8, 128], strides = [1, 1]} : vector<8x384xf32> to vector<8x128xf32>
    %495 = vector.extract_strided_slice %493 {offsets = [0, 0], sizes = [8, 128], strides = [1, 1]} : vector<8x384xf32> to vector<8x128xf32>
    %496 = arith.addf %494, %495 : vector<8x128xf32>
    %497 = arith.negf %496 : vector<8x128xf32>
    %498 = math.exp %497 : vector<8x128xf32>
    %cst_180 = arith.constant 1.000000e+00 : f32
    %499 = vector.broadcast %cst_180 : f32 to vector<8x128xf32>
    %500 = arith.addf %499, %498 : vector<8x128xf32>
    %501 = arith.divf %499, %500 : vector<8x128xf32>
    %502 = vector.extract_strided_slice %491 {offsets = [0, 128], sizes = [8, 128], strides = [1, 1]} : vector<8x384xf32> to vector<8x128xf32>
    %503 = vector.extract_strided_slice %493 {offsets = [0, 128], sizes = [8, 128], strides = [1, 1]} : vector<8x384xf32> to vector<8x128xf32>
    %504 = arith.addf %502, %503 : vector<8x128xf32>
    %505 = arith.negf %504 : vector<8x128xf32>
    %506 = math.exp %505 : vector<8x128xf32>
    %cst_181 = arith.constant 1.000000e+00 : f32
    %507 = vector.broadcast %cst_181 : f32 to vector<8x128xf32>
    %508 = arith.addf %507, %506 : vector<8x128xf32>
    %509 = arith.divf %507, %508 : vector<8x128xf32>
    %510 = vector.extract_strided_slice %491 {offsets = [0, 256], sizes = [8, 128], strides = [1, 1]} : vector<8x384xf32> to vector<8x128xf32>
    %511 = vector.extract_strided_slice %493 {offsets = [0, 256], sizes = [8, 128], strides = [1, 1]} : vector<8x384xf32> to vector<8x128xf32>
    %512 = arith.mulf %501, %511 : vector<8x128xf32>
    %513 = arith.addf %510, %512 : vector<8x128xf32>
    %514 = math.tanh %513 : vector<8x128xf32>
    %cst_182 = arith.constant 1.000000e+00 : f32
    %515 = vector.broadcast %cst_182 : f32 to vector<8x128xf32>
    %516 = arith.subf %515, %509 : vector<8x128xf32>
    %517 = arith.mulf %516, %514 : vector<8x128xf32>
    %518 = arith.mulf %509, %483 : vector<8x128xf32>
    %519 = arith.addf %517, %518 : vector<8x128xf32>
    %c3_i32_183 = arith.constant 3 : i32
    %520 = arith.index_cast %c3_i32_183 : i32 to index
    %c0_184 = arith.constant 0 : index
    %c0_185 = arith.constant 0 : index
    %521 = vector.load %arg15[%520, %c0_184, %c0_185] : memref<8x8x384xf32, #tpu.memory_space<vmem>>, vector<1x8x384xf32>
    %522 = vector.shape_cast %521 : vector<1x8x384xf32> to vector<8x384xf32>
    %c7_i32_186 = arith.constant 7 : i32
    %523 = arith.subi %c7_i32_186, %c3_i32_183 : i32
    %524 = arith.index_cast %523 : i32 to index
    %c0_187 = arith.constant 0 : index
    %c0_188 = arith.constant 0 : index
    %525 = vector.load %arg15[%524, %c0_187, %c0_188] : memref<8x8x384xf32, #tpu.memory_space<vmem>>, vector<1x8x384xf32>
    %526 = vector.shape_cast %525 : vector<1x8x384xf32> to vector<8x384xf32>
    %527 = arith.select %18, %522, %526 : vector<8x384xi1>, vector<8x384xf32>
    %cst_189 = arith.constant dense<0.000000e+00> : vector<8x384xf32>
    %528 = tpu.matmul %519, %410, %cst_189 {dimension_numbers = #tpu.dot_dimension_numbers<[1], [0], [0], [1], [0, 0, 1, 1], [], []>} : vector<8x128xf32>, vector<128x384xf32>, vector<8x384xf32> -> vector<8x384xf32>
    %529 = arith.addf %528, %409 : vector<8x384xf32>
    %530 = vector.extract_strided_slice %527 {offsets = [0, 0], sizes = [8, 128], strides = [1, 1]} : vector<8x384xf32> to vector<8x128xf32>
    %531 = vector.extract_strided_slice %529 {offsets = [0, 0], sizes = [8, 128], strides = [1, 1]} : vector<8x384xf32> to vector<8x128xf32>
    %532 = arith.addf %530, %531 : vector<8x128xf32>
    %533 = arith.negf %532 : vector<8x128xf32>
    %534 = math.exp %533 : vector<8x128xf32>
    %cst_190 = arith.constant 1.000000e+00 : f32
    %535 = vector.broadcast %cst_190 : f32 to vector<8x128xf32>
    %536 = arith.addf %535, %534 : vector<8x128xf32>
    %537 = arith.divf %535, %536 : vector<8x128xf32>
    %538 = vector.extract_strided_slice %527 {offsets = [0, 128], sizes = [8, 128], strides = [1, 1]} : vector<8x384xf32> to vector<8x128xf32>
    %539 = vector.extract_strided_slice %529 {offsets = [0, 128], sizes = [8, 128], strides = [1, 1]} : vector<8x384xf32> to vector<8x128xf32>
    %540 = arith.addf %538, %539 : vector<8x128xf32>
    %541 = arith.negf %540 : vector<8x128xf32>
    %542 = math.exp %541 : vector<8x128xf32>
    %cst_191 = arith.constant 1.000000e+00 : f32
    %543 = vector.broadcast %cst_191 : f32 to vector<8x128xf32>
    %544 = arith.addf %543, %542 : vector<8x128xf32>
    %545 = arith.divf %543, %544 : vector<8x128xf32>
    %546 = vector.extract_strided_slice %527 {offsets = [0, 256], sizes = [8, 128], strides = [1, 1]} : vector<8x384xf32> to vector<8x128xf32>
    %547 = vector.extract_strided_slice %529 {offsets = [0, 256], sizes = [8, 128], strides = [1, 1]} : vector<8x384xf32> to vector<8x128xf32>
    %548 = arith.mulf %537, %547 : vector<8x128xf32>
    %549 = arith.addf %546, %548 : vector<8x128xf32>
    %550 = math.tanh %549 : vector<8x128xf32>
    %cst_192 = arith.constant 1.000000e+00 : f32
    %551 = vector.broadcast %cst_192 : f32 to vector<8x128xf32>
    %552 = arith.subf %551, %545 : vector<8x128xf32>
    %553 = arith.mulf %552, %550 : vector<8x128xf32>
    %554 = arith.mulf %545, %519 : vector<8x128xf32>
    %555 = arith.addf %553, %554 : vector<8x128xf32>
    %c4_i32_193 = arith.constant 4 : i32
    %556 = arith.index_cast %c4_i32_193 : i32 to index
    %c0_194 = arith.constant 0 : index
    %c0_195 = arith.constant 0 : index
    %557 = vector.load %arg15[%556, %c0_194, %c0_195] : memref<8x8x384xf32, #tpu.memory_space<vmem>>, vector<1x8x384xf32>
    %558 = vector.shape_cast %557 : vector<1x8x384xf32> to vector<8x384xf32>
    %c7_i32_196 = arith.constant 7 : i32
    %559 = arith.subi %c7_i32_196, %c4_i32_193 : i32
    %560 = arith.index_cast %559 : i32 to index
    %c0_197 = arith.constant 0 : index
    %c0_198 = arith.constant 0 : index
    %561 = vector.load %arg15[%560, %c0_197, %c0_198] : memref<8x8x384xf32, #tpu.memory_space<vmem>>, vector<1x8x384xf32>
    %562 = vector.shape_cast %561 : vector<1x8x384xf32> to vector<8x384xf32>
    %563 = arith.select %18, %558, %562 : vector<8x384xi1>, vector<8x384xf32>
    %cst_199 = arith.constant dense<0.000000e+00> : vector<8x384xf32>
    %564 = tpu.matmul %555, %410, %cst_199 {dimension_numbers = #tpu.dot_dimension_numbers<[1], [0], [0], [1], [0, 0, 1, 1], [], []>} : vector<8x128xf32>, vector<128x384xf32>, vector<8x384xf32> -> vector<8x384xf32>
    %565 = arith.addf %564, %409 : vector<8x384xf32>
    %566 = vector.extract_strided_slice %563 {offsets = [0, 0], sizes = [8, 128], strides = [1, 1]} : vector<8x384xf32> to vector<8x128xf32>
    %567 = vector.extract_strided_slice %565 {offsets = [0, 0], sizes = [8, 128], strides = [1, 1]} : vector<8x384xf32> to vector<8x128xf32>
    %568 = arith.addf %566, %567 : vector<8x128xf32>
    %569 = arith.negf %568 : vector<8x128xf32>
    %570 = math.exp %569 : vector<8x128xf32>
    %cst_200 = arith.constant 1.000000e+00 : f32
    %571 = vector.broadcast %cst_200 : f32 to vector<8x128xf32>
    %572 = arith.addf %571, %570 : vector<8x128xf32>
    %573 = arith.divf %571, %572 : vector<8x128xf32>
    %574 = vector.extract_strided_slice %563 {offsets = [0, 128], sizes = [8, 128], strides = [1, 1]} : vector<8x384xf32> to vector<8x128xf32>
    %575 = vector.extract_strided_slice %565 {offsets = [0, 128], sizes = [8, 128], strides = [1, 1]} : vector<8x384xf32> to vector<8x128xf32>
    %576 = arith.addf %574, %575 : vector<8x128xf32>
    %577 = arith.negf %576 : vector<8x128xf32>
    %578 = math.exp %577 : vector<8x128xf32>
    %cst_201 = arith.constant 1.000000e+00 : f32
    %579 = vector.broadcast %cst_201 : f32 to vector<8x128xf32>
    %580 = arith.addf %579, %578 : vector<8x128xf32>
    %581 = arith.divf %579, %580 : vector<8x128xf32>
    %582 = vector.extract_strided_slice %563 {offsets = [0, 256], sizes = [8, 128], strides = [1, 1]} : vector<8x384xf32> to vector<8x128xf32>
    %583 = vector.extract_strided_slice %565 {offsets = [0, 256], sizes = [8, 128], strides = [1, 1]} : vector<8x384xf32> to vector<8x128xf32>
    %584 = arith.mulf %573, %583 : vector<8x128xf32>
    %585 = arith.addf %582, %584 : vector<8x128xf32>
    %586 = math.tanh %585 : vector<8x128xf32>
    %cst_202 = arith.constant 1.000000e+00 : f32
    %587 = vector.broadcast %cst_202 : f32 to vector<8x128xf32>
    %588 = arith.subf %587, %581 : vector<8x128xf32>
    %589 = arith.mulf %588, %586 : vector<8x128xf32>
    %590 = arith.mulf %581, %555 : vector<8x128xf32>
    %591 = arith.addf %589, %590 : vector<8x128xf32>
    %c5_i32_203 = arith.constant 5 : i32
    %592 = arith.index_cast %c5_i32_203 : i32 to index
    %c0_204 = arith.constant 0 : index
    %c0_205 = arith.constant 0 : index
    %593 = vector.load %arg15[%592, %c0_204, %c0_205] : memref<8x8x384xf32, #tpu.memory_space<vmem>>, vector<1x8x384xf32>
    %594 = vector.shape_cast %593 : vector<1x8x384xf32> to vector<8x384xf32>
    %c7_i32_206 = arith.constant 7 : i32
    %595 = arith.subi %c7_i32_206, %c5_i32_203 : i32
    %596 = arith.index_cast %595 : i32 to index
    %c0_207 = arith.constant 0 : index
    %c0_208 = arith.constant 0 : index
    %597 = vector.load %arg15[%596, %c0_207, %c0_208] : memref<8x8x384xf32, #tpu.memory_space<vmem>>, vector<1x8x384xf32>
    %598 = vector.shape_cast %597 : vector<1x8x384xf32> to vector<8x384xf32>
    %599 = arith.select %18, %594, %598 : vector<8x384xi1>, vector<8x384xf32>
    %cst_209 = arith.constant dense<0.000000e+00> : vector<8x384xf32>
    %600 = tpu.matmul %591, %410, %cst_209 {dimension_numbers = #tpu.dot_dimension_numbers<[1], [0], [0], [1], [0, 0, 1, 1], [], []>} : vector<8x128xf32>, vector<128x384xf32>, vector<8x384xf32> -> vector<8x384xf32>
    %601 = arith.addf %600, %409 : vector<8x384xf32>
    %602 = vector.extract_strided_slice %599 {offsets = [0, 0], sizes = [8, 128], strides = [1, 1]} : vector<8x384xf32> to vector<8x128xf32>
    %603 = vector.extract_strided_slice %601 {offsets = [0, 0], sizes = [8, 128], strides = [1, 1]} : vector<8x384xf32> to vector<8x128xf32>
    %604 = arith.addf %602, %603 : vector<8x128xf32>
    %605 = arith.negf %604 : vector<8x128xf32>
    %606 = math.exp %605 : vector<8x128xf32>
    %cst_210 = arith.constant 1.000000e+00 : f32
    %607 = vector.broadcast %cst_210 : f32 to vector<8x128xf32>
    %608 = arith.addf %607, %606 : vector<8x128xf32>
    %609 = arith.divf %607, %608 : vector<8x128xf32>
    %610 = vector.extract_strided_slice %599 {offsets = [0, 128], sizes = [8, 128], strides = [1, 1]} : vector<8x384xf32> to vector<8x128xf32>
    %611 = vector.extract_strided_slice %601 {offsets = [0, 128], sizes = [8, 128], strides = [1, 1]} : vector<8x384xf32> to vector<8x128xf32>
    %612 = arith.addf %610, %611 : vector<8x128xf32>
    %613 = arith.negf %612 : vector<8x128xf32>
    %614 = math.exp %613 : vector<8x128xf32>
    %cst_211 = arith.constant 1.000000e+00 : f32
    %615 = vector.broadcast %cst_211 : f32 to vector<8x128xf32>
    %616 = arith.addf %615, %614 : vector<8x128xf32>
    %617 = arith.divf %615, %616 : vector<8x128xf32>
    %618 = vector.extract_strided_slice %599 {offsets = [0, 256], sizes = [8, 128], strides = [1, 1]} : vector<8x384xf32> to vector<8x128xf32>
    %619 = vector.extract_strided_slice %601 {offsets = [0, 256], sizes = [8, 128], strides = [1, 1]} : vector<8x384xf32> to vector<8x128xf32>
    %620 = arith.mulf %609, %619 : vector<8x128xf32>
    %621 = arith.addf %618, %620 : vector<8x128xf32>
    %622 = math.tanh %621 : vector<8x128xf32>
    %cst_212 = arith.constant 1.000000e+00 : f32
    %623 = vector.broadcast %cst_212 : f32 to vector<8x128xf32>
    %624 = arith.subf %623, %617 : vector<8x128xf32>
    %625 = arith.mulf %624, %622 : vector<8x128xf32>
    %626 = arith.mulf %617, %591 : vector<8x128xf32>
    %627 = arith.addf %625, %626 : vector<8x128xf32>
    %c6_i32_213 = arith.constant 6 : i32
    %628 = arith.index_cast %c6_i32_213 : i32 to index
    %c0_214 = arith.constant 0 : index
    %c0_215 = arith.constant 0 : index
    %629 = vector.load %arg15[%628, %c0_214, %c0_215] : memref<8x8x384xf32, #tpu.memory_space<vmem>>, vector<1x8x384xf32>
    %630 = vector.shape_cast %629 : vector<1x8x384xf32> to vector<8x384xf32>
    %c7_i32_216 = arith.constant 7 : i32
    %631 = arith.subi %c7_i32_216, %c6_i32_213 : i32
    %632 = arith.index_cast %631 : i32 to index
    %c0_217 = arith.constant 0 : index
    %c0_218 = arith.constant 0 : index
    %633 = vector.load %arg15[%632, %c0_217, %c0_218] : memref<8x8x384xf32, #tpu.memory_space<vmem>>, vector<1x8x384xf32>
    %634 = vector.shape_cast %633 : vector<1x8x384xf32> to vector<8x384xf32>
    %635 = arith.select %18, %630, %634 : vector<8x384xi1>, vector<8x384xf32>
    %cst_219 = arith.constant dense<0.000000e+00> : vector<8x384xf32>
    %636 = tpu.matmul %627, %410, %cst_219 {dimension_numbers = #tpu.dot_dimension_numbers<[1], [0], [0], [1], [0, 0, 1, 1], [], []>} : vector<8x128xf32>, vector<128x384xf32>, vector<8x384xf32> -> vector<8x384xf32>
    %637 = arith.addf %636, %409 : vector<8x384xf32>
    %638 = vector.extract_strided_slice %635 {offsets = [0, 0], sizes = [8, 128], strides = [1, 1]} : vector<8x384xf32> to vector<8x128xf32>
    %639 = vector.extract_strided_slice %637 {offsets = [0, 0], sizes = [8, 128], strides = [1, 1]} : vector<8x384xf32> to vector<8x128xf32>
    %640 = arith.addf %638, %639 : vector<8x128xf32>
    %641 = arith.negf %640 : vector<8x128xf32>
    %642 = math.exp %641 : vector<8x128xf32>
    %cst_220 = arith.constant 1.000000e+00 : f32
    %643 = vector.broadcast %cst_220 : f32 to vector<8x128xf32>
    %644 = arith.addf %643, %642 : vector<8x128xf32>
    %645 = arith.divf %643, %644 : vector<8x128xf32>
    %646 = vector.extract_strided_slice %635 {offsets = [0, 128], sizes = [8, 128], strides = [1, 1]} : vector<8x384xf32> to vector<8x128xf32>
    %647 = vector.extract_strided_slice %637 {offsets = [0, 128], sizes = [8, 128], strides = [1, 1]} : vector<8x384xf32> to vector<8x128xf32>
    %648 = arith.addf %646, %647 : vector<8x128xf32>
    %649 = arith.negf %648 : vector<8x128xf32>
    %650 = math.exp %649 : vector<8x128xf32>
    %cst_221 = arith.constant 1.000000e+00 : f32
    %651 = vector.broadcast %cst_221 : f32 to vector<8x128xf32>
    %652 = arith.addf %651, %650 : vector<8x128xf32>
    %653 = arith.divf %651, %652 : vector<8x128xf32>
    %654 = vector.extract_strided_slice %635 {offsets = [0, 256], sizes = [8, 128], strides = [1, 1]} : vector<8x384xf32> to vector<8x128xf32>
    %655 = vector.extract_strided_slice %637 {offsets = [0, 256], sizes = [8, 128], strides = [1, 1]} : vector<8x384xf32> to vector<8x128xf32>
    %656 = arith.mulf %645, %655 : vector<8x128xf32>
    %657 = arith.addf %654, %656 : vector<8x128xf32>
    %658 = math.tanh %657 : vector<8x128xf32>
    %cst_222 = arith.constant 1.000000e+00 : f32
    %659 = vector.broadcast %cst_222 : f32 to vector<8x128xf32>
    %660 = arith.subf %659, %653 : vector<8x128xf32>
    %661 = arith.mulf %660, %658 : vector<8x128xf32>
    %662 = arith.mulf %653, %627 : vector<8x128xf32>
    %663 = arith.addf %661, %662 : vector<8x128xf32>
    %c7_i32_223 = arith.constant 7 : i32
    %664 = arith.index_cast %c7_i32_223 : i32 to index
    %c0_224 = arith.constant 0 : index
    %c0_225 = arith.constant 0 : index
    %665 = vector.load %arg15[%664, %c0_224, %c0_225] : memref<8x8x384xf32, #tpu.memory_space<vmem>>, vector<1x8x384xf32>
    %666 = vector.shape_cast %665 : vector<1x8x384xf32> to vector<8x384xf32>
    %c7_i32_226 = arith.constant 7 : i32
    %667 = arith.subi %c7_i32_226, %c7_i32_223 : i32
    %668 = arith.index_cast %667 : i32 to index
    %c0_227 = arith.constant 0 : index
    %c0_228 = arith.constant 0 : index
    %669 = vector.load %arg15[%668, %c0_227, %c0_228] : memref<8x8x384xf32, #tpu.memory_space<vmem>>, vector<1x8x384xf32>
    %670 = vector.shape_cast %669 : vector<1x8x384xf32> to vector<8x384xf32>
    %671 = arith.select %18, %666, %670 : vector<8x384xi1>, vector<8x384xf32>
    %cst_229 = arith.constant dense<0.000000e+00> : vector<8x384xf32>
    %672 = tpu.matmul %663, %410, %cst_229 {dimension_numbers = #tpu.dot_dimension_numbers<[1], [0], [0], [1], [0, 0, 1, 1], [], []>} : vector<8x128xf32>, vector<128x384xf32>, vector<8x384xf32> -> vector<8x384xf32>
    %673 = arith.addf %672, %409 : vector<8x384xf32>
    %674 = vector.extract_strided_slice %671 {offsets = [0, 0], sizes = [8, 128], strides = [1, 1]} : vector<8x384xf32> to vector<8x128xf32>
    %675 = vector.extract_strided_slice %673 {offsets = [0, 0], sizes = [8, 128], strides = [1, 1]} : vector<8x384xf32> to vector<8x128xf32>
    %676 = arith.addf %674, %675 : vector<8x128xf32>
    %677 = arith.negf %676 : vector<8x128xf32>
    %678 = math.exp %677 : vector<8x128xf32>
    %cst_230 = arith.constant 1.000000e+00 : f32
    %679 = vector.broadcast %cst_230 : f32 to vector<8x128xf32>
    %680 = arith.addf %679, %678 : vector<8x128xf32>
    %681 = arith.divf %679, %680 : vector<8x128xf32>
    %682 = vector.extract_strided_slice %671 {offsets = [0, 128], sizes = [8, 128], strides = [1, 1]} : vector<8x384xf32> to vector<8x128xf32>
    %683 = vector.extract_strided_slice %673 {offsets = [0, 128], sizes = [8, 128], strides = [1, 1]} : vector<8x384xf32> to vector<8x128xf32>
    %684 = arith.addf %682, %683 : vector<8x128xf32>
    %685 = arith.negf %684 : vector<8x128xf32>
    %686 = math.exp %685 : vector<8x128xf32>
    %cst_231 = arith.constant 1.000000e+00 : f32
    %687 = vector.broadcast %cst_231 : f32 to vector<8x128xf32>
    %688 = arith.addf %687, %686 : vector<8x128xf32>
    %689 = arith.divf %687, %688 : vector<8x128xf32>
    %690 = vector.extract_strided_slice %671 {offsets = [0, 256], sizes = [8, 128], strides = [1, 1]} : vector<8x384xf32> to vector<8x128xf32>
    %691 = vector.extract_strided_slice %673 {offsets = [0, 256], sizes = [8, 128], strides = [1, 1]} : vector<8x384xf32> to vector<8x128xf32>
    %692 = arith.mulf %681, %691 : vector<8x128xf32>
    %693 = arith.addf %690, %692 : vector<8x128xf32>
    %694 = math.tanh %693 : vector<8x128xf32>
    %cst_232 = arith.constant 1.000000e+00 : f32
    %695 = vector.broadcast %cst_232 : f32 to vector<8x128xf32>
    %696 = arith.subf %695, %689 : vector<8x128xf32>
    %697 = arith.mulf %696, %694 : vector<8x128xf32>
    %698 = arith.mulf %689, %663 : vector<8x128xf32>
    %699 = arith.addf %697, %698 : vector<8x128xf32>
    %c8_i32_233 = arith.constant 8 : i32
    %c0_234 = arith.constant 0 : index
    %c0_235 = arith.constant 0 : index
    %700 = vector.load %arg10[%c0_234, %c0_235] : memref<128x128xf32, #tpu.memory_space<vmem>>, vector<128x128xf32>
    %cst_236 = arith.constant dense<0.000000e+00> : vector<8x128xf32>
    %701 = tpu.matmul %699, %700, %cst_236 {dimension_numbers = #tpu.dot_dimension_numbers<[1], [0], [0], [1], [0, 0, 1, 1], [], []>} : vector<8x128xf32>, vector<128x128xf32>, vector<8x128xf32> -> vector<8x128xf32>
    %c0_237 = arith.constant 0 : index
    %c0_238 = arith.constant 0 : index
    %702 = vector.load %arg11[%c0_237, %c0_238] : memref<1x128xf32, #tpu.memory_space<vmem>>, vector<1x128xf32>
    %703 = vector.broadcast %702 : vector<1x128xf32> to vector<8x128xf32>
    %704 = arith.addf %701, %703 : vector<8x128xf32>
    %cst_239 = arith.constant 0.000000e+00 : f32
    %705 = vector.broadcast %cst_239 : f32 to vector<8x128xf32>
    %706 = arith.maximumf %704, %705 : vector<8x128xf32>
    %c0_240 = arith.constant 0 : index
    %c0_241 = arith.constant 0 : index
    %707 = vector.load %arg12[%c0_240, %c0_241] : memref<128x128xf32, #tpu.memory_space<vmem>>, vector<128x128xf32>
    %cst_242 = arith.constant dense<0.000000e+00> : vector<8x128xf32>
    %708 = tpu.matmul %706, %707, %cst_242 {dimension_numbers = #tpu.dot_dimension_numbers<[1], [0], [0], [1], [0, 0, 1, 1], [], []>} : vector<8x128xf32>, vector<128x128xf32>, vector<8x128xf32> -> vector<8x128xf32>
    %c0_243 = arith.constant 0 : index
    %c0_244 = arith.constant 0 : index
    %709 = vector.load %arg13[%c0_243, %c0_244] : memref<1x128xf32, #tpu.memory_space<vmem>>, vector<1x128xf32>
    %710 = vector.broadcast %709 : vector<1x128xf32> to vector<8x128xf32>
    %711 = arith.addf %708, %710 : vector<8x128xf32>
    %c0_245 = arith.constant 0 : index
    %c0_246 = arith.constant 0 : index
    %712 = vector.load %arg14[%c0_245, %c0_246] : memref<8x128xf32, #tpu.memory_space<vmem>>, vector<8x128xf32>
    tpu.vector_store %arg14[%c0_245, %c0_246], %711 {strides = array<i32>} : memref<8x128xf32, #tpu.memory_space<vmem>>, vector<8x128xf32>,
    return
  }
}

</mosaic_0001>

<bundles_post_ra>
// kernel: gru_model_forward.1
= control target key start
LH: loop header
LB: loop body
LE: loop exit
PB: predicated region body
PF: predicated region fallthrough
CT: control target
= control target key end

     0   :  { %19 = vsyncpa [#allocation6], 0  ;;  %s5786_s0 = inlined_call_operand.vmem [shape: f32[8,8,32], index: 0, kind: input, shape index: {}]   ;;  %s5787_s1 = inlined_call_operand.hbm [shape: f32[32,384], index: 1, kind: input, shape index: {}]   ;;  %s5788_s2 = inlined_call_operand.vmem [shape: f32[128,384], index: 2, kind: input, shape index: {}]   ;;  %s5789_s3 = inlined_call_operand.vmem [shape: f32[1,384], index: 3, kind: input, shape index: {}]   ;;  %s5790_s4 = inlined_call_operand.vmem [shape: f32[1,384], index: 4, kind: input, shape index: {}]   ;;  %s5791_s5 = inlined_call_operand.vmem [shape: f32[128,384], index: 5, kind: input, shape index: {}]   ;;  %s5792_s6 = inlined_call_operand.hbm [shape: f32[128,384], index: 6, kind: input, shape index: {}]   ;;  %s5793_s7 = inlined_call_operand.hbm [shape: f32[128,384], index: 7, kind: input, shape index: {}]   ;;  %s5794_s8 = inlined_call_operand.vmem [shape: f32[1,384], index: 8, kind: input, shape index: {}]   ;;  %s5795_s9 = inlined_call_operand.vmem [shape: f32[1,384], index: 9, kind: input, shape index: {}]   ;;  %s5796_s10 = inlined_call_operand.vmem [shape: f32[128,128], index: 10, kind: input, shape index: {}]   ;;  %s5797_s11 = inlined_call_operand.vmem [shape: f32[1,128], index: 11, kind: input, shape index: {}]   ;;  %s5798_s12 = inlined_call_operand.hbm [shape: f32[128,128], index: 12, kind: input, shape index: {}]   ;;  %s5799_s13 = inlined_call_operand.vmem [shape: f32[1,128], index: 13, kind: input, shape index: {}]   ;;  %s5800_s14 = inlined_call_operand.vmem [shape: f32[8,128], index: 14, kind: output, shape index: {}]  }
   0x1   :  { %20 = vsyncpa [#allocation8], 0 }
   0x2   :  { %21 = vsyncpa [#allocation11], 0  ;;  %s49_s15 = sshll.u32 %s5792_s6, 4  ;;  %s3262_s16 = smov [#allocation7]   ;;  %s50_s15 = int_to_ptr.hbm [resolvable:$true] %s49_s15 }
   0x3   :  { %s51_s17 = sshll.u32 %s3262_s16, 4  ;;  %s28_s20 = sshll.u32 %s5787_s1, 4  ;;  %s52_s17 = int_to_ptr.vmem [resolvable:$true] %s51_s17  ;;  %s29_s20 = int_to_ptr.hbm [resolvable:$true] %s28_s20 }
   0x4   :  { %s3263_s21 = smov 384   ;;  %s3264_s22 = smov 24  }
   0x5   :  { %57 = dma.hbm_to_vmem [thread:$0]  %s50_s15, 6144, %s52_s17, [#allocation8], %s3263_s21, %s3263_s21, %s3264_s22  }
   0x6   :  { %s3265_s23 = smov [#allocation5]   ;;  %s62_s27 = sshll.u32 %s5793_s7, 4  ;;  %s63_s27 = int_to_ptr.hbm [resolvable:$true] %s62_s27 }
   0x7   :  { %s30_s24 = sshll.u32 %s3265_s23, 4  ;;  %s83_s29 = sshll.u32 %s5798_s12, 4  ;;  %s31_s24 = int_to_ptr.vmem [resolvable:$true] %s30_s24  ;;  %s84_s29 = int_to_ptr.hbm [resolvable:$true] %s83_s29 }
   0x8   :  { %36 = dma.hbm_to_vmem [thread:$0]  %s29_s20, 1536, %s31_s24, [#allocation6], %s3263_s21, %s3263_s21, %s3264_s22  }
   0x9   :  { %s3266_s30 = smov [#allocation9]   ;;  %s3267_s1 = smov [#allocation10]  }
   0xa   :  { %s64_s16 = sshll.u32 %s3266_s30, 4  ;;  %s85_s15 = sshll.u32 %s3267_s1, 4  ;;  %s65_s16 = int_to_ptr.vmem [resolvable:$true] %s64_s16  ;;  %s86_s15 = int_to_ptr.vmem [resolvable:$true] %s85_s15 }
   0xb   :  { %70 = dma.hbm_to_vmem [thread:$0]  %s63_s27, 6144, %s65_s16, [#allocation8], %s3263_s21, %s3263_s21, %s3264_s22  }
   0xc   :  { %s3268_s17 = smov 128   ;;  %s3269_s18 = smov 8  }
   0xd   :  { %91 = dma.hbm_to_vmem [thread:$0]  %s84_s29, 2048, %s86_s15, [#allocation11], %s3268_s17, %s3268_s17, %s3269_s18  }
   0xe   :  { %3256 = dma.done.wait [#allocation6], 1536  }
   0xf   :  { %3257 = vsyncadd [#allocation6], 4294965760 }
  0x10   :  { %3258 = dma.done.wait [#allocation8], 12288  }
  0x11   :  { %3259 = vsyncadd [#allocation8], 4294955008 }
  0x12   :  { %3260 = dma.done.wait [#allocation11], 2048  }
  0x13   :  { %3261 = vsyncadd [#allocation11], 4294965248  ;;  %v170_v0 = vld [vmem:[#allocation5 + $0x48] sm:$0xff]  ;;  %v171_v1 = vld [vmem:[#allocation5 + $0x50] sm:$0xff]  ;;  %vm181_vm0 = vcmask 261120   ;;  %v5801_v51 = vmov 0.0  }
  0x14   :  { %v172_v2 = vld [vmem:[#allocation5 + $0x58] sm:$0xff]  ;;  %218 = vmatpush.msra.mxu0 %v170_v0  ;;  %259 = vmatpush.msra.mxu1 %v171_v1  ;;  %v3361_v3 = vld [vmem:[%s5788_s2 + $0x168] sm:$0xff]  ;;  %v167_v4 = vld [vmem:[#allocation5 + $0x30] sm:$0xff] }
  0x15   :  { %v168_v5 = vld [vmem:[#allocation5 + $0x38] sm:$0xff]  ;;  %300 = vmatpush.msra.mxu2 %v172_v2  ;;  %419 = vmatpush.msra.mxu3 %v3361_v3  ;;  %v169_v6 = vld [vmem:[#allocation5 + $0x40] sm:$0xff]  ;;  %v3367_v7 = vld [vmem:[%s5788_s2 + $0x150] sm:$0xff] }
  0x16   :  { %v164_v8 = vld [vmem:[#allocation5 + $0x18] sm:$0xff]  ;;  %219 = vmatpush.msra.mxu0 %v167_v4  ;;  %260 = vmatpush.msra.mxu1 %v168_v5  ;;  %v165_v9 = vld [vmem:[#allocation5 + $0x20] sm:$0xff]  ;;  %v166_v10 = vld [vmem:[#allocation5 + $0x28] sm:$0xff] }
  0x17   :  { %v3372_v11 = vld [vmem:[%s5788_s2 + $0x138] sm:$0xff]  ;;  %301 = vmatpush.msra.mxu2 %v169_v6  ;;  %420 = vmatpush.msra.mxu3 %v3367_v7  ;;  %v161_v12 = vld [vmem:[#allocation5] sm:$0xff]  ;;  %v162_v13 = vld [vmem:[#allocation5 + $0x8] sm:$0xff] }
  0x18   :  { %220 = vmatpush.msra.mxu0 %v164_v8  ;;  %261 = vmatpush.msra.mxu1 %v165_v9  ;;  %v163_v14 = vld [vmem:[#allocation5 + $0x10] sm:$0xff]  ;;  %v3378_v15 = vld [vmem:[%s5788_s2 + $0x120] sm:$0xff]  ;;  %v3387_v17 = vld [vmem:[%s5788_s2 + $0x108] sm:$0xff] }
  0x19   :  { %302 = vmatpush.msra.mxu2 %v166_v10  ;;  %421 = vmatpush.msra.mxu3 %v3372_v11  ;;  %v153_v16 = vld [vmem:[%s5786_s0] sm:$0xff]  ;;  %v3395_v18 = vld [vmem:[%s5788_s2 + $0xf0] sm:$0xff]  ;;  %v3402_v19 = vld [vmem:[%s5788_s2 + $0x178] sm:$0xff] }
  0x1a   :  { %221 = vmatpush.msra.mxu0 %v161_v12  ;;  %262 = vmatpush.msra.mxu1 %v162_v13  ;;  %v3407_v20 = vld [vmem:[%s5788_s2 + $0xd8] sm:$0xff]  ;;  %v3413_v21 = vld [vmem:[%s5788_s2 + $0x170] sm:$0xff]  ;;  %v3418_v22 = vld [vmem:[%s5788_s2 + $0x160] sm:$0xff] }
  0x1b   :  { %303 = vmatpush.msra.mxu2 %v163_v14  ;;  %422 = vmatpush.msra.mxu3 %v3378_v15  ;;  %v3425_v23 = vld [vmem:[%s5788_s2 + $0x148] sm:$0xff]  ;;  %v3431_v24 = vld [vmem:[%s5788_s2 + $0xc0] sm:$0xff]  ;;  %v3436_v25 = vld [vmem:[%s5788_s2 + $0x158] sm:$0xff] }
  0x1c   :  { %2837 = vmatmul.msk.f32.vlgmr.msra.gmra.mxu0 %vm181_vm0, %v153_v16  ;;  %2845 = vmatmul.msk.f32.vlgmr.msra.gmra.mxu1 %vm181_vm0, %v153_v16  ;;  %v154_v26 = vld [vmem:[%s5786_s0 + $0x8] sm:$0xff]  ;;  %v3453_v28 = vld [vmem:[%s5788_s2 + $0x140] sm:$0xff]  ;;  %v3461_v29 = vld [vmem:[%s5788_s2 + $0x130] sm:$0xff] }
  0x1d   :  { %2853 = vmatmul.msk.f32.vlgmr.msra.gmra.mxu2 %vm181_vm0, %v153_v16  ;;  %423 = vmatpush.msra.mxu3 %v3387_v17  ;;  %v3447_v27 = vld [vmem:[%s5788_s2 + $0xa8] sm:$0xff]  ;;  %v3469_v30 = vld [vmem:[%s5788_s2 + $0x90] sm:$0xff]  ;;  %v3476_v31 = vld [vmem:[%s5788_s2 + $0x118] sm:$0xff] }
  0x1e   :  { %459 = vmatpush.msrb.mxu0 %v3402_v19  ;;  %540 = vmatpush.msrb.mxu1 %v3361_v3  ;;  %v3481_v32 = vld [vmem:[%s5788_s2 + $0x78] sm:$0xff]  ;;  %v3486_v33 = vld [vmem:[%s5788_s2 + $0x128] sm:$0xff]  ;;  %v3494_v34 = vld [vmem:[%s5788_s2 + $0x100] sm:$0xff] }
  0x1f   :  { %424 = vmatpush.msra.mxu3 %v3395_v18  ;;  %560 = vmatpush.msrb.mxu2 %v3413_v21  ;;  %v3500_v35 = vld [vmem:[%s5788_s2 + $0x60] sm:$0xff]  ;;  %v3505_v36 = vld [vmem:[%s5788_s2 + $0x110] sm:$0xff]  ;;  %v3517_v38 = vld [vmem:[%s5788_s2 + $0x48] sm:$0xff] }
  0x20   :  { %460 = vmatpush.msrb.mxu0 %v3418_v22  ;;  %541 = vmatpush.msrb.mxu1 %v3367_v7  ;;  %5955 = vst [vmem:[#allocation15_spill] sm:$0xff] %v3500_v35  ;;  %v155_v37 = vld [vmem:[%s5786_s0 + $0x10] sm:$0xff]  ;;  %v3522_v39 = vld [vmem:[%s5788_s2 + $0xf8] sm:$0xff]  ;;  %v3530_v40 = vld [vmem:[%s5788_s2 + $0xe8] sm:$0xff] }
  0x21   :  { %425 = vmatpush.msra.mxu3 %v3407_v20  ;;  %561 = vmatpush.msrb.mxu2 %v3436_v25  ;;  %5956 = vst [vmem:[#allocation16_spill] sm:$0xff] %v3517_v38  ;;  %v3538_v41 = vld [vmem:[%s5788_s2 + $0x30] sm:$0xff]  ;;  %v3545_v42 = vld [vmem:[%s5788_s2 + $0x18] sm:$0xff]  ;;  %v3550_v43 = vld [vmem:[%s5788_s2 + $0xe0] sm:$0xff] }
  0x22   :  { %461 = vmatpush.msrb.mxu0 %v3425_v23  ;;  %542 = vmatpush.msrb.mxu1 %v3372_v11  ;;  %5957 = vst [vmem:[#allocation17_spill] sm:$0xff] %v3538_v41  ;;  %v3558_v44 = vld [vmem:[%s5788_s2 + $0xd0] sm:$0xff]  ;;  %v3564_v45 = vld [vmem:[%s5788_s2] sm:$0xff]  ;;  %v3569_v46 = vld [vmem:[%s5788_s2 + $0xc8] sm:$0xff] }
  0x23   :  { %426 = vmatpush.msra.mxu3 %v3431_v24  ;;  %562 = vmatpush.msrb.mxu2 %v3453_v28  ;;  %5958 = vst [vmem:[#allocation18_spill] sm:$0xff] %v3545_v42  ;;  %v156_v47 = vld [vmem:[%s5786_s0 + $0x18] sm:$0xff]  ;;  %v3581_v48 = vld [vmem:[%s5788_s2 + $0xb0] sm:$0xff]  ;;  %v3598_v50 = vld [vmem:[%s5788_s2 + $0xa0] sm:$0xff] }
  0x24   :  { %2838 = vmatmul.msk.f32.gmra.mxu0 %vm181_vm0, %v154_v26  ;;  %2846 = vmatmul.msk.f32.gmra.mxu1 %vm181_vm0, %v154_v26  ;;  %5959 = vst [vmem:[#allocation19_spill] sm:$0xff] %v3564_v45  ;;  %v3591_v49 = vld [vmem:[%s5788_s2 + $0xb8] sm:$0xff]  ;;  %v3611_v53 = vld [vmem:[%s5788_s2 + $0x88] sm:$0xff]  ;;  %v157_v54 = vld [vmem:[%s5786_s0 + $0x20] sm:$0xff] }
  0x25   :  { %2854 = vmatmul.msk.f32.gmra.mxu2 %vm181_vm0, %v154_v26  ;;  %427 = vmatpush.msra.mxu3 %v3447_v27  ;;  %v3606_v52 = vld [vmem:[%s5788_s2 + $0x98] sm:$0xff]  ;;  %v3623_v55 = vld [vmem:[%s5788_s2 + $0x80] sm:$0xff]  ;;  %v3632_v56 = vld [vmem:[%s5788_s2 + $0x70] sm:$0xff]  ;;  %v110_v26 = vlaneseq }
  0x26   :  { %462 = vmatpush.msrb.mxu0 %v3461_v29  ;;  %543 = vmatpush.msrb.mxu1 %v3378_v15  ;;  %5960 = vst [vmem:[#allocation20_spill] sm:$0xff] %v3632_v56  ;;  %v3642_v57 = vld [vmem:[%s5788_s2 + $0x68] sm:$0xff]  ;;  %v3647_v58 = vld [vmem:[%s5788_s2 + $0x58] sm:$0xff]  ;;  %v3655_v59 = vld [vmem:[%s5788_s2 + $0x50] sm:$0xff] }
  0x27   :  { %428 = vmatpush.msra.mxu3 %v3469_v30  ;;  %563 = vmatpush.msrb.mxu2 %v3486_v33  ;;  %5961 = vst [vmem:[#allocation21_spill] sm:$0xff] %v3642_v57  ;;  %v3660_v60 = vld [vmem:[%s5788_s2 + $0x40] sm:$0xff]  ;;  %v158_v61 = vld [vmem:[%s5786_s0 + $0x28] sm:$0xff]  ;;  %v3672_v62 = vld [vmem:[%s5788_s2 + $0x38] sm:$0xff] }
  0x28   :  { %463 = vmatpush.msrb.mxu0 %v3476_v31  ;;  %544 = vmatpush.msrb.mxu1 %v3387_v17  ;;  %5962 = vst [vmem:[#allocation22_spill] sm:$0xff] %v3647_v58  ;;  %v3681_v63 = vld [vmem:[%s5788_s2 + $0x28] sm:$0xff]  ;;  %v3691_v0 = vld [vmem:[%s5788_s2 + $0x20] sm:$0xff]  ;;  %v3696_v1 = vld [vmem:[%s5788_s2 + $0x10] sm:$0xff] }
  0x29   :  { %429 = vmatpush.msra.mxu3 %v3481_v32  ;;  %564 = vmatpush.msrb.mxu2 %v3505_v36  ;;  %5963 = vst [vmem:[#allocation23_spill] sm:$0xff] %v3655_v59  ;;  %v3704_v2 = vld [vmem:[%s5788_s2 + $0x8] sm:$0xff]  ;;  %v159_v4 = vld [vmem:[%s5786_s0 + $0x30] sm:$0xff]  ;;  %v160_v5 = vld [vmem:[%s5786_s0 + $0x38] sm:$0xff] }
  0x2a   :  { %464 = vmatpush.msrb.mxu0 %v3494_v34  ;;  %545 = vmatpush.msrb.mxu1 %v3395_v18  ;;  %5964 = vst [vmem:[#allocation24_spill] sm:$0xff] %v3660_v60 }
  0x2b   :  { %430 = vmatpush.msra.mxu3 %v3500_v35  ;;  %565 = vmatpush.msrb.mxu2 %v3522_v39  ;;  %5965 = vst [vmem:[#allocation25_spill] sm:$0xff] %v3672_v62 }
  0x2c   :  { %2839 = vmatmul.msk.f32.gmra.mxu0 %vm181_vm0, %v155_v37  ;;  %2847 = vmatmul.msk.f32.gmra.mxu1 %vm181_vm0, %v155_v37  ;;  %5966 = vst [vmem:[#allocation26_spill] sm:$0xff] %v3681_v63 }
  0x2d   :  { %2855 = vmatmul.msk.f32.gmra.mxu2 %vm181_vm0, %v155_v37  ;;  %431 = vmatpush.msra.mxu3 %v3517_v38  ;;  %5967 = vst [vmem:[#allocation27_spill] sm:$0xff] %v3691_v0  ;;  %v3831_v37 = vand.u32 127, %v110_v26 }
  0x2e   :  { %465 = vmatpush.msrb.mxu0 %v3530_v40  ;;  %546 = vmatpush.msrb.mxu1 %v3407_v20  ;;  %5968 = vst [vmem:[#allocation28_spill] sm:$0xff] %v3696_v1 }
  0x2f   :  { %432 = vmatpush.msra.mxu3 %v3538_v41  ;;  %566 = vmatpush.msrb.mxu2 %v3550_v43  ;;  %5969 = vst [vmem:[#allocation29_spill] sm:$0xff] %v3704_v2  ;;  %v113_v26 = vadd.s32 256, %v3831_v37  ;;  %vm150_vm1 = vcmp.lt.s32.totalorder %v3831_v37, 32 }
  0x30   :  { %466 = vmatpush.msrb.mxu0 %v3558_v44  ;;  %547 = vmatpush.msrb.mxu1 %v3431_v24  ;;  %5970 = vst [vmem:[#allocation30_spill] sm:$0xff] %v3831_v37 }
  0x31   :  { %433 = vmatpush.msra.mxu3 %v3545_v42  ;;  %567 = vmatpush.msrb.mxu2 %v3569_v46 }
  0x32   :  { %548 = vmatpush.msrb.mxu1 %v3447_v27  ;;  %467 = vmatpush.msrb.mxu0 %v3591_v49 }
  0x33   :  { %434 = vmatpush.msra.mxu3 %v3564_v45  ;;  %568 = vmatpush.msrb.mxu2 %v3581_v48 }
  0x34   :  { %2840 = vmatmul.msk.f32.gmra.mxu0 %vm181_vm0, %v156_v47  ;;  %2848 = vmatmul.msk.f32.gmra.mxu1 %vm181_vm0, %v156_v47 }
  0x35   :  { %2856 = vmatmul.msk.f32.gmra.mxu2 %vm181_vm0, %v156_v47  ;;  %439 = vmatpush.msrb.mxu3 %v3413_v21 }
  0x36   :  { %435 = vmatmul.f32.vlgmr.msra.gmra.mxu3 %v5801_v51  ;;  %549 = vmatpush.msrb.mxu1 %v3469_v30 }
  0x37   :  { %440 = vmatpush.msrb.mxu3 %v3436_v25  ;;  %468 = vmatpush.msrb.mxu0 %v3598_v50 }
  0x38   :  { %569 = vmatpush.msrb.mxu2 %v3606_v52  ;;  %550 = vmatpush.msrb.mxu1 %v3481_v32 }
  0x39   :  { %441 = vmatpush.msrb.mxu3 %v3453_v28  ;;  %469 = vmatpush.msrb.mxu0 %v3611_v53 }
  0x3a   :  { %570 = vmatpush.msrb.mxu2 %v3623_v55  ;;  %551 = vmatpush.msrb.mxu1 %v3500_v35 }
  0x3b   :  { %442 = vmatpush.msrb.mxu3 %v3486_v33  ;;  %470 = vmatpush.msrb.mxu0 %v3632_v56 }
  0x3c   :  { %2841 = vmatmul.msk.f32.gmra.mxu0 %vm181_vm0, %v157_v54  ;;  %2849 = vmatmul.msk.f32.gmra.mxu1 %vm181_vm0, %v157_v54 }
  0x3d   :  { %2857 = vmatmul.msk.f32.gmra.mxu2 %vm181_vm0, %v157_v54  ;;  %443 = vmatpush.msrb.mxu3 %v3505_v36 }
  0x3e   :  { %571 = vmatpush.msrb.mxu2 %v3642_v57  ;;  %552 = vmatpush.msrb.mxu1 %v3517_v38 }
  0x3f   :  { %444 = vmatpush.msrb.mxu3 %v3522_v39  ;;  %471 = vmatpush.msrb.mxu0 %v3647_v58 }
  0x40   :  { %572 = vmatpush.msrb.mxu2 %v3655_v59  ;;  %553 = vmatpush.msrb.mxu1 %v3538_v41 }
  0x41   :  { %445 = vmatpush.msrb.mxu3 %v3550_v43  ;;  %472 = vmatpush.msrb.mxu0 %v3660_v60 }
  0x42   :  { %573 = vmatpush.msrb.mxu2 %v3672_v62  ;;  %554 = vmatpush.msrb.mxu1 %v3545_v42 }
  0x43   :  { %446 = vmatpush.msrb.mxu3 %v3569_v46  ;;  %473 = vmatpush.msrb.mxu0 %v3681_v63 }
  0x44   :  { %2842 = vmatmul.msk.f32.gmra.mxu0 %vm181_vm0, %v158_v61  ;;  %2850 = vmatmul.msk.f32.gmra.mxu1 %vm181_vm0, %v158_v61 }
  0x45   :  { %2858 = vmatmul.msk.f32.gmra.mxu2 %vm181_vm0, %v158_v61  ;;  %447 = vmatpush.msrb.mxu3 %v3581_v48 }
  0x46   :  { %574 = vmatpush.msrb.mxu2 %v3691_v0  ;;  %555 = vmatpush.msrb.mxu1 %v3564_v45 }
  0x47   :  { %448 = vmatpush.msrb.mxu3 %v3606_v52  ;;  %474 = vmatpush.msrb.mxu0 %v3696_v1 }
  0x48   :  { %575 = vmatpush.msrb.mxu2 %v3704_v2  ;;  %682 = vmatpush.msra.mxu1 %v3413_v21 }
  0x49   :  { %449 = vmatpush.msrb.mxu3 %v3623_v55  ;;  %662 = vmatpush.msra.mxu0 %v3361_v3 }
  0x4a   :  { %702 = vmatpush.msra.mxu2 %v3402_v19  ;;  %683 = vmatpush.msra.mxu1 %v3436_v25 }
  0x4b   :  { %450 = vmatpush.msrb.mxu3 %v3642_v57  ;;  %663 = vmatpush.msra.mxu0 %v3367_v7 }
  0x4c   :  { %2843 = vmatmul.msk.f32.gmra.mxu0 %vm181_vm0, %v159_v4  ;;  %2851 = vmatmul.msk.f32.gmra.mxu1 %vm181_vm0, %v159_v4 }
  0x4d   :  { %2859 = vmatmul.msk.f32.gmra.mxu2 %vm181_vm0, %v159_v4  ;;  %451 = vmatpush.msrb.mxu3 %v3655_v59  ;;  %v112_v4 = vadd.s32 128, %v3831_v37 }
  0x4e   :  { %703 = vmatpush.msra.mxu2 %v3418_v22  ;;  %664 = vmatpush.msra.mxu0 %v3372_v11 }
  0x4f   :  { %452 = vmatpush.msrb.mxu3 %v3672_v62  ;;  %684 = vmatpush.msra.mxu1 %v3453_v28 }
  0x50   :  { %704 = vmatpush.msra.mxu2 %v3425_v23  ;;  %665 = vmatpush.msra.mxu0 %v3378_v15 }
  0x51   :  { %453 = vmatpush.msrb.mxu3 %v3691_v0  ;;  %685 = vmatpush.msra.mxu1 %v3486_v33 }
  0x52   :  { %705 = vmatpush.msra.mxu2 %v3461_v29  ;;  %666 = vmatpush.msra.mxu0 %v3387_v17 }
  0x53   :  { %454 = vmatpush.msrb.mxu3 %v3704_v2  ;;  %686 = vmatpush.msra.mxu1 %v3505_v36 }
  0x54   :  { %455 = vmatmul.f32.vlgmr.msrb.gmra.mxu3 %v5801_v51  ;;  %2844 = vmatmul.msk.f32.gmra.mxu0 %vm181_vm0, %v160_v5 }
  0x55   :  { %2852 = vmatmul.msk.f32.gmra.mxu1 %vm181_vm0, %v160_v5  ;;  %2860 = vmatmul.msk.f32.gmra.mxu2 %vm181_vm0, %v160_v5  ;;  %v173_v5 = vld [vmem:[%s5789_s3] sm:$0x7] }
  0x56   :  { %580 = vmatpush.msra.mxu3 %v3402_v19  ;;  %706 = vmatpush.msra.mxu2 %v3476_v31 }
  0x57   :  { %667 = vmatpush.msra.mxu0 %v3395_v18  ;;  %687 = vmatpush.msra.mxu1 %v3522_v39 }
  0x58   :  { %581 = vmatpush.msra.mxu3 %v3418_v22  ;;  %707 = vmatpush.msra.mxu2 %v3494_v34 }
  0x59   :  { %668 = vmatpush.msra.mxu0 %v3407_v20  ;;  %688 = vmatpush.msra.mxu1 %v3550_v43 }
  0x5a   :  { %582 = vmatpush.msra.mxu3 %v3425_v23  ;;  %708 = vmatpush.msra.mxu2 %v3530_v40 }
  0x5b   :  { %669 = vmatpush.msra.mxu0 %v3431_v24  ;;  %689 = vmatpush.msra.mxu1 %v3569_v46 }
  0x5c   :  { %475 = vmatmul.f32.vlgmr.msrb.gmra.mxu0 %v5801_v51  ;;  %583 = vmatpush.msra.mxu3 %v3461_v29  ;;  %v125_v51 = vand.u32 127, %v112_v4 }
  0x5d   :  { %709 = vmatpush.msra.mxu2 %v3558_v44  ;;  %670 = vmatpush.msra.mxu0 %v3447_v27 }
  0x5e   :  { %584 = vmatpush.msra.mxu3 %v3476_v31  ;;  %690 = vmatpush.msra.mxu1 %v3581_v48  ;;  %vm3841_vm2 = vcmp.lt.s32.totalorder %v125_v51, 32 }
  0x5f   :  { %710 = vmatpush.msra.mxu2 %v3591_v49  ;;  %671 = vmatpush.msra.mxu0 %v3469_v30 }
  0x60   :  { %585 = vmatpush.msra.mxu3 %v3494_v34  ;;  %691 = vmatpush.msra.mxu1 %v3606_v52 }
  0x61   :  { %711 = vmatpush.msra.mxu2 %v3598_v50  ;;  %672 = vmatpush.msra.mxu0 %v3481_v32 }
  0x62   :  { %586 = vmatpush.msra.mxu3 %v3530_v40  ;;  %692 = vmatpush.msra.mxu1 %v3623_v55 }
  0x63   :  { %712 = vmatpush.msra.mxu2 %v3611_v53  ;;  %673 = vmatpush.msra.mxu0 %v3500_v35 }
  0x64   :  { %587 = vmatpush.msra.mxu3 %v3558_v44  ;;  %693 = vmatpush.msra.mxu1 %v3642_v57 }
  0x65   :  { %713 = vmatpush.msra.mxu2 %v3632_v56  ;;  %674 = vmatpush.msra.mxu0 %v3517_v38 }
  0x66   :  { %588 = vmatpush.msra.mxu3 %v3591_v49  ;;  %694 = vmatpush.msra.mxu1 %v3655_v59 }
  0x67   :  { %714 = vmatpush.msra.mxu2 %v3647_v58  ;;  %675 = vmatpush.msra.mxu0 %v3538_v41 }
  0x68   :  { %589 = vmatpush.msra.mxu3 %v3598_v50  ;;  %695 = vmatpush.msra.mxu1 %v3672_v62 }
  0x69   :  { %715 = vmatpush.msra.mxu2 %v3660_v60  ;;  %676 = vmatpush.msra.mxu0 %v3545_v42 }
  0x6a   :  { %590 = vmatpush.msra.mxu3 %v3611_v53  ;;  %696 = vmatpush.msra.mxu1 %v3691_v0 }
  0x6b   :  { %716 = vmatpush.msra.mxu2 %v3681_v63  ;;  %677 = vmatpush.msra.mxu0 %v3564_v45 }
  0x6c   :  { %591 = vmatpush.msra.mxu3 %v3632_v56  ;;  %697 = vmatpush.msra.mxu1 %v3704_v2 }
  0x6d   :  { %717 = vmatpush.msra.mxu2 %v3696_v1  ;;  %804 = vmatpush.msrb.mxu0 %v3413_v21 }
  0x6e   :  { %592 = vmatpush.msra.mxu3 %v3647_v58 }
  0x6f   :  { %805 = vmatpush.msrb.mxu0 %v3436_v25 }
  0x70   :  { %593 = vmatpush.msra.mxu3 %v3660_v60 }
  0x71   :  { %806 = vmatpush.msrb.mxu0 %v3453_v28 }
  0x72   :  { %594 = vmatpush.msra.mxu3 %v3681_v63 }
  0x73   :  { %807 = vmatpush.msrb.mxu0 %v3486_v33 }
  0x74   :  { %595 = vmatpush.msra.mxu3 %v3696_v1 }
  0x75   :  { %808 = vmatpush.msrb.mxu0 %v3505_v36 }
  0x76   :  { %784 = vmatpush.msrb.mxu3 %v3361_v3 }
  0x77   :  { %809 = vmatpush.msrb.mxu0 %v3522_v39 }
  0x78   :  { %785 = vmatpush.msrb.mxu3 %v3367_v7 }
  0x79   :  { %810 = vmatpush.msrb.mxu0 %v3550_v43 }
  0x7a   :  { %786 = vmatpush.msrb.mxu3 %v3372_v11 }
  0x7b   :  { %811 = vmatpush.msrb.mxu0 %v3569_v46 }
  0x7c   :  { %787 = vmatpush.msrb.mxu3 %v3378_v15 }
  0x7d   :  { %812 = vmatpush.msrb.mxu0 %v3581_v48 }
  0x7e   :  { %788 = vmatpush.msrb.mxu3 %v3387_v17 }
  0x7f   :  { %813 = vmatpush.msrb.mxu0 %v3606_v52 }
  0x80   :  { %789 = vmatpush.msrb.mxu3 %v3395_v18 }
  0x81   :  { %814 = vmatpush.msrb.mxu0 %v3623_v55 }
  0x82   :  { %790 = vmatpush.msrb.mxu3 %v3407_v20 }
  0x83   :  { %815 = vmatpush.msrb.mxu0 %v3642_v57 }
  0x84   :  { %791 = vmatpush.msrb.mxu3 %v3431_v24 }
  0x85   :  { %816 = vmatpush.msrb.mxu0 %v3655_v59  ;;  %v177_v59 = vperm.slane %v173_v5, 2 }
  0x86   :  { %792 = vmatpush.msrb.mxu3 %v3447_v27 }
  0x87   :  { %817 = vmatpush.msrb.mxu0 %v3672_v62  ;;  %v5972_v62 = vmov 0 }
  0x88   :  { %793 = vmatpush.msrb.mxu3 %v3469_v30  ;;  %v5973_v62 = vsel %vm3841_vm2, 4294967295, %v5972_v62 }
  0x89   :  { %818 = vmatpush.msrb.mxu0 %v3691_v0  ;;  %5974 = vst [vmem:[#allocation32_spill] sm:$0xff] %v5973_v62 }
  0x8a   :  { %794 = vmatpush.msrb.mxu3 %v3481_v32 }
  0x8b   :  { %819 = vmatpush.msrb.mxu0 %v3704_v2  ;;  %v176_v2 = vperm.slane %v173_v5, 1 }
  0x8c   :  { %795 = vmatpush.msrb.mxu3 %v3500_v35 }
  0x8e   :  { %796 = vmatpush.msrb.mxu3 %v3517_v38  ;;  %v132_v38 = vand.u32 127, %v113_v26 }
  0x90   :  { %797 = vmatpush.msrb.mxu3 %v3538_v41  ;;  %vm3863_vm3 = vcmp.lt.s32.totalorder %v132_v38, 32 }
  0x92   :  { %798 = vmatpush.msrb.mxu3 %v3545_v42 }
  0x94   :  { %799 = vmatpush.msrb.mxu3 %v3564_v45  ;;  %v175_v45 = vperm.slane %v173_v5, 0 }
  0x99   :  { %v3825_v6 = vpop.f32.mrf.mxu0  ;;  %v3827_v8 = vpop.f32.mrf.mxu1 }
  0xa0   :  { %v3829_v9 = vpop.f32.mrf.mxu2 }
  0xa1   :  { %v226_v10 = vpop.f32.mrf.mxu0  ;;  %v267_v12 = vpop.f32.mrf.mxu1 }
  0xa2   :  { %v227_v51 = vadd.f32 %v226_v10, %v175_v45 }
  0xa8   :  { %v308_v13 = vpop.f32.mrf.mxu2 }
  0xa9   :  { %v229_v14 = vpop.f32.mrf.mxu0  ;;  %v270_v16 = vpop.f32.mrf.mxu1 }
  0xb0   :  { %v311_v47 = vpop.f32.mrf.mxu2 }
  0xb1   :  { %v232_v54 = vpop.f32.mrf.mxu0  ;;  %v273_v61 = vpop.f32.mrf.mxu1 }
  0xb2   :  { %v3837_v1 = vadd.f32 %v273_v61, %v176_v2  ;;  %v3845_v41 = vadd.f32 %v232_v54, %v175_v45 }
  0xb4   :  { %5971 = vst [vmem:[#allocation31_spill] sm:$0xff] %v3837_v1 }
  0xb5   :  { %5975 = vst [vmem:[#allocation33_spill] sm:$0xff] %v3845_v41 }
  0xb8   :  { %v314_v0 = vpop.f32.mrf.mxu2 }
  0xb9   :  { %v235_v42 = vpop.f32.mrf.mxu0  ;;  %v276_v63 = vpop.f32.mrf.mxu1  ;;  %v3861_v58 = vadd.f32 %v314_v0, %v177_v59 }
  0xba   :  { %v3847_v60 = vadd.f32 %v235_v42, %v175_v45  ;;  %v3849_v4 = vadd.f32 %v276_v63, %v176_v2 }
  0xbb   :  { %5979 = vst [vmem:[#allocation37_spill] sm:$0xff] %v3861_v58  ;;  %v3897_v58 = vadd.f32 %v267_v12, %v176_v2 }
  0xbc   :  { %5976 = vst [vmem:[#allocation34_spill] sm:$0xff] %v3847_v60  ;;  %v3855_v61 = vsel %vm150_vm1, %v3847_v60, %v3845_v41  ;;  %v230_v41 = vadd.f32 %v229_v14, %v175_v45 }
  0xbd   :  { %5977 = vst [vmem:[#allocation35_spill] sm:$0xff] %v3849_v4  ;;  %v224_v4 = vadd.f32 %v3825_v6, %v175_v45 }
  0xbe   :  { %5978 = vst [vmem:[#allocation36_spill] sm:$0xff] %v3855_v61  ;;  %v3869_v61 = vadd.f32 %v270_v16, %v176_v2 }
  0xbf   :  { %5989 = vst [vmem:[#allocation45_spill] sm:$0xff] %v3897_v58 }
  0xc0   :  { %v317_v54 = vpop.f32.mrf.mxu2  ;;  %5983 = vst [vmem:[#allocation39_spill] sm:$0xff] %v3869_v61 }
  0xc1   :  { %v3867_v63 = vadd.f32 %v317_v54, %v177_v59  ;;  %v238_v57 = vpop.f32.mrf.mxu0  ;;  %v279_v35 = vpop.f32.mrf.mxu1 }
  0xc2   :  { %v239_v60 = vadd.f32 %v238_v57, %v175_v45  ;;  %v3871_v56 = vadd.f32 %v279_v35, %v176_v2  ;;  %v3893_v57 = vadd.f32 %v311_v47, %v177_v59  ;;  %v3926_v35 = vadd.f32 %v308_v13, %v177_v59 }
  0xc3   :  { %5982 = vst [vmem:[#allocation38_spill] sm:$0xff] %v3867_v63 }
  0xc4   :  { %5984 = vst [vmem:[#allocation40_spill] sm:$0xff] %v3871_v56  ;;  %v3879_v38 = vsel %vm150_vm1, %v230_v41, %v239_v60  ;;  %v3887_v14 = vsel %vm150_vm1, %v239_v60, %v230_v41  ;;  %v353_v41 = vld [vmem:[%s5790_s4] sm:$0x7] }
  0xc5   :  { %5985 = vst [vmem:[#allocation41_spill] sm:$0xff] %v3879_v38 }
  0xc6   :  { %5986 = vst [vmem:[#allocation42_spill] sm:$0xff] %v3887_v14 }
  0xc7   :  { %5987 = vst [vmem:[#allocation43_spill] sm:$0xff] %v3893_v57 }
  0xc8   :  { %v320_v16 = vpop.f32.mrf.mxu2  ;;  %5993 = vst [vmem:[#allocation49_spill] sm:$0xff] %v3926_v35 }
  0xc9   :  { %v3895_v26 = vadd.f32 %v320_v16, %v177_v59  ;;  %v241_v54 = vpop.f32.mrf.mxu0  ;;  %v282_v0 = vpop.f32.mrf.mxu1  ;;  %v3924_v16 = vperm.slane %v353_v41, 0 }
  0xca   :  { %v242_v5 = vadd.f32 %v241_v54, %v175_v45  ;;  %v3899_v63 = vadd.f32 %v282_v0, %v176_v2  ;;  %v436_v54 = vpop.f32.mrf.mxu3  ;;  %v3955_v0 = vadd.f32 %v3829_v9, %v177_v59 }
  0xcb   :  { %5988 = vst [vmem:[#allocation44_spill] sm:$0xff] %v3895_v26  ;;  %v437_v14 = vadd.f32 %v436_v54, %v3924_v16  ;;  %v3967_v26 = vperm.slane %v353_v41, 2 }
  0xcc   :  { %5990 = vst [vmem:[#allocation46_spill] sm:$0xff] %v3899_v63  ;;  %v3910_v47 = vsel %vm150_vm1, %v227_v51, %v242_v5  ;;  %v3918_v12 = vsel %vm150_vm1, %v242_v5, %v227_v51 }
  0xcd   :  { %5991 = vst [vmem:[#allocation47_spill] sm:$0xff] %v3918_v12  ;;  %v3933_v12 = vadd.f32 %v3827_v8, %v176_v2 }
  0xce   :  { %5992 = vst [vmem:[#allocation48_spill] sm:$0xff] %v3924_v16 }
  0xcf   :  { %5995 = vst [vmem:[#allocation51_spill] sm:$0xff] %v3933_v12 }
  0xd0   :  { %v323_v60 = vpop.f32.mrf.mxu2  ;;  %5999 = vst [vmem:[#allocation55_spill] sm:$0xff] %v3955_v0 }
  0xd1   :  { %v3929_v1 = vadd.f32 %v323_v60, %v177_v59  ;;  %v244_v10 = vpop.f32.mrf.mxu0  ;;  %v3943_v60 = vperm.slane %v353_v41, 1 }
  0xd2   :  { %v245_v51 = vadd.f32 %v244_v10, %v175_v45  ;;  %v285_v5 = vpop.f32.mrf.mxu1 }
  0xd3   :  { %5994 = vst [vmem:[#allocation50_spill] sm:$0xff] %v3929_v1  ;;  %v3935_v57 = vadd.f32 %v285_v5, %v176_v2 }
  0xd4   :  { %v416_v54 = vsel %vm150_vm1, %v224_v4, %v245_v51  ;;  %5997 = vst [vmem:[#allocation53_spill] sm:$0xff] %v3943_v60  ;;  %v3947_v6 = vsel %vm150_vm1, %v245_v51, %v224_v4 }
  0xd5   :  { %5996 = vst [vmem:[#allocation52_spill] sm:$0xff] %v3935_v57  ;;  %v479_v45 = vadd.f32 %v437_v14, %v416_v54  ;;  %v417_v4 = vsel %vm3841_vm2, %v3933_v12, %v3935_v57 }
  0xd6   :  { %5998 = vst [vmem:[#allocation54_spill] sm:$0xff] %v3947_v6 }
  0xd7   :  { %v2861_v8 = vmul.f32 -1.442695, %v479_v45  ;;  %v456_v10 = vpop.f32.mrf.mxu3 }
  0xd8   :  { %v457_v5 = vadd.f32 %v456_v10, %v3943_v60  ;;  %v326_v13 = vpop.f32.mrf.mxu2 }
  0xd9   :  { %2904 = vpow2.f32 %v2861_v8  ;;  %v3961_v14 = vadd.f32 %v326_v13, %v177_v59  ;;  %v476_v13 = vpop.f32.mrf.mxu0 }
  0xda   :  { %v499_v51 = vadd.f32 %v457_v5, %v417_v4 }
  0xdb   :  { %6000 = vst [vmem:[#allocation56_spill] sm:$0xff] %v3961_v14 }
  0xdc   :  { %v2862_v45 = vmul.f32 -1.442695, %v499_v51  ;;  %v477_v51 = vadd.f32 %v476_v13, %v3967_v26 }
  0xde   :  { %2906 = vpow2.f32 %v2862_v45 }
  0xdf   :  { %v2905_v10 = vpop.eup %2904 }
  0xe0   :  { %v483_v2 = vadd.f32 1.0, %v2905_v10 }
  0xe2   :  { %2908 = vrcp.f32 %v483_v2  ;;  %v495_v5 = vand.u32 2147483648, %v483_v2  ;;  %v493_v57 = vand.u32 2147483647, %v483_v2  ;;  %vm489_vm5 = vweird.f32 %v483_v2 }
  0xe4   :  { %v2907_v9 = vpop.eup %2906  ;;  %vm494_vm7 = vcmp.eq.f32.partialorder %v493_v57, 8.507059e+37 }
  0xe5   :  { %v503_v8 = vadd.f32 1.0, %v2907_v9  ;;  %v496_v9 = vor.u32 1.1754944e-38, %v495_v5 }
  0xe7   :  { %2910 = vrcp.f32 %v503_v8  ;;  %vm509_vm9 = vweird.f32 %v503_v8  ;;  %v513_v13 = vand.u32 2147483647, %v503_v8 }
  0xe8   :  { %v2909_v6 = vpop.eup %2908 }
  0xe9   :  { %v485_v37 = vmul.f32 %v2909_v6, %v483_v2  ;;  %vm490_vm4 = vweird.f32 %v2909_v6  ;;  %vm514_vm11 = vcmp.eq.f32.partialorder %v513_v13, 8.507059e+37 }
  0xea   :  { %vm491_vm6 = vmor %vm489_vm5, %vm490_vm4 }
  0xeb   :  { %v486_v59 = vsub.f32 1.0, %v485_v37  ;;  %v515_v37 = vand.u32 2147483648, %v503_v8 }
  0xed   :  { %v2911_v4 = vpop.eup %2910  ;;  %v487_v12 = vmul.f32 %v2909_v6, %v486_v59  ;;  %v418_v59 = vsel %vm3863_vm3, %v3955_v0, %v3961_v14 }
  0xee   :  { %v505_v54 = vmul.f32 %v2911_v4, %v503_v8  ;;  %vm510_vm8 = vweird.f32 %v2911_v4  ;;  %v6012_v8 = vld [vmem:[#allocation18_spill] sm:$0xff] }
  0xef   :  { %v488_v45 = vadd.f32 %v2909_v6, %v487_v12  ;;  %vm511_vm10 = vmor %vm509_vm9, %vm510_vm8 }
  0xf0   :  { %v506_v10 = vsub.f32 1.0, %v505_v54  ;;  %v516_v54 = vor.u32 1.1754944e-38, %v515_v37 }
  0xf1   :  { %v492_v56 = vsel %vm491_vm6, %v2909_v6, %v488_v45 }
  0xf2   :  { %v507_v61 = vmul.f32 %v2911_v4, %v506_v10  ;;  %v497_v41 = vsel %vm494_vm7, %v496_v9, %v492_v56  ;;  %v6014_v10 = vld [vmem:[#allocation28_spill] sm:$0xff]  ;;  %v6015_v9 = vld [vmem:[#allocation19_spill] sm:$0xff] }
  0xf3   :  { %v519_v38 = vmul.f32 %v497_v41, %v477_v51  ;;  %v6016_v41 = vld [vmem:[#allocation29_spill] sm:$0xff] }
  0xf4   :  { %v508_v35 = vadd.f32 %v2911_v4, %v507_v61  ;;  %v6009_v61 = vld [vmem:[#allocation17_spill] sm:$0xff] }
  0xf5   :  { %v520_v12 = vadd.f32 %v519_v38, %v418_v59  ;;  %v6010_v38 = vld [vmem:[#allocation25_spill] sm:$0xff] }
  0xf6   :  { %v512_v2 = vsel %vm511_vm10, %v2911_v4, %v508_v35  ;;  %v6011_v35 = vld [vmem:[#allocation26_spill] sm:$0xff]  ;;  %v6013_v4 = vld [vmem:[#allocation27_spill] sm:$0xff] }
  0xf7   :  { %2912 = vtanh.f32 %v520_v12  ;;  %v517_v57 = vsel %vm514_vm11, %v516_v54, %v512_v2 }
  0xf8   :  { %v522_v6 = vsub.f32 1.0, %v517_v57  ;;  %v524_v45 = vmul.f32 0.0, %v517_v57  ;;  %v6017_v57 = vsel %vm3841_vm2, %v3897_v58, %v3899_v63 }
  0xfd   :  { %v2913_v56 = vpop.eup %2912 }
  0xfe   :  { %v523_v5 = vmul.f32 %v2913_v56, %v522_v6 }
 0x100   :  { %v3974_v51 = vadd.f32 %v524_v45, %v523_v5 }
 0x102   :  { %6001 = vst [vmem:[#allocation57_spill] sm:$0xff] %v3974_v51  ;;  %556 = vmatmul.f32.vlgmr.msrb.gmra.mxu1 %v3974_v51  ;;  %576 = vmatmul.f32.vlgmr.msrb.gmra.mxu2 %v3974_v51 }
 0x103   :  { %596 = vmatmul.f32.vlgmr.msra.gmra.mxu3 %v3974_v51  ;;  %824 = vmatpush.msrb.mxu1 %v3402_v19 }
 0x104   :  { %904 = vmatpush.msrb.mxu2 %v3361_v3  ;;  %924 = vmatpush.msra.mxu3 %v3413_v21  ;;  %v6002_v3 = vld [vmem:[#allocation20_spill] sm:$0xff] }
 0x105   :  { %825 = vmatpush.msrb.mxu1 %v3418_v22 }
 0x106   :  { %905 = vmatpush.msrb.mxu2 %v3367_v7  ;;  %925 = vmatpush.msra.mxu3 %v3436_v25  ;;  %v6003_v7 = vld [vmem:[#allocation15_spill] sm:$0xff] }
 0x107   :  { %826 = vmatpush.msrb.mxu1 %v3425_v23 }
 0x108   :  { %906 = vmatpush.msrb.mxu2 %v3372_v11  ;;  %926 = vmatpush.msra.mxu3 %v3453_v28  ;;  %v6004_v11 = vld [vmem:[#allocation21_spill] sm:$0xff] }
 0x109   :  { %827 = vmatpush.msrb.mxu1 %v3461_v29 }
 0x10a   :  { %907 = vmatpush.msrb.mxu2 %v3378_v15  ;;  %927 = vmatpush.msra.mxu3 %v3486_v33  ;;  %v6005_v15 = vld [vmem:[#allocation22_spill] sm:$0xff] }
 0x10b   :  { %828 = vmatpush.msrb.mxu1 %v3476_v31 }
 0x10c   :  { %908 = vmatpush.msrb.mxu2 %v3387_v17  ;;  %928 = vmatpush.msra.mxu3 %v3505_v36  ;;  %v6006_v17 = vld [vmem:[#allocation16_spill] sm:$0xff] }
 0x10d   :  { %829 = vmatpush.msrb.mxu1 %v3494_v34 }
 0x10e   :  { %909 = vmatpush.msrb.mxu2 %v3395_v18  ;;  %929 = vmatpush.msra.mxu3 %v3522_v39  ;;  %v6007_v18 = vld [vmem:[#allocation23_spill] sm:$0xff] }
 0x10f   :  { %830 = vmatpush.msrb.mxu1 %v3530_v40 }
 0x110   :  { %910 = vmatpush.msrb.mxu2 %v3407_v20  ;;  %930 = vmatpush.msra.mxu3 %v3550_v43  ;;  %v6008_v20 = vld [vmem:[#allocation24_spill] sm:$0xff] }
 0x111   :  { %831 = vmatpush.msrb.mxu1 %v3558_v44 }
 0x112   :  { %911 = vmatpush.msrb.mxu2 %v3431_v24  ;;  %931 = vmatpush.msra.mxu3 %v3569_v46 }
 0x113   :  { %832 = vmatpush.msrb.mxu1 %v3591_v49 }
 0x114   :  { %912 = vmatpush.msrb.mxu2 %v3447_v27  ;;  %932 = vmatpush.msra.mxu3 %v3581_v48 }
 0x115   :  { %833 = vmatpush.msrb.mxu1 %v3598_v50 }
 0x116   :  { %913 = vmatpush.msrb.mxu2 %v3469_v30  ;;  %933 = vmatpush.msra.mxu3 %v3606_v52 }
 0x117   :  { %834 = vmatpush.msrb.mxu1 %v3611_v53 }
 0x118   :  { %914 = vmatpush.msrb.mxu2 %v3481_v32  ;;  %934 = vmatpush.msra.mxu3 %v3623_v55 }
 0x119   :  { %835 = vmatpush.msrb.mxu1 %v6002_v3 }
 0x11a   :  { %915 = vmatpush.msrb.mxu2 %v6003_v7  ;;  %935 = vmatpush.msra.mxu3 %v6004_v11 }
 0x11b   :  { %836 = vmatpush.msrb.mxu1 %v6005_v15 }
 0x11c   :  { %916 = vmatpush.msrb.mxu2 %v6006_v17  ;;  %936 = vmatpush.msra.mxu3 %v6007_v18 }
 0x11d   :  { %837 = vmatpush.msrb.mxu1 %v6008_v20 }
 0x11e   :  { %917 = vmatpush.msrb.mxu2 %v6009_v61  ;;  %937 = vmatpush.msra.mxu3 %v6010_v38 }
 0x11f   :  { %838 = vmatpush.msrb.mxu1 %v6011_v35 }
 0x120   :  { %918 = vmatpush.msrb.mxu2 %v6012_v8  ;;  %938 = vmatpush.msra.mxu3 %v6013_v4 }
 0x121   :  { %839 = vmatpush.msrb.mxu1 %v6014_v10 }
 0x122   :  { %919 = vmatpush.msrb.mxu2 %v6015_v9  ;;  %939 = vmatpush.msra.mxu3 %v6016_v41 }
 0x17f   :  { %v557_v37 = vpop.f32.mrf.mxu1 }
 0x180   :  { %v558_v59 = vadd.f32 %v557_v37, %v3924_v16 }
 0x182   :  { %v600_v13 = vadd.f32 %v558_v59, %v3910_v47 }
 0x184   :  { %v2863_v12 = vmul.f32 -1.442695, %v600_v13 }
 0x185   :  { %v577_v2 = vpop.f32.mrf.mxu2 }
 0x186   :  { %2914 = vpow2.f32 %v2863_v12  ;;  %v578_v54 = vadd.f32 %v577_v2, %v3943_v60  ;;  %v597_v60 = vpop.f32.mrf.mxu3 }
 0x188   :  { %v620_v6 = vadd.f32 %v578_v54, %v6017_v57 }
 0x18a   :  { %v2864_v56 = vmul.f32 -1.442695, %v620_v6  ;;  %v598_v6 = vadd.f32 %v597_v60, %v3967_v26 }
 0x18c   :  { %v2915_v5 = vpop.eup %2914  ;;  %2916 = vpow2.f32 %v2864_v56 }
 0x18d   :  { %v604_v45 = vadd.f32 1.0, %v2915_v5 }
 0x18f   :  { %2918 = vrcp.f32 %v604_v45  ;;  %v616_v13 = vand.u32 2147483648, %v604_v45  ;;  %v614_v2 = vand.u32 2147483647, %v604_v45  ;;  %vm610_vm13 = vweird.f32 %v604_v45 }
 0x191   :  { %v617_v54 = vor.u32 1.1754944e-38, %v616_v13  ;;  %vm615_vm15 = vcmp.eq.f32.partialorder %v614_v2, 8.507059e+37 }
 0x192   :  { %v2917_v0 = vpop.eup %2916 }
 0x193   :  { %v624_v37 = vadd.f32 1.0, %v2917_v0 }
 0x195   :  { %v2919_v14 = vpop.eup %2918  ;;  %2920 = vrcp.f32 %v624_v37  ;;  %v634_v9 = vand.u32 2147483647, %v624_v37  ;;  %vm630_vm4 = vweird.f32 %v624_v37 }
 0x196   :  { %v606_v47 = vmul.f32 %v2919_v14, %v604_v45  ;;  %vm611_vm12 = vweird.f32 %v2919_v14 }
 0x197   :  { %vm612_vm14 = vmor %vm610_vm13, %vm611_vm12  ;;  %vm635_vm6 = vcmp.eq.f32.partialorder %v634_v9, 8.507059e+37 }
 0x198   :  { %v607_v59 = vsub.f32 1.0, %v606_v47  ;;  %v636_v47 = vand.u32 2147483648, %v624_v37 }
 0x19a   :  { %v608_v12 = vmul.f32 %v2919_v14, %v607_v59  ;;  %v6018_v59 = vld [vmem:[#allocation49_spill] sm:$0xff] }
 0x19b   :  { %v2921_v62 = vpop.eup %2920  ;;  %v539_v41 = vsel %vm3863_vm3, %v6018_v59, %v3929_v1 }
 0x19c   :  { %v626_v16 = vmul.f32 %v2921_v62, %v624_v37  ;;  %v609_v58 = vadd.f32 %v2919_v14, %v608_v12  ;;  %vm631_vm0 = vweird.f32 %v2921_v62 }
 0x19d   :  { %vm632_vm5 = vmor %vm630_vm4, %vm631_vm0 }
 0x19e   :  { %v627_v57 = vsub.f32 1.0, %v626_v16  ;;  %v613_v56 = vsel %vm612_vm14, %v2919_v14, %v609_v58  ;;  %v637_v16 = vor.u32 1.1754944e-38, %v636_v47  ;;  %v6030_v47 = vld [vmem:[#allocation43_spill] sm:$0xff] }
 0x19f   :  { %v618_v0 = vsel %vm615_vm15, %v617_v54, %v613_v56 }
 0x1a0   :  { %v628_v5 = vmul.f32 %v2921_v62, %v627_v57  ;;  %v640_v63 = vmul.f32 %v618_v0, %v598_v6 }
 0x1a2   :  { %v629_v45 = vadd.f32 %v2921_v62, %v628_v5  ;;  %v641_v12 = vadd.f32 %v640_v63, %v539_v41  ;;  %v4058_v63 = vld [vmem:[%s5788_s2 + $0x150] sm:$0xff]  ;;  %v6029_v5 = vld [vmem:[#allocation44_spill] sm:$0xff] }
 0x1a4   :  { %v633_v13 = vsel %vm632_vm5, %v2921_v62, %v629_v45  ;;  %2922 = vtanh.f32 %v641_v12  ;;  %v4050_v62 = vld [vmem:[%s5788_s2 + $0x168] sm:$0xff]  ;;  %v661_v45 = vsel %vm3863_vm3, %v6030_v47, %v6029_v5 }
 0x1a5   :  { %v638_v58 = vsel %vm635_vm6, %v637_v16, %v633_v13 }
 0x1a6   :  { %v643_v60 = vsub.f32 1.0, %v638_v58  ;;  %v645_v54 = vmul.f32 %v638_v58, %v3974_v51  ;;  %v6040_v51 = vld [vmem:[#allocation31_spill] sm:$0xff] }
 0x1aa   :  { %v2923_v14 = vpop.eup %2922 }
 0x1ab   :  { %v644_v2 = vmul.f32 %v2923_v14, %v643_v60 }
 0x1ad   :  { %v4041_v57 = vadd.f32 %v645_v54, %v644_v2 }
 0x1af   :  { %6019 = vst [vmem:[#allocation20_spill] sm:$0xff] %v4041_v57  ;;  %678 = vmatmul.f32.vlgmr.msra.gmra.mxu0 %v4041_v57  ;;  %698 = vmatmul.f32.vlgmr.msra.gmra.mxu1 %v4041_v57 }
 0x1b0   :  { %718 = vmatmul.f32.vlgmr.msra.gmra.mxu2 %v4041_v57  ;;  %944 = vmatpush.msra.mxu0 %v3402_v19  ;;  %v4066_v19 = vld [vmem:[%s5788_s2 + $0x138] sm:$0xff] }
 0x1b1   :  { %1024 = vmatpush.msra.mxu1 %v4050_v62  ;;  %1044 = vmatpush.msra.mxu2 %v3413_v21  ;;  %v4074_v21 = vld [vmem:[%s5788_s2 + $0x120] sm:$0xff] }
 0x1b2   :  { %945 = vmatpush.msra.mxu0 %v3418_v22  ;;  %v4082_v22 = vld [vmem:[%s5788_s2 + $0x108] sm:$0xff] }
 0x1b3   :  { %1025 = vmatpush.msra.mxu1 %v4058_v63  ;;  %1045 = vmatpush.msra.mxu2 %v3436_v25  ;;  %v4098_v25 = vld [vmem:[%s5788_s2 + $0xd8] sm:$0xff] }
 0x1b4   :  { %946 = vmatpush.msra.mxu0 %v3425_v23  ;;  %v4090_v23 = vld [vmem:[%s5788_s2 + $0xf0] sm:$0xff] }
 0x1b5   :  { %1026 = vmatpush.msra.mxu1 %v4066_v19  ;;  %1046 = vmatpush.msra.mxu2 %v3453_v28 }
 0x1b6   :  { %947 = vmatpush.msra.mxu0 %v3461_v29 }
 0x1b7   :  { %1027 = vmatpush.msra.mxu1 %v4074_v21  ;;  %1047 = vmatpush.msra.mxu2 %v3486_v33 }
 0x1b8   :  { %948 = vmatpush.msra.mxu0 %v3476_v31 }
 0x1b9   :  { %1028 = vmatpush.msra.mxu1 %v4082_v22  ;;  %1048 = vmatpush.msra.mxu2 %v3505_v36 }
 0x1ba   :  { %949 = vmatpush.msra.mxu0 %v3494_v34  ;;  %v6024_v34 = vld [vmem:[#allocation41_spill] sm:$0xff] }
 0x1bb   :  { %1029 = vmatpush.msra.mxu1 %v4090_v23  ;;  %1049 = vmatpush.msra.mxu2 %v3522_v39 }
 0x1bc   :  { %950 = vmatpush.msra.mxu0 %v3530_v40  ;;  %v6026_v40 = vld [vmem:[#allocation39_spill] sm:$0xff] }
 0x1bd   :  { %1030 = vmatpush.msra.mxu1 %v4098_v25  ;;  %1050 = vmatpush.msra.mxu2 %v3550_v43  ;;  %v6027_v43 = vld [vmem:[#allocation40_spill] sm:$0xff] }
 0x1be   :  { %951 = vmatpush.msra.mxu0 %v3558_v44  ;;  %v6028_v44 = vsel %vm3841_vm2, %v6026_v40, %v6027_v43  ;;  %v6041_v43 = vld [vmem:[#allocation34_spill] sm:$0xff] }
 0x1bf   :  { %1031 = vmatpush.msra.mxu1 %v3431_v24  ;;  %1051 = vmatpush.msra.mxu2 %v3569_v46  ;;  %v6020_v24 = vld [vmem:[#allocation19_spill] sm:$0xff] }
 0x1c0   :  { %952 = vmatpush.msra.mxu0 %v3591_v49 }
 0x1c1   :  { %1032 = vmatpush.msra.mxu1 %v3447_v27  ;;  %1052 = vmatpush.msra.mxu2 %v3581_v48  ;;  %v6021_v27 = vld [vmem:[#allocation29_spill] sm:$0xff] }
 0x1c2   :  { %953 = vmatpush.msra.mxu0 %v3598_v50 }
 0x1c3   :  { %1033 = vmatpush.msra.mxu1 %v3469_v30  ;;  %1053 = vmatpush.msra.mxu2 %v3606_v52  ;;  %v6022_v30 = vld [vmem:[#allocation48_spill] sm:$0xff] }
 0x1c4   :  { %954 = vmatpush.msra.mxu0 %v3611_v53 }
 0x1c5   :  { %1034 = vmatpush.msra.mxu1 %v3481_v32  ;;  %1054 = vmatpush.msra.mxu2 %v3623_v55  ;;  %v6023_v32 = vld [vmem:[#allocation53_spill] sm:$0xff] }
 0x1c6   :  { %955 = vmatpush.msra.mxu0 %v6002_v3 }
 0x1c7   :  { %1035 = vmatpush.msra.mxu1 %v6003_v7  ;;  %1055 = vmatpush.msra.mxu2 %v6004_v11 }
 0x1c8   :  { %956 = vmatpush.msra.mxu0 %v6005_v15 }
 0x1c9   :  { %1036 = vmatpush.msra.mxu1 %v6006_v17  ;;  %1056 = vmatpush.msra.mxu2 %v6007_v18 }
 0x1ca   :  { %957 = vmatpush.msra.mxu0 %v6008_v20 }
 0x1cb   :  { %1037 = vmatpush.msra.mxu1 %v6009_v61  ;;  %1057 = vmatpush.msra.mxu2 %v6010_v38 }
 0x1cc   :  { %958 = vmatpush.msra.mxu0 %v6011_v35 }
 0x1cd   :  { %1038 = vmatpush.msra.mxu1 %v6012_v8  ;;  %1058 = vmatpush.msra.mxu2 %v6013_v4 }
 0x1ce   :  { %959 = vmatpush.msra.mxu0 %v6014_v10 }
 0x1cf   :  { %1039 = vmatpush.msra.mxu1 %v6020_v24  ;;  %1059 = vmatpush.msra.mxu2 %v6021_v27 }
 0x22c   :  { %v679_v28 = vpop.f32.mrf.mxu0  ;;  %v699_v29 = vpop.f32.mrf.mxu1 }
 0x22d   :  { %v680_v31 = vadd.f32 %v679_v28, %v6022_v30  ;;  %v700_v33 = vadd.f32 %v699_v29, %v6023_v32  ;;  %v4151_v28 = vld [vmem:[%s5788_s2 + $0x178] sm:$0xff]  ;;  %v4158_v29 = vld [vmem:[%s5788_s2 + $0x170] sm:$0xff] }
 0x22f   :  { %v722_v36 = vadd.f32 %v680_v31, %v6024_v34  ;;  %v742_v46 = vadd.f32 %v700_v33, %v6028_v44  ;;  %v4164_v31 = vld [vmem:[%s5788_s2 + $0x160] sm:$0xff]  ;;  %v4171_v33 = vld [vmem:[%s5788_s2 + $0x158] sm:$0xff]  ;;  %v4177_v34 = vld [vmem:[%s5788_s2 + $0x148] sm:$0xff] }
 0x230   :  { %v4190_v44 = vld [vmem:[%s5788_s2 + $0x130] sm:$0xff] }
 0x231   :  { %v2865_v48 = vmul.f32 -1.442695, %v722_v36  ;;  %v2866_v49 = vmul.f32 -1.442695, %v742_v46  ;;  %v4184_v36 = vld [vmem:[%s5788_s2 + $0x140] sm:$0xff]  ;;  %v4197_v46 = vld [vmem:[%s5788_s2 + $0x128] sm:$0xff] }
 0x233   :  { %2924 = vpow2.f32 %v2865_v48  ;;  %v719_v8 = vpop.f32.mrf.mxu2  ;;  %v4203_v48 = vld [vmem:[%s5788_s2 + $0x118] sm:$0xff] }
 0x234   :  { %2926 = vpow2.f32 %v2866_v49  ;;  %v720_v9 = vadd.f32 %v719_v8, %v3967_v26  ;;  %v4210_v49 = vld [vmem:[%s5788_s2 + $0x110] sm:$0xff]  ;;  %v4302_v8 = vld [vmem:[%s5788_s2 + $0x78] sm:$0xff] }
 0x239   :  { %v2925_v50 = vpop.eup %2924 }
 0x23a   :  { %v2927_v52 = vpop.eup %2926  ;;  %v726_v53 = vadd.f32 1.0, %v2925_v50  ;;  %v4216_v50 = vld [vmem:[%s5788_s2 + $0x100] sm:$0xff] }
 0x23b   :  { %v746_v55 = vadd.f32 1.0, %v2927_v52  ;;  %v4223_v52 = vld [vmem:[%s5788_s2 + $0xf8] sm:$0xff] }
 0x23c   :  { %2928 = vrcp.f32 %v726_v53  ;;  %v738_v20 = vand.u32 2147483648, %v726_v53  ;;  %v736_v38 = vand.u32 2147483647, %v726_v53  ;;  %vm732_vm8 = vweird.f32 %v726_v53 }
 0x23d   :  { %2930 = vrcp.f32 %v746_v55  ;;  %v758_v56 = vand.u32 2147483648, %v746_v55  ;;  %vm752_vm12 = vweird.f32 %v746_v55  ;;  %v756_v12 = vand.u32 2147483647, %v746_v55 }
 0x23e   :  { %v739_v10 = vor.u32 1.1754944e-38, %v738_v20  ;;  %vm737_vm10 = vcmp.eq.f32.partialorder %v736_v38, 8.507059e+37  ;;  %v4278_v20 = vld [vmem:[%s5788_s2 + $0xa0] sm:$0xff]  ;;  %v4290_v38 = vld [vmem:[%s5788_s2 + $0x98] sm:$0xff] }
 0x23f   :  { %v759_v58 = vor.u32 1.1754944e-38, %v758_v56  ;;  %vm757_vm14 = vcmp.eq.f32.partialorder %v756_v12, 8.507059e+37  ;;  %v4344_v56 = vld [vmem:[%s5788_s2 + $0x50] sm:$0xff]  ;;  %v4362_v12 = vld [vmem:[%s5788_s2 + $0x38] sm:$0xff] }
 0x240   :  { %6032 = vst [vmem:[#allocation21_spill] sm:$0xff] %v4362_v12 }
 0x242   :  { %v2929_v3 = vpop.eup %2928 }
 0x243   :  { %v2931_v7 = vpop.eup %2930  ;;  %v728_v11 = vmul.f32 %v2929_v3, %v726_v53  ;;  %vm733_vm7 = vweird.f32 %v2929_v3  ;;  %v4229_v53 = vld [vmem:[%s5788_s2 + $0xe8] sm:$0xff] }
 0x244   :  { %v748_v15 = vmul.f32 %v2931_v7, %v746_v55  ;;  %vm734_vm9 = vmor %vm732_vm8, %vm733_vm7  ;;  %vm753_vm11 = vweird.f32 %v2931_v7  ;;  %v4236_v55 = vld [vmem:[%s5788_s2 + $0xe0] sm:$0xff] }
 0x245   :  { %v729_v17 = vsub.f32 1.0, %v728_v11  ;;  %vm754_vm13 = vmor %vm752_vm12, %vm753_vm11  ;;  %v4254_v11 = vld [vmem:[%s5788_s2 + $0xc8] sm:$0xff] }
 0x246   :  { %v749_v18 = vsub.f32 1.0, %v748_v15  ;;  %v4260_v15 = vld [vmem:[%s5788_s2 + $0xb8] sm:$0xff] }
 0x247   :  { %v730_v61 = vmul.f32 %v2929_v3, %v729_v17  ;;  %v4266_v17 = vld [vmem:[%s5788_s2 + $0xa8] sm:$0xff] }
 0x248   :  { %v750_v35 = vmul.f32 %v2931_v7, %v749_v18  ;;  %v4272_v18 = vld [vmem:[%s5788_s2 + $0xb0] sm:$0xff] }
 0x249   :  { %v731_v4 = vadd.f32 %v2929_v3, %v730_v61  ;;  %v4284_v61 = vld [vmem:[%s5788_s2 + $0x90] sm:$0xff] }
 0x24a   :  { %v751_v37 = vadd.f32 %v2931_v7, %v750_v35  ;;  %v4296_v35 = vld [vmem:[%s5788_s2 + $0x88] sm:$0xff] }
 0x24b   :  { %v735_v41 = vsel %vm734_vm9, %v2929_v3, %v731_v4  ;;  %v4242_v3 = vld [vmem:[%s5788_s2 + $0xd0] sm:$0xff]  ;;  %v4308_v4 = vld [vmem:[%s5788_s2 + $0x80] sm:$0xff] }
 0x24c   :  { %v740_v6 = vsel %vm737_vm10, %v739_v10, %v735_v41  ;;  %v755_v13 = vsel %vm754_vm13, %v2931_v7, %v751_v37  ;;  %v4248_v7 = vld [vmem:[%s5788_s2 + $0xc0] sm:$0xff]  ;;  %v4314_v10 = vld [vmem:[%s5788_s2 + $0x70] sm:$0xff]  ;;  %v4326_v41 = vld [vmem:[%s5788_s2 + $0x68] sm:$0xff] }
 0x24d   :  { %v762_v0 = vmul.f32 %v740_v6, %v720_v9  ;;  %v760_v60 = vsel %vm757_vm14, %v759_v58, %v755_v13  ;;  %v4320_v9 = vld [vmem:[%s5788_s2 + $0x60] sm:$0xff]  ;;  %v4332_v37 = vld [vmem:[%s5788_s2 + $0x58] sm:$0xff]  ;;  %v4338_v6 = vld [vmem:[%s5788_s2 + $0x48] sm:$0xff] }
 0x24e   :  { %v765_v14 = vsub.f32 1.0, %v760_v60  ;;  %v767_v24 = vmul.f32 %v760_v60, %v4041_v57  ;;  %v4374_v13 = vld [vmem:[%s5788_s2 + $0x18] sm:$0xff]  ;;  %v4380_v58 = vld [vmem:[%s5788_s2 + $0x20] sm:$0xff]  ;;  %v4386_v60 = vld [vmem:[%s5788_s2 + $0x10] sm:$0xff] }
 0x24f   :  { %v763_v16 = vadd.f32 %v762_v0, %v661_v45  ;;  %v4350_v0 = vld [vmem:[%s5788_s2 + $0x40] sm:$0xff]  ;;  %v4356_v45 = vld [vmem:[%s5788_s2 + $0x30] sm:$0xff]  ;;  %6034 = vst [vmem:[#allocation16_spill] sm:$0xff] %v4374_v13 }
 0x250   :  { %6031 = vst [vmem:[#allocation15_spill] sm:$0xff] %v4356_v45  ;;  %v6039_v57 = vld [vmem:[#allocation35_spill] sm:$0xff] }
 0x251   :  { %2932 = vtanh.f32 %v763_v16  ;;  %v4368_v16 = vld [vmem:[%s5788_s2 + $0x28] sm:$0xff]  ;;  %6035 = vst [vmem:[#allocation23_spill] sm:$0xff] %v4380_v58  ;;  %v782_v59 = vsel %vm3841_vm2, %v6040_v51, %v6039_v57 }
 0x252   :  { %6033 = vst [vmem:[#allocation22_spill] sm:$0xff] %v4368_v16 }
 0x253   :  { %6036 = vst [vmem:[#allocation24_spill] sm:$0xff] %v4386_v60 }
 0x257   :  { %v2933_v2 = vpop.eup %2932 }
 0x258   :  { %v766_v54 = vmul.f32 %v2933_v2, %v765_v14  ;;  %v4392_v14 = vld [vmem:[%s5788_s2] sm:$0xff]  ;;  %v4398_v2 = vld [vmem:[%s5788_s2 + $0x8] sm:$0xff] }
 0x259   :  { %6037 = vst [vmem:[#allocation17_spill] sm:$0xff] %v4392_v14 }
 0x25a   :  { %v4143_v27 = vadd.f32 %v767_v24, %v766_v54  ;;  %6038 = vst [vmem:[#allocation25_spill] sm:$0xff] %v4398_v2 }
 0x25c   :  { %800 = vmatmul.f32.vlgmr.msrb.gmra.mxu3 %v4143_v27  ;;  %820 = vmatmul.f32.vlgmr.msrb.gmra.mxu0 %v4143_v27 }
 0x25d   :  { %840 = vmatmul.f32.vlgmr.msrb.gmra.mxu1 %v4143_v27  ;;  %1064 = vmatpush.msrb.mxu3 %v4151_v28 }
 0x25e   :  { %1144 = vmatpush.msrb.mxu0 %v4050_v62  ;;  %1164 = vmatpush.msrb.mxu1 %v4158_v29 }
 0x25f   :  { %1065 = vmatpush.msrb.mxu3 %v4164_v31 }
 0x260   :  { %1145 = vmatpush.msrb.mxu0 %v4058_v63  ;;  %1165 = vmatpush.msrb.mxu1 %v4171_v33 }
 0x261   :  { %1066 = vmatpush.msrb.mxu3 %v4177_v34 }
 0x262   :  { %1146 = vmatpush.msrb.mxu0 %v4066_v19  ;;  %1166 = vmatpush.msrb.mxu1 %v4184_v36 }
 0x263   :  { %1067 = vmatpush.msrb.mxu3 %v4190_v44 }
 0x264   :  { %1147 = vmatpush.msrb.mxu0 %v4074_v21  ;;  %1167 = vmatpush.msrb.mxu1 %v4197_v46 }
 0x265   :  { %1068 = vmatpush.msrb.mxu3 %v4203_v48 }
 0x266   :  { %1148 = vmatpush.msrb.mxu0 %v4082_v22  ;;  %1168 = vmatpush.msrb.mxu1 %v4210_v49 }
 0x267   :  { %1069 = vmatpush.msrb.mxu3 %v4216_v50 }
 0x268   :  { %1149 = vmatpush.msrb.mxu0 %v4090_v23  ;;  %1169 = vmatpush.msrb.mxu1 %v4223_v52 }
 0x269   :  { %1070 = vmatpush.msrb.mxu3 %v4229_v53 }
 0x26a   :  { %1150 = vmatpush.msrb.mxu0 %v4098_v25  ;;  %1170 = vmatpush.msrb.mxu1 %v4236_v55 }
 0x26b   :  { %1071 = vmatpush.msrb.mxu3 %v4242_v3 }
 0x26c   :  { %1151 = vmatpush.msrb.mxu0 %v4248_v7  ;;  %1171 = vmatpush.msrb.mxu1 %v4254_v11 }
 0x26d   :  { %1072 = vmatpush.msrb.mxu3 %v4260_v15 }
 0x26e   :  { %1152 = vmatpush.msrb.mxu0 %v4266_v17  ;;  %1172 = vmatpush.msrb.mxu1 %v4272_v18 }
 0x26f   :  { %1073 = vmatpush.msrb.mxu3 %v4278_v20 }
 0x270   :  { %1153 = vmatpush.msrb.mxu0 %v4284_v61  ;;  %1173 = vmatpush.msrb.mxu1 %v4290_v38 }
 0x271   :  { %1074 = vmatpush.msrb.mxu3 %v4296_v35 }
 0x272   :  { %1154 = vmatpush.msrb.mxu0 %v4302_v8  ;;  %1174 = vmatpush.msrb.mxu1 %v4308_v4 }
 0x273   :  { %1075 = vmatpush.msrb.mxu3 %v4314_v10 }
 0x274   :  { %1155 = vmatpush.msrb.mxu0 %v4320_v9  ;;  %1175 = vmatpush.msrb.mxu1 %v4326_v41 }
 0x275   :  { %1076 = vmatpush.msrb.mxu3 %v4332_v37 }
 0x276   :  { %1156 = vmatpush.msrb.mxu0 %v4338_v6  ;;  %1176 = vmatpush.msrb.mxu1 %v4344_v56 }
 0x277   :  { %1077 = vmatpush.msrb.mxu3 %v4350_v0 }
 0x278   :  { %1157 = vmatpush.msrb.mxu0 %v4356_v45  ;;  %1177 = vmatpush.msrb.mxu1 %v4362_v12  ;;  %v6045_v45 = vld [vmem:[#allocation37_spill] sm:$0xff] }
 0x279   :  { %1078 = vmatpush.msrb.mxu3 %v4368_v16 }
 0x27a   :  { %1158 = vmatpush.msrb.mxu0 %v4374_v13  ;;  %1178 = vmatpush.msrb.mxu1 %v4380_v58 }
 0x27b   :  { %1079 = vmatpush.msrb.mxu3 %v4386_v60 }
 0x27c   :  { %1159 = vmatpush.msrb.mxu0 %v4392_v14  ;;  %1179 = vmatpush.msrb.mxu1 %v4398_v2  ;;  %v6042_v14 = vld [vmem:[#allocation33_spill] sm:$0xff] }
 0x27d   :  { %v781_v58 = vsel %vm150_vm1, %v6042_v14, %v6041_v43 }
 0x2d9   :  { %v821_v54 = vpop.f32.mrf.mxu0 }
 0x2da   :  { %v822_v24 = vadd.f32 %v821_v54, %v6023_v32 }
 0x2dc   :  { %v864_v1 = vadd.f32 %v822_v24, %v782_v59 }
 0x2de   :  { %v2868_v47 = vmul.f32 -1.442695, %v864_v1 }
 0x2df   :  { %v801_v5 = vpop.f32.mrf.mxu3 }
 0x2e0   :  { %2934 = vpow2.f32 %v2868_v47  ;;  %v802_v40 = vadd.f32 %v801_v5, %v6022_v30 }
 0x2e2   :  { %v844_v2 = vadd.f32 %v802_v40, %v781_v58  ;;  %v841_v40 = vpop.f32.mrf.mxu1 }
 0x2e4   :  { %v2867_v13 = vmul.f32 -1.442695, %v844_v2 }
 0x2e6   :  { %v2935_v16 = vpop.eup %2934  ;;  %2936 = vpow2.f32 %v2867_v13  ;;  %v842_v13 = vadd.f32 %v841_v40, %v3967_v26 }
 0x2e7   :  { %v868_v54 = vadd.f32 1.0, %v2935_v16 }
 0x2e9   :  { %2938 = vrcp.f32 %v868_v54  ;;  %v880_v12 = vand.u32 2147483648, %v868_v54  ;;  %vm874_vm7 = vweird.f32 %v868_v54 }
 0x2ec   :  { %v2937_v32 = vpop.eup %2936 }
 0x2ed   :  { %v848_v39 = vadd.f32 1.0, %v2937_v32 }
 0x2ef   :  { %2940 = vrcp.f32 %v848_v39  ;;  %v2939_v59 = vpop.eup %2938  ;;  %v860_v57 = vand.u32 2147483648, %v848_v39  ;;  %v858_v60 = vand.u32 2147483647, %v848_v39  ;;  %vm854_vm0 = vweird.f32 %v848_v39 }
 0x2f0   :  { %v870_v1 = vmul.f32 %v2939_v59, %v868_v54  ;;  %vm875_vm6 = vweird.f32 %v2939_v59 }
 0x2f1   :  { %v861_v16 = vor.u32 1.1754944e-38, %v860_v57  ;;  %vm859_vm5 = vcmp.eq.f32.partialorder %v858_v60, 8.507059e+37  ;;  %vm876_vm8 = vmor %vm874_vm7, %vm875_vm6  ;;  %v881_v57 = vor.u32 1.1754944e-38, %v880_v12 }
 0x2f2   :  { %v871_v51 = vsub.f32 1.0, %v870_v1 }
 0x2f4   :  { %v872_v43 = vmul.f32 %v2939_v59, %v871_v51  ;;  %v878_v51 = vand.u32 2147483647, %v868_v54 }
 0x2f5   :  { %v2941_v24 = vpop.eup %2940 }
 0x2f6   :  { %v850_v47 = vmul.f32 %v2941_v24, %v848_v39  ;;  %vm855_vm15 = vweird.f32 %v2941_v24  ;;  %v873_v14 = vadd.f32 %v2939_v59, %v872_v43  ;;  %vm879_vm9 = vcmp.eq.f32.partialorder %v878_v51, 8.507059e+37 }
 0x2f7   :  { %vm856_vm4 = vmor %vm854_vm0, %vm855_vm15 }
 0x2f8   :  { %v851_v5 = vsub.f32 1.0, %v850_v47  ;;  %v6044_v47 = vld [vmem:[#allocation38_spill] sm:$0xff]  ;;  %v877_v39 = vsel %vm876_vm8, %v2939_v59, %v873_v14 }
 0x2fa   :  { %v852_v30 = vmul.f32 %v2941_v24, %v851_v5  ;;  %v783_v5 = vsel %vm3863_vm3, %v6045_v45, %v6044_v47 }
 0x2fc   :  { %v853_v58 = vadd.f32 %v2941_v24, %v852_v30 }
 0x2fe   :  { %v857_v32 = vsel %vm856_vm4, %v2941_v24, %v853_v58  ;;  %v882_v24 = vsel %vm879_vm9, %v881_v57, %v877_v39 }
 0x2ff   :  { %v862_v2 = vsel %vm859_vm5, %v861_v16, %v857_v32  ;;  %v887_v60 = vsub.f32 1.0, %v882_v24  ;;  %v889_v40 = vmul.f32 %v882_v24, %v4143_v27 }
 0x300   :  { %v884_v1 = vmul.f32 %v862_v2, %v842_v13 }
 0x302   :  { %v885_v30 = vadd.f32 %v884_v1, %v783_v5 }
 0x304   :  { %2942 = vtanh.f32 %v885_v30 }
 0x30a   :  { %v2943_v43 = vpop.eup %2942 }
 0x30b   :  { %v888_v58 = vmul.f32 %v2943_v43, %v887_v60 }
 0x30d   :  { %v4417_v16 = vadd.f32 %v889_v40, %v888_v58 }
 0x30f   :  { %920 = vmatmul.f32.vlgmr.msrb.gmra.mxu2 %v4417_v16  ;;  %940 = vmatmul.f32.vlgmr.msra.gmra.mxu3 %v4417_v16 }
 0x310   :  { %960 = vmatmul.f32.vlgmr.msra.gmra.mxu0 %v4417_v16  ;;  %1184 = vmatpush.msrb.mxu2 %v4151_v28 }
 0x311   :  { %1264 = vmatpush.msra.mxu3 %v4050_v62  ;;  %1284 = vmatpush.msra.mxu0 %v4158_v29  ;;  %v6046_v62 = vld [vmem:[#allocation15_spill] sm:$0xff]  ;;  %v6053_v29 = vld [vmem:[#allocation25_spill] sm:$0xff] }
 0x312   :  { %1185 = vmatpush.msrb.mxu2 %v4164_v31 }
 0x313   :  { %1265 = vmatpush.msra.mxu3 %v4058_v63  ;;  %1285 = vmatpush.msra.mxu0 %v4171_v33  ;;  %v6047_v63 = vld [vmem:[#allocation21_spill] sm:$0xff] }
 0x314   :  { %1186 = vmatpush.msrb.mxu2 %v4177_v34 }
 0x315   :  { %1266 = vmatpush.msra.mxu3 %v4066_v19  ;;  %1286 = vmatpush.msra.mxu0 %v4184_v36  ;;  %v6048_v19 = vld [vmem:[#allocation22_spill] sm:$0xff] }
 0x316   :  { %1187 = vmatpush.msrb.mxu2 %v4190_v44 }
 0x317   :  { %1267 = vmatpush.msra.mxu3 %v4074_v21  ;;  %1287 = vmatpush.msra.mxu0 %v4197_v46  ;;  %v6049_v21 = vld [vmem:[#allocation16_spill] sm:$0xff] }
 0x318   :  { %1188 = vmatpush.msrb.mxu2 %v4203_v48  ;;  %v6054_v46 = vld [vmem:[#allocation48_spill] sm:$0xff] }
 0x319   :  { %1268 = vmatpush.msra.mxu3 %v4082_v22  ;;  %1288 = vmatpush.msra.mxu0 %v4210_v49  ;;  %v6050_v22 = vld [vmem:[#allocation23_spill] sm:$0xff] }
 0x31a   :  { %1189 = vmatpush.msrb.mxu2 %v4216_v50 }
 0x31b   :  { %1269 = vmatpush.msra.mxu3 %v4090_v23  ;;  %1289 = vmatpush.msra.mxu0 %v4223_v52  ;;  %v6051_v23 = vld [vmem:[#allocation24_spill] sm:$0xff]  ;;  %v6055_v52 = vld [vmem:[#allocation53_spill] sm:$0xff] }
 0x31c   :  { %1190 = vmatpush.msrb.mxu2 %v4229_v53 }
 0x31d   :  { %1270 = vmatpush.msra.mxu3 %v4098_v25  ;;  %1290 = vmatpush.msra.mxu0 %v4236_v55  ;;  %v6052_v25 = vld [vmem:[#allocation17_spill] sm:$0xff] }
 0x31e   :  { %1191 = vmatpush.msrb.mxu2 %v4242_v3 }
 0x31f   :  { %1271 = vmatpush.msra.mxu3 %v4248_v7  ;;  %1291 = vmatpush.msra.mxu0 %v4254_v11  ;;  %v6056_v7 = vld [vmem:[#allocation36_spill] sm:$0xff] }
 0x320   :  { %1192 = vmatpush.msrb.mxu2 %v4260_v15 }
 0x321   :  { %1272 = vmatpush.msra.mxu3 %v4266_v17  ;;  %1292 = vmatpush.msra.mxu0 %v4272_v18  ;;  %v6058_v18 = vld [vmem:[#allocation35_spill] sm:$0xff] }
 0x322   :  { %1193 = vmatpush.msrb.mxu2 %v4278_v20 }
 0x323   :  { %1273 = vmatpush.msra.mxu3 %v4284_v61  ;;  %1293 = vmatpush.msra.mxu0 %v4290_v38  ;;  %v6059_v61 = vld [vmem:[#allocation31_spill] sm:$0xff] }
 0x324   :  { %1194 = vmatpush.msrb.mxu2 %v4296_v35  ;;  %v6060_v38 = vsel %vm3841_vm2, %v6058_v18, %v6059_v61 }
 0x325   :  { %1274 = vmatpush.msra.mxu3 %v4302_v8  ;;  %1294 = vmatpush.msra.mxu0 %v4308_v4 }
 0x326   :  { %1195 = vmatpush.msrb.mxu2 %v4314_v10 }
 0x327   :  { %1275 = vmatpush.msra.mxu3 %v4320_v9  ;;  %1295 = vmatpush.msra.mxu0 %v4326_v41 }
 0x328   :  { %1196 = vmatpush.msrb.mxu2 %v4332_v37 }
 0x329   :  { %1276 = vmatpush.msra.mxu3 %v4338_v6  ;;  %1296 = vmatpush.msra.mxu0 %v4344_v56 }
 0x32a   :  { %1197 = vmatpush.msrb.mxu2 %v4350_v0 }
 0x32b   :  { %1277 = vmatpush.msra.mxu3 %v6046_v62  ;;  %1297 = vmatpush.msra.mxu0 %v6047_v63 }
 0x32c   :  { %1198 = vmatpush.msrb.mxu2 %v6048_v19 }
 0x32d   :  { %1278 = vmatpush.msra.mxu3 %v6049_v21  ;;  %1298 = vmatpush.msra.mxu0 %v6050_v22  ;;  %v6061_v22 = vsel %vm3863_vm3, %v6044_v47, %v6045_v45 }
 0x32e   :  { %1199 = vmatpush.msrb.mxu2 %v6051_v23 }
 0x32f   :  { %1279 = vmatpush.msra.mxu3 %v6052_v25  ;;  %1299 = vmatpush.msra.mxu0 %v6053_v29 }
 0x38d   :  { %v961_v30 = vpop.f32.mrf.mxu0 }
 0x38e   :  { %v962_v60 = vadd.f32 %v961_v30, %v3967_v26  ;;  %v6066_v30 = vld [vmem:[#allocation44_spill] sm:$0xff] }
 0x392   :  { %v921_v33 = vpop.f32.mrf.mxu2  ;;  %v941_v36 = vpop.f32.mrf.mxu3 }
 0x393   :  { %v922_v49 = vadd.f32 %v921_v33, %v6054_v46  ;;  %v942_v55 = vadd.f32 %v941_v36, %v6055_v52 }
 0x395   :  { %v964_v11 = vadd.f32 %v922_v49, %v6056_v7  ;;  %v984_v8 = vadd.f32 %v942_v55, %v6060_v38 }
 0x397   :  { %v2869_v4 = vmul.f32 -1.442695, %v964_v11  ;;  %v2870_v9 = vmul.f32 -1.442695, %v984_v8 }
 0x399   :  { %2944 = vpow2.f32 %v2869_v4 }
 0x39a   :  { %2946 = vpow2.f32 %v2870_v9 }
 0x39f   :  { %v2945_v41 = vpop.eup %2944 }
 0x3a0   :  { %v2947_v6 = vpop.eup %2946  ;;  %v968_v56 = vadd.f32 1.0, %v2945_v41 }
 0x3a1   :  { %v988_v12 = vadd.f32 1.0, %v2947_v6 }
 0x3a2   :  { %2948 = vrcp.f32 %v968_v56  ;;  %v980_v2 = vand.u32 2147483648, %v968_v56  ;;  %v978_v51 = vand.u32 2147483647, %v968_v56  ;;  %vm974_vm11 = vweird.f32 %v968_v56 }
 0x3a3   :  { %2950 = vrcp.f32 %v988_v12  ;;  %v1000_v63 = vand.u32 2147483648, %v988_v12  ;;  %vm994_vm15 = vweird.f32 %v988_v12  ;;  %v998_v21 = vand.u32 2147483647, %v988_v12 }
 0x3a4   :  { %v981_v24 = vor.u32 1.1754944e-38, %v980_v2  ;;  %vm979_vm13 = vcmp.eq.f32.partialorder %v978_v51, 8.507059e+37 }
 0x3a5   :  { %v1001_v33 = vor.u32 1.1754944e-38, %v1000_v63  ;;  %vm999_vm4 = vcmp.eq.f32.partialorder %v998_v21, 8.507059e+37 }
 0x3a8   :  { %v2949_v54 = vpop.eup %2948 }
 0x3a9   :  { %v2951_v59 = vpop.eup %2950  ;;  %v970_v13 = vmul.f32 %v2949_v54, %v968_v56  ;;  %vm975_vm10 = vweird.f32 %v2949_v54 }
 0x3aa   :  { %v990_v32 = vmul.f32 %v2951_v59, %v988_v12  ;;  %vm976_vm12 = vmor %vm974_vm11, %vm975_vm10  ;;  %vm995_vm14 = vweird.f32 %v2951_v59 }
 0x3ab   :  { %v971_v14 = vsub.f32 1.0, %v970_v13  ;;  %vm996_vm0 = vmor %vm994_vm15, %vm995_vm14 }
 0x3ac   :  { %v991_v1 = vsub.f32 1.0, %v990_v32 }
 0x3ad   :  { %v972_v5 = vmul.f32 %v2949_v54, %v971_v14 }
 0x3ae   :  { %v992_v39 = vmul.f32 %v2951_v59, %v991_v1 }
 0x3af   :  { %v973_v57 = vadd.f32 %v2949_v54, %v972_v5 }
 0x3b0   :  { %v993_v58 = vadd.f32 %v2951_v59, %v992_v39  ;;  %v6067_v39 = vld [vmem:[#allocation43_spill] sm:$0xff] }
 0x3b1   :  { %v977_v43 = vsel %vm976_vm12, %v2949_v54, %v973_v57  ;;  %v6068_v57 = vsel %vm3863_vm3, %v6066_v30, %v6067_v39 }
 0x3b2   :  { %v982_v40 = vsel %vm979_vm13, %v981_v24, %v977_v43  ;;  %v997_v29 = vsel %vm996_vm0, %v2951_v59, %v993_v58 }
 0x3b3   :  { %v1004_v62 = vmul.f32 %v982_v40, %v962_v60  ;;  %v1002_v36 = vsel %vm999_vm4, %v1001_v33, %v997_v29  ;;  %v1432_v29 = vld [vmem:[%s5791_s5 + $0x150] sm:$0xff]  ;;  %v1429_v33 = vld [vmem:[%s5791_s5 + $0x138] sm:$0xff] }
 0x3b4   :  { %v1007_v49 = vsub.f32 1.0, %v1002_v36  ;;  %v1009_v11 = vmul.f32 %v1002_v36, %v4417_v16  ;;  %v1426_v36 = vld [vmem:[%s5791_s5 + $0x120] sm:$0xff] }
 0x3b5   :  { %v1005_v25 = vadd.f32 %v1004_v62, %v6061_v22 }
 0x3b7   :  { %2952 = vtanh.f32 %v1005_v25  ;;  %v1435_v25 = vld [vmem:[%s5791_s5 + $0x168] sm:$0xff] }
 0x3bd   :  { %v2953_v55 = vpop.eup %2952 }
 0x3be   :  { %v1008_v7 = vmul.f32 %v2953_v55, %v1007_v49 }
 0x3c0   :  { %v4485_v18 = vadd.f32 %v1009_v11, %v1008_v7 }
 0x3c2   :  { %1040 = vmatmul.f32.vlgmr.msra.gmra.mxu1 %v4485_v18  ;;  %1060 = vmatmul.f32.vlgmr.msra.gmra.mxu2 %v4485_v18 }
 0x3c3   :  { %1080 = vmatmul.f32.vlgmr.msrb.gmra.mxu3 %v4485_v18  ;;  %1304 = vmatpush.msra.mxu1 %v4151_v28 }
 0x3c5   :  { %1305 = vmatpush.msra.mxu1 %v4164_v31 }
 0x3c7   :  { %1306 = vmatpush.msra.mxu1 %v4177_v34  ;;  %v6062_v34 = vld [vmem:[#allocation42_spill] sm:$0xff] }
 0x3c9   :  { %1307 = vmatpush.msra.mxu1 %v4190_v44 }
 0x3cb   :  { %1308 = vmatpush.msra.mxu1 %v4203_v48 }
 0x3cd   :  { %1309 = vmatpush.msra.mxu1 %v4216_v50 }
 0x3cf   :  { %1310 = vmatpush.msra.mxu1 %v4229_v53 }
 0x3d1   :  { %1311 = vmatpush.msra.mxu1 %v4242_v3  ;;  %v6063_v3 = vld [vmem:[#allocation40_spill] sm:$0xff] }
 0x3d3   :  { %1312 = vmatpush.msra.mxu1 %v4260_v15  ;;  %v6064_v15 = vld [vmem:[#allocation39_spill] sm:$0xff] }
 0x3d5   :  { %1313 = vmatpush.msra.mxu1 %v4278_v20  ;;  %v6065_v20 = vsel %vm3841_vm2, %v6063_v3, %v6064_v15  ;;  %v1420_v3 = vld [vmem:[%s5791_s5 + $0xf0] sm:$0xff] }
 0x3d7   :  { %1314 = vmatpush.msra.mxu1 %v4296_v35 }
 0x3d9   :  { %1315 = vmatpush.msra.mxu1 %v4314_v10 }
 0x3db   :  { %1316 = vmatpush.msra.mxu1 %v4332_v37 }
 0x3dd   :  { %1317 = vmatpush.msra.mxu1 %v4350_v0 }
 0x3df   :  { %1318 = vmatpush.msra.mxu1 %v6048_v19 }
 0x3e1   :  { %1319 = vmatpush.msra.mxu1 %v6051_v23 }
 0x43f   :  { %v1041_v28 = vpop.f32.mrf.mxu1 }
 0x440   :  { %v1042_v31 = vadd.f32 %v1041_v28, %v6054_v46  ;;  %v1423_v28 = vld [vmem:[%s5791_s5 + $0x108] sm:$0xff] }
 0x442   :  { %v1084_v44 = vadd.f32 %v1042_v31, %v6062_v34  ;;  %v6069_v31 = vld [vmem:[#allocation47_spill] sm:$0xff] }
 0x444   :  { %v2871_v48 = vmul.f32 -1.442695, %v1084_v44  ;;  %v6070_v44 = vld [vmem:[#allocation46_spill] sm:$0xff] }
 0x445   :  { %v1061_v50 = vpop.f32.mrf.mxu2 }
 0x446   :  { %2954 = vpow2.f32 %v2871_v48  ;;  %v1062_v53 = vadd.f32 %v1061_v50, %v6055_v52  ;;  %v1081_v41 = vpop.f32.mrf.mxu3  ;;  %v6071_v48 = vld [vmem:[#allocation45_spill] sm:$0xff] }
 0x447   :  { %v1082_v59 = vadd.f32 %v1081_v41, %v3967_v26  ;;  %v6072_v50 = vsel %vm3841_vm2, %v6070_v44, %v6071_v48  ;;  %v1390_v41 = vld [vmem:[%s5791_s5] sm:$0xff]  ;;  %v1483_v44 = vld [vmem:[#allocation7 + $0x168] sm:$0xff]  ;;  %v1484_v48 = vld [vmem:[#allocation7 + $0x170] sm:$0xff] }
 0x448   :  { %v1104_v35 = vadd.f32 %v1062_v53, %v6065_v20  ;;  %1486 = vmatpush.msra.mxu2 %v1483_v44  ;;  %1527 = vmatpush.msrb.mxu3 %v1484_v48  ;;  %v1445_v44 = vld [vmem:[#allocation7 + $0x38] sm:$0xff]  ;;  %v1446_v48 = vld [vmem:[#allocation7 + $0x40] sm:$0xff] }
 0x44a   :  { %v2872_v10 = vmul.f32 -1.442695, %v1104_v35  ;;  %v1417_v35 = vld [vmem:[%s5791_s5 + $0xd8] sm:$0xff] }
 0x44c   :  { %v2955_v37 = vpop.eup %2954  ;;  %2956 = vpow2.f32 %v2872_v10  ;;  %v1414_v10 = vld [vmem:[%s5791_s5 + $0xc0] sm:$0xff] }
 0x44d   :  { %v1088_v0 = vadd.f32 1.0, %v2955_v37  ;;  %v1411_v37 = vld [vmem:[%s5791_s5 + $0xa8] sm:$0xff] }
 0x44f   :  { %2958 = vrcp.f32 %v1088_v0  ;;  %v1100_v38 = vand.u32 2147483648, %v1088_v0  ;;  %v1098_v4 = vand.u32 2147483647, %v1088_v0  ;;  %vm1094_vm6 = vweird.f32 %v1088_v0 }
 0x451   :  { %v1101_v12 = vor.u32 1.1754944e-38, %v1100_v38  ;;  %vm1099_vm8 = vcmp.eq.f32.partialorder %v1098_v4, 8.507059e+37  ;;  %v1396_v4 = vld [vmem:[%s5791_s5 + $0x30] sm:$0xff] }
 0x452   :  { %v2957_v45 = vpop.eup %2956 }
 0x453   :  { %v1108_v47 = vadd.f32 1.0, %v2957_v45 }
 0x455   :  { %v2959_v19 = vpop.eup %2958  ;;  %2960 = vrcp.f32 %v1108_v47  ;;  %v1120_v2 = vand.u32 2147483648, %v1108_v47  ;;  %v1118_v5 = vand.u32 2147483647, %v1108_v47  ;;  %vm1114_vm10 = vweird.f32 %v1108_v47 }
 0x456   :  { %v1090_v23 = vmul.f32 %v2959_v19, %v1088_v0  ;;  %vm1095_vm5 = vweird.f32 %v2959_v19  ;;  %v1408_v0 = vld [vmem:[%s5791_s5 + $0x90] sm:$0xff] }
 0x457   :  { %vm1096_vm7 = vmor %vm1094_vm6, %vm1095_vm5  ;;  %v1121_v60 = vor.u32 1.1754944e-38, %v1120_v2  ;;  %vm1119_vm12 = vcmp.eq.f32.partialorder %v1118_v5, 8.507059e+37 }
 0x458   :  { %v1091_v61 = vsub.f32 1.0, %v1090_v23 }
 0x45a   :  { %v1092_v8 = vmul.f32 %v2959_v19, %v1091_v61  ;;  %v1402_v61 = vld [vmem:[%s5791_s5 + $0x60] sm:$0xff] }
 0x45b   :  { %v2961_v9 = vpop.eup %2960 }
 0x45c   :  { %v1110_v6 = vmul.f32 %v2961_v9, %v1108_v47  ;;  %v1093_v56 = vadd.f32 %v2959_v19, %v1092_v8  ;;  %vm1115_vm9 = vweird.f32 %v2961_v9  ;;  %v1405_v47 = vld [vmem:[%s5791_s5 + $0x78] sm:$0xff]  ;;  %v1399_v8 = vld [vmem:[%s5791_s5 + $0x48] sm:$0xff] }
 0x45d   :  { %vm1116_vm11 = vmor %vm1114_vm10, %vm1115_vm9 }
 0x45e   :  { %v1111_v54 = vsub.f32 1.0, %v1110_v6  ;;  %v1097_v13 = vsel %vm1096_vm7, %v2959_v19, %v1093_v56 }
 0x45f   :  { %v1102_v32 = vsel %vm1099_vm8, %v1101_v12, %v1097_v13 }
 0x460   :  { %v1112_v14 = vmul.f32 %v2961_v9, %v1111_v54  ;;  %v1124_v1 = vmul.f32 %v1102_v32, %v1082_v59 }
 0x462   :  { %v1113_v51 = vadd.f32 %v2961_v9, %v1112_v14  ;;  %v1125_v24 = vadd.f32 %v1124_v1, %v6068_v57 }
 0x464   :  { %v1117_v43 = vsel %vm1116_vm11, %v2961_v9, %v1113_v51  ;;  %2962 = vtanh.f32 %v1125_v24  ;;  %v1393_v9 = vld [vmem:[%s5791_s5 + $0x18] sm:$0xff] }
 0x465   :  { %v1122_v40 = vsel %vm1119_vm12, %v1121_v60, %v1117_v43 }
 0x466   :  { %v1127_v58 = vsub.f32 1.0, %v1122_v40  ;;  %v1129_v21 = vmul.f32 %v1122_v40, %v4485_v18 }
 0x46a   :  { %v2963_v62 = vpop.eup %2962 }
 0x46b   :  { %v1128_v63 = vmul.f32 %v2963_v62, %v1127_v58  ;;  %v6073_v62 = vld [vmem:[#allocation50_spill] sm:$0xff] }
 0x46d   :  { %v4521_v22 = vadd.f32 %v1129_v21, %v1128_v63  ;;  %v6074_v63 = vld [vmem:[#allocation49_spill] sm:$0xff] }
 0x46e   :  { %v6075_v21 = vsel %vm3863_vm3, %v6073_v62, %v6074_v63  ;;  %v1453_v62 = vld [vmem:[#allocation7 + $0x78] sm:$0xff]  ;;  %v1454_v63 = vld [vmem:[#allocation7 + $0x80] sm:$0xff] }
 0x46f   :  { %1160 = vmatmul.f32.vlgmr.msrb.gmra.mxu0 %v4521_v22  ;;  %1180 = vmatmul.f32.vlgmr.msrb.gmra.mxu1 %v4521_v22 }
 0x470   :  { %1200 = vmatmul.f32.vlgmr.msrb.gmra.mxu2 %v4521_v22  ;;  %1609 = vmatpush.msrb.mxu1 %v1435_v25 }
 0x472   :  { %1610 = vmatpush.msrb.mxu1 %v1432_v29 }
 0x474   :  { %1611 = vmatpush.msrb.mxu1 %v1429_v33 }
 0x476   :  { %1612 = vmatpush.msrb.mxu1 %v1426_v36 }
 0x478   :  { %1613 = vmatpush.msrb.mxu1 %v1423_v28 }
 0x47a   :  { %1614 = vmatpush.msrb.mxu1 %v1420_v3  ;;  %v1481_v3 = vld [vmem:[#allocation7 + $0x158] sm:$0xff] }
 0x47b   :  { %1528 = vmatpush.msrb.mxu3 %v1481_v3  ;;  %v1443_v3 = vld [vmem:[#allocation7 + $0x28] sm:$0xff] }
 0x47c   :  { %1615 = vmatpush.msrb.mxu1 %v1417_v35  ;;  %v1478_v35 = vld [vmem:[#allocation7 + $0x140] sm:$0xff] }
 0x47d   :  { %1529 = vmatpush.msrb.mxu3 %v1478_v35  ;;  %v1439_v35 = vld [vmem:[#allocation7 + $0x8] sm:$0xff] }
 0x47e   :  { %1616 = vmatpush.msrb.mxu1 %v1414_v10  ;;  %v1479_v10 = vld [vmem:[#allocation7 + $0x148] sm:$0xff] }
 0x480   :  { %1617 = vmatpush.msrb.mxu1 %v1411_v37  ;;  %v1474_v37 = vld [vmem:[#allocation7 + $0x120] sm:$0xff] }
 0x482   :  { %1618 = vmatpush.msrb.mxu1 %v1408_v0  ;;  %v1475_v0 = vld [vmem:[#allocation7 + $0x128] sm:$0xff] }
 0x483   :  { %1530 = vmatpush.msrb.mxu3 %v1475_v0 }
 0x484   :  { %1619 = vmatpush.msrb.mxu1 %v1405_v47  ;;  %v1471_v47 = vld [vmem:[#allocation7 + $0x108] sm:$0xff] }
 0x486   :  { %1620 = vmatpush.msrb.mxu1 %v1402_v61 }
 0x488   :  { %1621 = vmatpush.msrb.mxu1 %v1399_v8  ;;  %v1468_v8 = vld [vmem:[#allocation7 + $0xf0] sm:$0xff] }
 0x48a   :  { %1622 = vmatpush.msrb.mxu1 %v1396_v4  ;;  %v1469_v4 = vld [vmem:[#allocation7 + $0xf8] sm:$0xff] }
 0x48c   :  { %1623 = vmatpush.msrb.mxu1 %v1393_v9  ;;  %v1470_v9 = vld [vmem:[#allocation7 + $0x100] sm:$0xff] }
 0x48e   :  { %1624 = vmatpush.msrb.mxu1 %v1390_v41  ;;  %v6078_v41 = vld [vmem:[#allocation52_spill] sm:$0xff] }
 0x4ec   :  { %v1161_v49 = vpop.f32.mrf.mxu0  ;;  %v1181_v55 = vpop.f32.mrf.mxu1 }
 0x4ed   :  { %v1162_v7 = vadd.f32 %v1161_v49, %v6054_v46  ;;  %v1182_v11 = vadd.f32 %v1181_v55, %v6055_v52 }
 0x4ef   :  { %v1204_v34 = vadd.f32 %v1162_v7, %v6069_v31  ;;  %v1224_v53 = vadd.f32 %v1182_v11, %v6072_v50  ;;  %v6076_v31 = vld [vmem:[#allocation57_spill] sm:$0xff]  ;;  %v1485_v50 = vld [vmem:[#allocation7 + $0x178] sm:$0xff] }
 0x4f0   :  { %1568 = vmatpush.msrb.mxu0 %v1485_v50  ;;  %v1441_v50 = vld [vmem:[#allocation7 + $0x18] sm:$0xff] }
 0x4f1   :  { %v2873_v15 = vmul.f32 -1.442695, %v1204_v34  ;;  %v2874_v20 = vmul.f32 -1.442695, %v1224_v53  ;;  %v6077_v34 = vld [vmem:[#allocation20_spill] sm:$0xff]  ;;  %v1480_v53 = vld [vmem:[#allocation7 + $0x150] sm:$0xff] }
 0x4f2   :  { %1487 = vmatpush.msra.mxu2 %v1480_v53  ;;  %v1442_v53 = vld [vmem:[#allocation7 + $0x20] sm:$0xff] }
 0x4f3   :  { %2964 = vpow2.f32 %v2873_v15  ;;  %v1201_v5 = vpop.f32.mrf.mxu2  ;;  %v1482_v15 = vld [vmem:[#allocation7 + $0x160] sm:$0xff] }
 0x4f4   :  { %2966 = vpow2.f32 %v2874_v20  ;;  %v1202_v39 = vadd.f32 %v1201_v5, %v3967_v26  ;;  %1569 = vmatpush.msrb.mxu0 %v1482_v15  ;;  %v1477_v20 = vld [vmem:[#allocation7 + $0x138] sm:$0xff] }
 0x4f5   :  { %1488 = vmatpush.msra.mxu2 %v1477_v20  ;;  %v1438_v20 = vld [vmem:[#allocation7] sm:$0xff] }
 0x4f6   :  { %1570 = vmatpush.msrb.mxu0 %v1479_v10 }
 0x4f7   :  { %1489 = vmatpush.msra.mxu2 %v1474_v37  ;;  %v1440_v37 = vld [vmem:[#allocation7 + $0x10] sm:$0xff] }
 0x4f9   :  { %v2965_v45 = vpop.eup %2964  ;;  %1490 = vmatpush.msra.mxu2 %v1471_v47  ;;  %v1433_v47 = vld [vmem:[%s5791_s5 + $0x158] sm:$0xff] }
 0x4fa   :  { %v2967_v19 = vpop.eup %2966  ;;  %v1208_v23 = vadd.f32 1.0, %v2965_v45  ;;  %v1476_v45 = vld [vmem:[#allocation7 + $0x130] sm:$0xff] }
 0x4fb   :  { %v1228_v38 = vadd.f32 1.0, %v2967_v19  ;;  %1571 = vmatpush.msrb.mxu0 %v1476_v45  ;;  %v1472_v19 = vld [vmem:[#allocation7 + $0x110] sm:$0xff]  ;;  %1491 = vmatpush.msra.mxu2 %v1468_v8 }
 0x4fc   :  { %2968 = vrcp.f32 %v1208_v23  ;;  %v1220_v32 = vand.u32 2147483648, %v1208_v23  ;;  %v1218_v2 = vand.u32 2147483647, %v1208_v23  ;;  %vm1214_vm14 = vweird.f32 %v1208_v23  ;;  %1531 = vmatpush.msrb.mxu3 %v1472_v19  ;;  %v1436_v45 = vld [vmem:[%s5791_s5 + $0x170] sm:$0xff] }
 0x4fd   :  { %2970 = vrcp.f32 %v1228_v38  ;;  %v1240_v43 = vand.u32 2147483648, %v1228_v38  ;;  %vm1234_vm5 = vweird.f32 %v1228_v38  ;;  %v1238_v58 = vand.u32 2147483647, %v1228_v38 }
 0x4fe   :  { %v1221_v30 = vor.u32 1.1754944e-38, %v1220_v32  ;;  %vm1219_vm0 = vcmp.eq.f32.partialorder %v1218_v2, 8.507059e+37  ;;  %1532 = vmatpush.msrb.mxu3 %v1469_v4  ;;  %v1464_v2 = vld [vmem:[#allocation7 + $0xd0] sm:$0xff]  ;;  %v1430_v4 = vld [vmem:[%s5791_s5 + $0x140] sm:$0xff] }
 0x4ff   :  { %v1241_v33 = vor.u32 1.1754944e-38, %v1240_v43  ;;  %vm1239_vm7 = vcmp.eq.f32.partialorder %v1238_v58, 8.507059e+37  ;;  %v1457_v43 = vld [vmem:[#allocation7 + $0x98] sm:$0xff] }
 0x502   :  { %v2969_v6 = vpop.eup %2968 }
 0x503   :  { %v2971_v56 = vpop.eup %2970  ;;  %v1210_v12 = vmul.f32 %v2969_v6, %v1208_v23  ;;  %vm1215_vm13 = vweird.f32 %v2969_v6  ;;  %v1473_v23 = vld [vmem:[#allocation7 + $0x118] sm:$0xff] }
 0x504   :  { %v1230_v54 = vmul.f32 %v2971_v56, %v1228_v38  ;;  %vm1216_vm15 = vmor %vm1214_vm14, %vm1215_vm13  ;;  %vm1235_vm4 = vweird.f32 %v2971_v56  ;;  %1572 = vmatpush.msrb.mxu0 %v1473_v23 }
 0x505   :  { %v1211_v59 = vsub.f32 1.0, %v1210_v12  ;;  %vm1236_vm6 = vmor %vm1234_vm5, %vm1235_vm4 }
 0x506   :  { %v1231_v13 = vsub.f32 1.0, %v1230_v54  ;;  %1573 = vmatpush.msrb.mxu0 %v1470_v9  ;;  %v1465_v54 = vld [vmem:[#allocation7 + $0xd8] sm:$0xff]  ;;  %v1427_v9 = vld [vmem:[%s5791_s5 + $0x128] sm:$0xff] }
 0x507   :  { %v1212_v14 = vmul.f32 %v2969_v6, %v1211_v59  ;;  %v1466_v59 = vld [vmem:[#allocation7 + $0xe0] sm:$0xff]  ;;  %1492 = vmatpush.msra.mxu2 %v1465_v54 }
 0x508   :  { %v1232_v1 = vmul.f32 %v2971_v56, %v1231_v13  ;;  %v1467_v13 = vld [vmem:[#allocation7 + $0xe8] sm:$0xff]  ;;  %1533 = vmatpush.msrb.mxu3 %v1466_v59 }
 0x509   :  { %v1213_v51 = vadd.f32 %v2969_v6, %v1212_v14  ;;  %1574 = vmatpush.msrb.mxu0 %v1467_v13  ;;  %v1463_v14 = vld [vmem:[#allocation7 + $0xc8] sm:$0xff] }
 0x50a   :  { %v1233_v60 = vadd.f32 %v2971_v56, %v1232_v1  ;;  %1534 = vmatpush.msrb.mxu3 %v1463_v14 }
 0x50b   :  { %v1217_v57 = vsel %vm1216_vm15, %v2969_v6, %v1213_v51  ;;  %v6079_v6 = vld [vmem:[#allocation51_spill] sm:$0xff]  ;;  %1575 = vmatpush.msrb.mxu0 %v1464_v2  ;;  %v1459_v51 = vld [vmem:[#allocation7 + $0xa8] sm:$0xff] }
 0x50c   :  { %v1222_v24 = vsel %vm1219_vm0, %v1221_v30, %v1217_v57  ;;  %v1237_v29 = vsel %vm1236_vm6, %v2971_v56, %v1233_v60  ;;  %v6080_v56 = vsel %vm3841_vm2, %v6078_v41, %v6079_v6  ;;  %v1460_v30 = vld [vmem:[#allocation7 + $0xb0] sm:$0xff]  ;;  %v6081_v57 = vld [vmem:[#allocation54_spill] sm:$0xff] }
 0x50d   :  { %v1244_v40 = vmul.f32 %v1222_v24, %v1202_v39  ;;  %v1242_v36 = vsel %vm1239_vm7, %v1241_v33, %v1237_v29  ;;  %v1461_v39 = vld [vmem:[#allocation7 + $0xb8] sm:$0xff]  ;;  %1535 = vmatpush.msrb.mxu3 %v1460_v30  ;;  %v1456_v60 = vld [vmem:[#allocation7 + $0x90] sm:$0xff] }
 0x50e   :  { %v1247_v49 = vsub.f32 1.0, %v1242_v36  ;;  %v1249_v11 = vmul.f32 %v1242_v36, %v4521_v22  ;;  %1576 = vmatpush.msrb.mxu0 %v1461_v39  ;;  %v1452_v29 = vld [vmem:[#allocation7 + $0x70] sm:$0xff]  ;;  %v1447_v36 = vld [vmem:[#allocation7 + $0x48] sm:$0xff]  ;;  %v1421_v30 = vld [vmem:[%s5791_s5 + $0xf8] sm:$0xff] }
 0x50f   :  { %v1245_v25 = vadd.f32 %v1244_v40, %v6075_v21  ;;  %v1458_v40 = vld [vmem:[#allocation7 + $0xa0] sm:$0xff]  ;;  %1536 = vmatpush.msrb.mxu3 %v1457_v43  ;;  %v1455_v21 = vld [vmem:[#allocation7 + $0x88] sm:$0xff] }
 0x510   :  { %1577 = vmatpush.msrb.mxu0 %v1458_v40 }
 0x511   :  { %2972 = vtanh.f32 %v1245_v25  ;;  %1537 = vmatpush.msrb.mxu3 %v1454_v63  ;;  %v1451_v25 = vld [vmem:[#allocation7 + $0x68] sm:$0xff]  ;;  %v1418_v63 = vld [vmem:[%s5791_s5 + $0xe0] sm:$0xff] }
 0x512   :  { %1578 = vmatpush.msrb.mxu0 %v1455_v21  ;;  %v1434_v21 = vld [vmem:[%s5791_s5 + $0x160] sm:$0xff] }
 0x513   :  { %1538 = vmatpush.msrb.mxu3 %v1451_v25 }
 0x514   :  { %1579 = vmatpush.msrb.mxu0 %v1452_v29  ;;  %v1431_v29 = vld [vmem:[%s5791_s5 + $0x148] sm:$0xff] }
 0x517   :  { %v2973_v55 = vpop.eup %2972 }
 0x518   :  { %v1248_v7 = vmul.f32 %v2973_v55, %v1247_v49  ;;  %v1448_v49 = vld [vmem:[#allocation7 + $0x50] sm:$0xff] }
 0x519   :  { %1539 = vmatpush.msrb.mxu3 %v1448_v49 }
 0x51a   :  { %v4589_v28 = vadd.f32 %v1249_v11, %v1248_v7  ;;  %v1449_v7 = vld [vmem:[#allocation7 + $0x58] sm:$0xff]  ;;  %v1444_v11 = vld [vmem:[#allocation7 + $0x30] sm:$0xff] }
 0x51b   :  { %1580 = vmatpush.msrb.mxu0 %v1449_v7  ;;  %1540 = vmatpush.msrb.mxu3 %v1445_v44  ;;  %v1412_v7 = vld [vmem:[%s5791_s5 + $0xb0] sm:$0xff] }
 0x51c   :  { %1280 = vmatmul.f32.vlgmr.msra.gmra.mxu3 %v4589_v28  ;;  %1300 = vmatmul.f32.vlgmr.msra.gmra.mxu0 %v4589_v28  ;;  %v1428_v44 = vld [vmem:[%s5791_s5 + $0x130] sm:$0xff] }
 0x51d   :  { %1320 = vmatmul.f32.vlgmr.msra.gmra.mxu1 %v4589_v28  ;;  %1581 = vmatpush.msrb.mxu0 %v1446_v48  ;;  %v4671_v48 = vld [vmem:[#allocation9 + $0x150] sm:$0xff] }
 0x51e   :  { %1541 = vmatpush.msrb.mxu3 %v1442_v53  ;;  %v4676_v53 = vld [vmem:[#allocation9 + $0x138] sm:$0xff] }
 0x51f   :  { %1582 = vmatpush.msrb.mxu0 %v1443_v3  ;;  %v1425_v3 = vld [vmem:[%s5791_s5 + $0x118] sm:$0xff] }
 0x520   :  { %1542 = vmatpush.msrb.mxu3 %v1439_v35  ;;  %v4691_v35 = vld [vmem:[#allocation9 + $0x108] sm:$0xff] }
 0x521   :  { %1583 = vmatpush.msrb.mxu0 %v1440_v37  ;;  %v1403_v37 = vld [vmem:[%s5791_s5 + $0x68] sm:$0xff] }
 0x525   :  { %1625 = vmatmul.f32.vlgmr.msrb.gmra.mxu1 %v6076_v31 }
 0x52d   :  { %1628 = vmatmul.f32.gmra.mxu1 %v6077_v34 }
 0x535   :  { %1631 = vmatmul.f32.gmra.mxu1 %v4143_v27 }
 0x53d   :  { %1634 = vmatmul.f32.gmra.mxu1 %v4417_v16 }
 0x545   :  { %1637 = vmatmul.f32.gmra.mxu1 %v4485_v18 }
 0x54d   :  { %1640 = vmatmul.f32.gmra.mxu1 %v4521_v22 }
 0x555   :  { %1643 = vmatmul.f32.gmra.mxu1 %v4589_v28 }
 0x599   :  { %v1301_v61 = vpop.f32.mrf.mxu0 }
 0x59a   :  { %v1302_v38 = vadd.f32 %v1301_v61, %v6055_v52  ;;  %v1462_v52 = vld [vmem:[#allocation7 + $0xc0] sm:$0xff]  ;;  %v1321_v54 = vpop.f32.mrf.mxu1 }
 0x59b   :  { %1493 = vmatpush.msra.mxu2 %v1462_v52 }
 0x59c   :  { %v1344_v12 = vadd.f32 %v1302_v38, %v6080_v56 }
 0x59d   :  { %1494 = vmatpush.msra.mxu2 %v1459_v51  ;;  %v1424_v51 = vld [vmem:[%s5791_s5 + $0x110] sm:$0xff] }
 0x59e   :  { %v2876_v32 = vmul.f32 -1.442695, %v1344_v12 }
 0x59f   :  { %v1281_v1 = vpop.f32.mrf.mxu3  ;;  %1495 = vmatpush.msra.mxu2 %v1456_v60 }
 0x5a0   :  { %2974 = vpow2.f32 %v2876_v32  ;;  %v1282_v5 = vadd.f32 %v1281_v1, %v6054_v46  ;;  %v1450_v46 = vld [vmem:[#allocation7 + $0x60] sm:$0xff]  ;;  %v1322_v32 = vadd.f32 %v1321_v54, %v3967_v26  ;;  %v1437_v26 = vld [vmem:[%s5791_s5 + $0x178] sm:$0xff] }
 0x5a1   :  { %1496 = vmatpush.msra.mxu2 %v1453_v62  ;;  %1691 = vmatpush.msra.mxu3 %v1437_v26  ;;  %v1394_v54 = vld [vmem:[%s5791_s5 + $0x20] sm:$0xff]  ;;  %v4783_v26 = vld [vmem:[#allocation9 + $0x158] sm:$0xff] }
 0x5a2   :  { %v1324_v24 = vadd.f32 %v1282_v5, %v6081_v57  ;;  %v6082_v57 = vld [vmem:[#allocation56_spill] sm:$0xff] }
 0x5a3   :  { %1497 = vmatpush.msra.mxu2 %v1450_v46  ;;  %v1415_v46 = vld [vmem:[%s5791_s5 + $0xc8] sm:$0xff]  ;;  %1692 = vmatpush.msra.mxu3 %v1434_v21  ;;  %v4828_v21 = vld [vmem:[#allocation9 + $0xf8] sm:$0xff] }
 0x5a4   :  { %v2875_v58 = vmul.f32 -1.442695, %v1324_v24  ;;  %v6083_v24 = vld [vmem:[#allocation55_spill] sm:$0xff] }
 0x5a5   :  { %1498 = vmatpush.msra.mxu2 %v1447_v36  ;;  %v6084_v60 = vsel %vm3863_vm3, %v6082_v57, %v6083_v24  ;;  %1693 = vmatpush.msra.mxu3 %v1431_v29  ;;  %v4790_v57 = vld [vmem:[#allocation9 + $0x160] sm:$0xff]  ;;  %v4796_v24 = vld [vmem:[#allocation9 + $0x148] sm:$0xff]  ;;  %v4842_v29 = vld [vmem:[#allocation9 + $0xd0] sm:$0xff] }
 0x5a6   :  { %v2975_v33 = vpop.eup %2974  ;;  %2976 = vpow2.f32 %v2875_v58 }
 0x5a7   :  { %v4609_v55 = vadd.f32 1.0, %v2975_v33  ;;  %1499 = vmatpush.msra.mxu2 %v1444_v11  ;;  %v4665_v11 = vld [vmem:[#allocation9 + $0x168] sm:$0xff]  ;;  %1694 = vmatpush.msra.mxu3 %v1428_v44 }
 0x5a8   :  { %1853 = vmatpush.msra.mxu0 %v4665_v11  ;;  %v4865_v44 = vld [vmem:[#allocation9 + $0x88] sm:$0xff] }
 0x5a9   :  { %2978 = vrcp.f32 %v4609_v55  ;;  %1500 = vmatpush.msra.mxu2 %v1441_v50  ;;  %v1360_v1 = vand.u32 2147483648, %v4609_v55  ;;  %vm1354_vm13 = vweird.f32 %v4609_v55  ;;  %v1358_v39 = vand.u32 2147483647, %v4609_v55  ;;  %v1409_v50 = vld [vmem:[%s5791_s5 + $0x98] sm:$0xff]  ;;  %1695 = vmatpush.msra.mxu3 %v1425_v3  ;;  %6093 = vst [vmem:[#allocation33_spill] sm:$0xff] %v4865_v44 }
 0x5aa   :  { %1854 = vmatpush.msra.mxu0 %v4671_v48  ;;  %v4872_v3 = vld [vmem:[#allocation9 + $0x98] sm:$0xff] }
 0x5ab   :  { %1501 = vmatpush.msra.mxu2 %v1438_v20  ;;  %v1361_v58 = vor.u32 1.1754944e-38, %v1360_v1  ;;  %vm1359_vm15 = vcmp.eq.f32.partialorder %v1358_v39, 8.507059e+37  ;;  %v1406_v20 = vld [vmem:[%s5791_s5 + $0x80] sm:$0xff]  ;;  %v4770_v1 = vld [vmem:[#allocation9 + $0x48] sm:$0xff]  ;;  %v4785_v39 = vld [vmem:[#allocation9 + $0x18] sm:$0xff]  ;;  %6094 = vst [vmem:[#allocation38_spill] sm:$0xff] %v4872_v3 }
 0x5ac   :  { %v2977_v15 = vpop.eup %2976  ;;  %1855 = vmatpush.msra.mxu0 %v4676_v53  ;;  %6088 = vst [vmem:[#allocation28_spill] sm:$0xff] %v4770_v1 }
 0x5ad   :  { %v1328_v10 = vadd.f32 1.0, %v2977_v15  ;;  %1650 = vmatpush.msrb.mxu2 %v1436_v45  ;;  %v4683_v15 = vld [vmem:[#allocation9 + $0x120] sm:$0xff]  ;;  %v4703_v45 = vld [vmem:[#allocation9 + $0xf0] sm:$0xff]  ;;  %6090 = vst [vmem:[#allocation29_spill] sm:$0xff] %v4785_v39 }
 0x5ae   :  { %1856 = vmatpush.msra.mxu0 %v4683_v15 }
 0x5af   :  { %2980 = vrcp.f32 %v1328_v10  ;;  %v2979_v0 = vpop.eup %2978  ;;  %1651 = vmatpush.msrb.mxu2 %v1433_v47  ;;  %v1340_v41 = vand.u32 2147483648, %v1328_v10  ;;  %v1338_v56 = vand.u32 2147483647, %v1328_v10  ;;  %vm1334_vm9 = vweird.f32 %v1328_v10  ;;  %v1416_v47 = vld [vmem:[%s5791_s5 + $0xd0] sm:$0xff] }
 0x5b0   :  { %v1350_v19 = vmul.f32 %v2979_v0, %v4609_v55  ;;  %vm1355_vm12 = vweird.f32 %v2979_v0  ;;  %1857 = vmatpush.msra.mxu0 %v4691_v35 }
 0x5b1   :  { %1652 = vmatpush.msrb.mxu2 %v1430_v4  ;;  %v1341_v13 = vor.u32 1.1754944e-38, %v1340_v41  ;;  %vm1339_vm11 = vcmp.eq.f32.partialorder %v1338_v56, 8.507059e+37  ;;  %vm1356_vm14 = vmor %vm1354_vm13, %vm1355_vm12  ;;  %v1397_v4 = vld [vmem:[%s5791_s5 + $0x38] sm:$0xff]  ;;  %v1407_v41 = vld [vmem:[%s5791_s5 + $0x88] sm:$0xff] }
 0x5b2   :  { %v1351_v38 = vsub.f32 1.0, %v1350_v19  ;;  %1858 = vmatpush.msra.mxu0 %v4703_v45  ;;  %v4710_v19 = vld [vmem:[#allocation9 + $0xd8] sm:$0xff]  ;;  %v4740_v56 = vld [vmem:[#allocation9 + $0x90] sm:$0xff] }
 0x5b3   :  { %1653 = vmatpush.msrb.mxu2 %v1427_v9  ;;  %v4730_v9 = vld [vmem:[#allocation9 + $0xa8] sm:$0xff]  ;;  %6085 = vst [vmem:[#allocation26_spill] sm:$0xff] %v4740_v56 }
 0x5b4   :  { %v1352_v12 = vmul.f32 %v2979_v0, %v1351_v38  ;;  %v1413_v38 = vld [vmem:[%s5791_s5 + $0xb8] sm:$0xff]  ;;  %1859 = vmatpush.msra.mxu0 %v4710_v19 }
 0x5b5   :  { %v2981_v23 = vpop.eup %2980  ;;  %1654 = vmatpush.msrb.mxu2 %v1424_v51  ;;  %v4777_v51 = vld [vmem:[#allocation9 + $0x170] sm:$0xff] }
 0x5b6   :  { %v1330_v61 = vmul.f32 %v2981_v23, %v1328_v10  ;;  %vm1335_vm8 = vweird.f32 %v2981_v23  ;;  %v1353_v14 = vadd.f32 %v2979_v0, %v1352_v12  ;;  %v1422_v10 = vld [vmem:[%s5791_s5 + $0x100] sm:$0xff]  ;;  %v4745_v12 = vld [vmem:[#allocation9 + $0x78] sm:$0xff]  ;;  %1873 = vmatpush.msra.mxu1 %v4777_v51 }
 0x5b7   :  { %vm1336_vm10 = vmor %vm1334_vm9, %vm1335_vm8  ;;  %1655 = vmatpush.msrb.mxu2 %v1421_v30  ;;  %1696 = vmatpush.msra.mxu3 %v1422_v10  ;;  %6086 = vst [vmem:[#allocation18_spill] sm:$0xff] %v4745_v12  ;;  %v4780_v30 = vld [vmem:[#allocation9 + $0x178] sm:$0xff]  ;;  %v4877_v10 = vld [vmem:[#allocation9 + $0x70] sm:$0xff] }
 0x5b8   :  { %v1331_v8 = vsub.f32 1.0, %v1330_v61  ;;  %v1357_v40 = vsel %vm1356_vm14, %v2979_v0, %v1353_v14  ;;  %v1419_v0 = vld [vmem:[%s5791_s5 + $0xe8] sm:$0xff]  ;;  %v1400_v61 = vld [vmem:[%s5791_s5 + $0x50] sm:$0xff]  ;;  %1874 = vmatpush.msra.mxu1 %v4783_v26  ;;  %6096 = vst [vmem:[#allocation37_spill] sm:$0xff] %v4877_v10 }
 0x5b9   :  { %v1362_v62 = vsel %vm1359_vm15, %v1361_v58, %v1357_v40  ;;  %1656 = vmatpush.msrb.mxu2 %v1418_v63  ;;  %1697 = vmatpush.msra.mxu3 %v1419_v0  ;;  %v1395_v14 = vld [vmem:[%s5791_s5 + $0x28] sm:$0xff]  ;;  %v4812_v58 = vld [vmem:[#allocation9 + $0x130] sm:$0xff]  ;;  %v4893_v0 = vld [vmem:[#allocation9 + $0x80] sm:$0xff] }
 0x5ba   :  { %v1332_v6 = vmul.f32 %v2981_v23, %v1331_v8  ;;  %v1367_v25 = vsub.f32 1.0, %v1362_v62  ;;  %v1369_v49 = vmul.f32 %v1362_v62, %v4589_v28  ;;  %v1410_v8 = vld [vmem:[%s5791_s5 + $0xa0] sm:$0xff]  ;;  %v4807_v40 = vld [vmem:[#allocation9 + $0x128] sm:$0xff]  ;;  %v4818_v62 = vld [vmem:[#allocation9 + $0x118] sm:$0xff]  ;;  %6099 = vst [vmem:[#allocation22_spill] sm:$0xff] %v4893_v0 }
 0x5bb   :  { %1657 = vmatpush.msrb.mxu2 %v1415_v46  ;;  %1698 = vmatpush.msra.mxu3 %v1416_v47  ;;  %v4824_v63 = vld [vmem:[#allocation9 + $0x110] sm:$0xff]  ;;  %v4831_v46 = vld [vmem:[#allocation9 + $0x100] sm:$0xff]  ;;  %v4895_v47 = vld [vmem:[#allocation9 + $0x68] sm:$0xff] }
 0x5bc   :  { %v1333_v59 = vadd.f32 %v2981_v23, %v1332_v6  ;;  %v1404_v6 = vld [vmem:[%s5791_s5 + $0x70] sm:$0xff]  ;;  %6100 = vst [vmem:[#allocation16_spill] sm:$0xff] %v4895_v47 }
 0x5bd   :  { %1658 = vmatpush.msrb.mxu2 %v1412_v7  ;;  %1699 = vmatpush.msra.mxu3 %v1413_v38  ;;  %v4860_v7 = vld [vmem:[#allocation9 + $0xa0] sm:$0xff]  ;;  %v4904_v38 = vld [vmem:[#allocation9 + $0x10] sm:$0xff] }
 0x5be   :  { %v1337_v52 = vsel %vm1336_vm10, %v2981_v23, %v1333_v59  ;;  %v4715_v23 = vld [vmem:[#allocation9 + $0xc0] sm:$0xff]  ;;  %v1401_v59 = vld [vmem:[%s5791_s5 + $0x58] sm:$0xff]  ;;  %6092 = vst [vmem:[#allocation34_spill] sm:$0xff] %v4860_v7 }
 0x5bf   :  { %v1342_v2 = vsel %vm1339_vm11, %v1341_v13, %v1337_v52  ;;  %1659 = vmatpush.msrb.mxu2 %v1409_v50  ;;  %1860 = vmatpush.msra.mxu0 %v4715_v23  ;;  %v1398_v13 = vld [vmem:[%s5791_s5 + $0x40] sm:$0xff]  ;;  %v4870_v50 = vld [vmem:[#allocation9 + $0xb0] sm:$0xff]  ;;  %6102 = vst [vmem:[#allocation24_spill] sm:$0xff] %v4904_v38 }
 0x5c0   :  { %v1364_v5 = vmul.f32 %v1342_v2, %v1322_v32  ;;  %1700 = vmatpush.msra.mxu3 %v1410_v8  ;;  %v1391_v32 = vld [vmem:[%s5791_s5 + $0x8] sm:$0xff]  ;;  %v4760_v52 = vld [vmem:[#allocation9 + $0x60] sm:$0xff]  ;;  %v1392_v2 = vld [vmem:[%s5791_s5 + $0x10] sm:$0xff] }
 0x5c1   :  { %1660 = vmatpush.msrb.mxu2 %v1406_v20  ;;  %1861 = vmatpush.msra.mxu0 %v4730_v9  ;;  %6087 = vst [vmem:[#allocation27_spill] sm:$0xff] %v4760_v52  ;;  %v6095_v20 = vmov 0.0   ;;  %v4917_v8 = vld [vmem:[#allocation9 + $0x38] sm:$0xff] }
 0x5c2   :  { %v1365_v43 = vadd.f32 %v1364_v5, %v6084_v60  ;;  %1701 = vmatpush.msra.mxu3 %v1407_v41  ;;  %v4775_v5 = vld [vmem:[#allocation9 + $0x30] sm:$0xff]  ;;  %v4798_v60 = vld [vmem:[#allocation9] sm:$0xff]  ;;  %6104 = vst [vmem:[#allocation25_spill] sm:$0xff] %v4917_v8 }
 0x5c3   :  { %1661 = vmatpush.msrb.mxu2 %v1403_v37  ;;  %1862 = vmatpush.msra.mxu0 %v4740_v56  ;;  %6089 = vst [vmem:[#allocation19_spill] sm:$0xff] %v4775_v5  ;;  %v4888_v37 = vld [vmem:[#allocation9 + $0x40] sm:$0xff] }
 0x5c4   :  { %2982 = vtanh.f32 %v1365_v43  ;;  %1702 = vmatpush.msra.mxu3 %v1404_v6  ;;  %6091 = vst [vmem:[#allocation41_spill] sm:$0xff] %v4798_v60  ;;  %v4803_v43 = vld [vmem:[#allocation9 + $0x140] sm:$0xff] }
 0x5c5   :  { %1662 = vmatpush.msrb.mxu2 %v1400_v61  ;;  %1863 = vmatpush.msra.mxu0 %v4745_v12  ;;  %6098 = vst [vmem:[#allocation21_spill] sm:$0xff] %v4888_v37  ;;  %v4898_v61 = vld [vmem:[#allocation9 + $0x28] sm:$0xff]  ;;  %v5029_v6 = vld [vmem:[%s5794_s8] sm:$0x7] }
 0x5c6   :  { %1703 = vmatpush.msra.mxu3 %v1401_v59  ;;  %1875 = vmatpush.msra.mxu1 %v4803_v43  ;;  %6101 = vst [vmem:[#allocation23_spill] sm:$0xff] %v4898_v61 }
 0x5c7   :  { %1663 = vmatpush.msrb.mxu2 %v1397_v4  ;;  %1864 = vmatpush.msra.mxu0 %v4760_v52  ;;  %v4940_v4 = vld [vmem:[#allocation9 + $0x8] sm:$0xff] }
 0x5c8   :  { %1704 = vmatpush.msra.mxu3 %v1398_v13  ;;  %1876 = vmatpush.msra.mxu1 %v4807_v40  ;;  %6106 = vst [vmem:[#allocation53_spill] sm:$0xff] %v4940_v4 }
 0x5c9   :  { %1664 = vmatpush.msrb.mxu2 %v1394_v54  ;;  %1865 = vmatpush.msra.mxu0 %v4770_v1 }
 0x5ca   :  { %v2983_v33 = vpop.eup %2982  ;;  %1705 = vmatpush.msra.mxu3 %v1395_v14  ;;  %1877 = vmatpush.msra.mxu1 %v4824_v63 }
 0x5cb   :  { %v1368_v36 = vmul.f32 %v2983_v33, %v1367_v25  ;;  %1665 = vmatpush.msrb.mxu2 %v1391_v32  ;;  %1866 = vmatpush.msra.mxu0 %v4775_v5  ;;  %v4837_v25 = vld [vmem:[#allocation9 + $0xe8] sm:$0xff]  ;;  %v4847_v33 = vld [vmem:[#allocation9 + $0xe0] sm:$0xff]  ;;  %v5036_v32 = vperm.slane %v5029_v6, 0 }
 0x5cc   :  { %1706 = vmatpush.msra.mxu3 %v1392_v2  ;;  %1878 = vmatpush.msra.mxu1 %v4828_v21 }
 0x5cd   :  { %v4656_v55 = vadd.f32 %v1369_v49, %v1368_v36  ;;  %1867 = vmatpush.msra.mxu0 %v4785_v39  ;;  %v4851_v36 = vld [vmem:[#allocation9 + $0xc8] sm:$0xff]  ;;  %v4854_v49 = vld [vmem:[#allocation9 + $0xb8] sm:$0xff] }
 0x5ce   :  { %1879 = vmatpush.msra.mxu1 %v4847_v33 }
 0x5cf   :  { %1502 = vmatmul.f32.vlgmr.msra.gmra.mxu2 %v4656_v55  ;;  %1543 = vmatmul.f32.vlgmr.msrb.gmra.mxu3 %v4656_v55 }
 0x5d0   :  { %1584 = vmatmul.f32.vlgmr.msrb.gmra.mxu0 %v4656_v55  ;;  %1646 = vmatmul.f32.gmra.mxu1 %v4656_v55 }
 0x5d1   :  { %1989 = vmatpush.msra.mxu2 %v4777_v51  ;;  %2009 = vmatpush.msrb.mxu3 %v4780_v30 }
 0x5d2   :  { %1868 = vmatpush.msra.mxu0 %v4798_v60  ;;  %1880 = vmatpush.msra.mxu1 %v4851_v36 }
 0x5d3   :  { %1990 = vmatpush.msra.mxu2 %v4783_v26  ;;  %2010 = vmatpush.msrb.mxu3 %v4790_v57 }
 0x5d4   :  { %1893 = vmatpush.msrb.mxu0 %v4780_v30  ;;  %1881 = vmatpush.msra.mxu1 %v4870_v50 }
 0x5d5   :  { %2011 = vmatpush.msrb.mxu3 %v4796_v24  ;;  %1991 = vmatpush.msra.mxu2 %v4803_v43 }
 0x5d6   :  { %1894 = vmatpush.msrb.mxu0 %v4790_v57  ;;  %1882 = vmatpush.msra.mxu1 %v4872_v3 }
 0x5d7   :  { %1505 = vmatmul.f32.gmra.mxu2 %v4589_v28  ;;  %1546 = vmatmul.f32.gmra.mxu3 %v4589_v28 }
 0x5d8   :  { %1587 = vmatmul.f32.gmra.mxu0 %v4589_v28  ;;  %1992 = vmatpush.msra.mxu2 %v4807_v40 }
 0x5d9   :  { %2012 = vmatpush.msrb.mxu3 %v4812_v58  ;;  %1895 = vmatpush.msrb.mxu0 %v4796_v24 }
 0x5da   :  { %1993 = vmatpush.msra.mxu2 %v4824_v63  ;;  %1883 = vmatpush.msra.mxu1 %v4893_v0 }
 0x5db   :  { %2013 = vmatpush.msrb.mxu3 %v4818_v62  ;;  %1896 = vmatpush.msrb.mxu0 %v4812_v58 }
 0x5dc   :  { %1994 = vmatpush.msra.mxu2 %v4828_v21  ;;  %1884 = vmatpush.msra.mxu1 %v4895_v47 }
 0x5dd   :  { %2014 = vmatpush.msrb.mxu3 %v4831_v46  ;;  %1897 = vmatpush.msrb.mxu0 %v4818_v62 }
 0x5de   :  { %1995 = vmatpush.msra.mxu2 %v4847_v33 }
 0x5df   :  { %1508 = vmatmul.f32.gmra.mxu2 %v4521_v22  ;;  %1549 = vmatmul.f32.gmra.mxu3 %v4521_v22 }
 0x5e0   :  { %1590 = vmatmul.f32.gmra.mxu0 %v4521_v22  ;;  %2015 = vmatpush.msrb.mxu3 %v4837_v25 }
 0x5e1   :  { %1898 = vmatpush.msrb.mxu0 %v4831_v46  ;;  %1996 = vmatpush.msra.mxu2 %v4851_v36 }
 0x5e2   :  { %2016 = vmatpush.msrb.mxu3 %v4842_v29 }
 0x5e3   :  { %1899 = vmatpush.msrb.mxu0 %v4837_v25  ;;  %1997 = vmatpush.msra.mxu2 %v4870_v50 }
 0x5e4   :  { %2017 = vmatpush.msrb.mxu3 %v4854_v49 }
 0x5e5   :  { %1900 = vmatpush.msrb.mxu0 %v4842_v29  ;;  %1998 = vmatpush.msra.mxu2 %v4872_v3 }
 0x5e6   :  { %2018 = vmatpush.msrb.mxu3 %v4860_v7 }
 0x5e7   :  { %1511 = vmatmul.f32.gmra.mxu2 %v4485_v18  ;;  %1552 = vmatmul.f32.gmra.mxu3 %v4485_v18 }
 0x5e8   :  { %1593 = vmatmul.f32.gmra.mxu0 %v4485_v18  ;;  %2019 = vmatpush.msrb.mxu3 %v4865_v44 }
 0x5e9   :  { %1901 = vmatpush.msrb.mxu0 %v4854_v49  ;;  %1999 = vmatpush.msra.mxu2 %v4893_v0 }
 0x5ea   :  { %2020 = vmatpush.msrb.mxu3 %v4877_v10 }
 0x5eb   :  { %1902 = vmatpush.msrb.mxu0 %v4860_v7  ;;  %2000 = vmatpush.msra.mxu2 %v4895_v47 }
 0x5ed   :  { %1903 = vmatpush.msrb.mxu0 %v4865_v44 }
 0x5ef   :  { %1514 = vmatmul.f32.gmra.mxu2 %v4417_v16  ;;  %1555 = vmatmul.f32.gmra.mxu3 %v4417_v16 }
 0x5f0   :  { %1596 = vmatmul.f32.gmra.mxu0 %v4417_v16 }
 0x5f1   :  { %1904 = vmatpush.msrb.mxu0 %v4877_v10 }
 0x5f7   :  { %1517 = vmatmul.f32.gmra.mxu2 %v4143_v27  ;;  %1558 = vmatmul.f32.gmra.mxu3 %v4143_v27 }
 0x5f8   :  { %1599 = vmatmul.f32.gmra.mxu0 %v4143_v27 }
 0x5ff   :  { %1520 = vmatmul.f32.gmra.mxu2 %v6077_v34  ;;  %1561 = vmatmul.f32.gmra.mxu3 %v6077_v34 }
 0x600   :  { %1602 = vmatmul.f32.gmra.mxu0 %v6077_v34 }
 0x607   :  { %1523 = vmatmul.f32.gmra.mxu2 %v6076_v31  ;;  %1564 = vmatmul.f32.gmra.mxu3 %v6076_v31 }
 0x608   :  { %1605 = vmatmul.f32.gmra.mxu0 %v6076_v31 }
 0x60f   :  { %1666 = vmatmul.f32.vlgmr.msrb.gmra.mxu2 %v6076_v31  ;;  %1707 = vmatmul.f32.vlgmr.msra.gmra.mxu3 %v6076_v31  ;;  %v4883_v31 = vld [vmem:[#allocation9 + $0x58] sm:$0xff] }
 0x610   :  { %1869 = vmatmul.f32.vlgmr.msra.gmra.mxu0 %v6095_v20  ;;  %6097 = vst [vmem:[#allocation15_spill] sm:$0xff] %v4883_v31  ;;  %2021 = vmatpush.msrb.mxu3 %v4883_v31 }
 0x611   :  { %1905 = vmatpush.msrb.mxu0 %v4883_v31 }
 0x612   :  { %2022 = vmatpush.msrb.mxu3 %v4888_v37 }
 0x613   :  { %1906 = vmatpush.msrb.mxu0 %v4888_v37 }
 0x614   :  { %2023 = vmatpush.msrb.mxu3 %v4898_v61 }
 0x615   :  { %1907 = vmatpush.msrb.mxu0 %v4898_v61 }
 0x616   :  { %2024 = vmatpush.msrb.mxu3 %v4904_v38 }
 0x617   :  { %1669 = vmatmul.f32.gmra.mxu2 %v6077_v34  ;;  %1710 = vmatmul.f32.gmra.mxu3 %v6077_v34  ;;  %v4915_v34 = vld [vmem:[#allocation9 + $0x50] sm:$0xff] }
 0x618   :  { %2201 = vmatpush.msra.mxu3 %v4665_v11  ;;  %1908 = vmatpush.msrb.mxu0 %v4904_v38  ;;  %6103 = vst [vmem:[#allocation17_spill] sm:$0xff] %v4915_v34 }
 0x619   :  { %1909 = vmatmul.f32.vlgmr.msrb.gmra.mxu0 %v6095_v20  ;;  %1885 = vmatpush.msra.mxu1 %v4915_v34 }
 0x61a   :  { %2202 = vmatpush.msra.mxu3 %v4671_v48  ;;  %2001 = vmatpush.msra.mxu2 %v4915_v34 }
 0x61b   :  { %2085 = vmatpush.msra.mxu0 %v4665_v11  ;;  %1886 = vmatpush.msra.mxu1 %v4917_v8 }
 0x61c   :  { %2203 = vmatpush.msra.mxu3 %v4676_v53  ;;  %2002 = vmatpush.msra.mxu2 %v4917_v8 }
 0x61d   :  { %2086 = vmatpush.msra.mxu0 %v4671_v48 }
 0x61e   :  { %2204 = vmatpush.msra.mxu3 %v4683_v15 }
 0x61f   :  { %1672 = vmatmul.f32.gmra.mxu2 %v4143_v27  ;;  %1713 = vmatmul.f32.gmra.mxu3 %v4143_v27  ;;  %v4932_v27 = vld [vmem:[#allocation9 + $0x20] sm:$0xff] }
 0x620   :  { %2087 = vmatpush.msra.mxu0 %v4676_v53  ;;  %2205 = vmatpush.msra.mxu3 %v4691_v35  ;;  %6105 = vst [vmem:[#allocation48_spill] sm:$0xff] %v4932_v27 }
 0x621   :  { %1887 = vmatpush.msra.mxu1 %v4932_v27  ;;  %2003 = vmatpush.msra.mxu2 %v4932_v27 }
 0x622   :  { %2088 = vmatpush.msra.mxu0 %v4683_v15  ;;  %2206 = vmatpush.msra.mxu3 %v4703_v45 }
 0x623   :  { %1888 = vmatpush.msra.mxu1 %v4940_v4  ;;  %2004 = vmatpush.msra.mxu2 %v4940_v4 }
 0x624   :  { %2089 = vmatpush.msra.mxu0 %v4691_v35  ;;  %2207 = vmatpush.msra.mxu3 %v4710_v19 }
 0x625   :  { %1889 = vmatmul.f32.vlgmr.msra.gmra.mxu1 %v6095_v20  ;;  %2125 = vmatpush.msrb.mxu2 %v4780_v30 }
 0x626   :  { %2090 = vmatpush.msra.mxu0 %v4703_v45  ;;  %2208 = vmatpush.msra.mxu3 %v4715_v23 }
 0x627   :  { %1675 = vmatmul.f32.gmra.mxu2 %v4417_v16  ;;  %1716 = vmatmul.f32.gmra.mxu3 %v4417_v16  ;;  %v4990_v16 = vpop.f32.mrf.mxu1 }
 0x628   :  { %1969 = vmatpush.msrb.mxu1 %v4665_v11  ;;  %2091 = vmatpush.msra.mxu0 %v4710_v19 }
 0x629   :  { %2126 = vmatpush.msrb.mxu2 %v4790_v57  ;;  %2209 = vmatpush.msra.mxu3 %v4730_v9 }
 0x62a   :  { %1970 = vmatpush.msrb.mxu1 %v4671_v48  ;;  %2092 = vmatpush.msra.mxu0 %v4715_v23 }
 0x62b   :  { %2127 = vmatpush.msrb.mxu2 %v4796_v24  ;;  %2210 = vmatpush.msra.mxu3 %v4740_v56 }
 0x62c   :  { %1971 = vmatpush.msrb.mxu1 %v4676_v53  ;;  %2093 = vmatpush.msra.mxu0 %v4730_v9 }
 0x62d   :  { %2128 = vmatpush.msrb.mxu2 %v4812_v58  ;;  %2211 = vmatpush.msra.mxu3 %v4745_v12 }
 0x62e   :  { %1972 = vmatpush.msrb.mxu1 %v4683_v15  ;;  %2094 = vmatpush.msra.mxu0 %v4740_v56 }
 0x62f   :  { %1678 = vmatmul.f32.gmra.mxu2 %v4485_v18  ;;  %1719 = vmatmul.f32.gmra.mxu3 %v4485_v18 }
 0x630   :  { %2129 = vmatpush.msrb.mxu2 %v4818_v62  ;;  %2212 = vmatpush.msra.mxu3 %v4760_v52 }
 0x631   :  { %1973 = vmatpush.msrb.mxu1 %v4691_v35  ;;  %2095 = vmatpush.msra.mxu0 %v4745_v12 }
 0x632   :  { %2130 = vmatpush.msrb.mxu2 %v4831_v46  ;;  %2213 = vmatpush.msra.mxu3 %v4770_v1 }
 0x633   :  { %1974 = vmatpush.msrb.mxu1 %v4703_v45  ;;  %2096 = vmatpush.msra.mxu0 %v4760_v52 }
 0x634   :  { %2131 = vmatpush.msrb.mxu2 %v4837_v25  ;;  %2214 = vmatpush.msra.mxu3 %v4775_v5 }
 0x635   :  { %1975 = vmatpush.msrb.mxu1 %v4710_v19  ;;  %2097 = vmatpush.msra.mxu0 %v4770_v1 }
 0x636   :  { %2132 = vmatpush.msrb.mxu2 %v4842_v29  ;;  %2215 = vmatpush.msra.mxu3 %v4785_v39 }
 0x637   :  { %1681 = vmatmul.f32.gmra.mxu2 %v4521_v22  ;;  %1722 = vmatmul.f32.gmra.mxu3 %v4521_v22  ;;  %v1629_v22 = vpop.f32.mrf.mxu1 }
 0x638   :  { %1976 = vmatpush.msrb.mxu1 %v4715_v23  ;;  %2133 = vmatpush.msrb.mxu2 %v4854_v49 }
 0x639   :  { %2098 = vmatpush.msra.mxu0 %v4775_v5  ;;  %2216 = vmatpush.msra.mxu3 %v4798_v60 }
 0x63a   :  { %1977 = vmatpush.msrb.mxu1 %v4730_v9  ;;  %2134 = vmatpush.msrb.mxu2 %v4860_v7 }
 0x63b   :  { %2099 = vmatpush.msra.mxu0 %v4785_v39 }
 0x63c   :  { %1978 = vmatpush.msrb.mxu1 %v4740_v56  ;;  %2135 = vmatpush.msrb.mxu2 %v4865_v44  ;;  %v5135_v44 = vperm.slane %v5029_v6, 1 }
 0x63d   :  { %2100 = vmatpush.msra.mxu0 %v4798_v60 }
 0x63e   :  { %1979 = vmatpush.msrb.mxu1 %v4745_v12  ;;  %2136 = vmatpush.msrb.mxu2 %v4877_v10 }
 0x63f   :  { %1684 = vmatmul.f32.gmra.mxu2 %v4589_v28  ;;  %1725 = vmatmul.f32.gmra.mxu3 %v4589_v28  ;;  %v1632_v54 = vpop.f32.mrf.mxu1 }
 0x640   :  { %1980 = vmatpush.msrb.mxu1 %v4760_v52  ;;  %2137 = vmatpush.msrb.mxu2 %v4883_v31 }
 0x641   :  { %2221 = vmatpush.msrb.mxu0 %v4777_v51 }
 0x642   :  { %1981 = vmatpush.msrb.mxu1 %v4770_v1  ;;  %2138 = vmatpush.msrb.mxu2 %v4888_v37 }
 0x643   :  { %2222 = vmatpush.msrb.mxu0 %v4783_v26 }
 0x644   :  { %1982 = vmatpush.msrb.mxu1 %v4775_v5  ;;  %2139 = vmatpush.msrb.mxu2 %v4898_v61 }
 0x645   :  { %2223 = vmatpush.msrb.mxu0 %v4803_v43 }
 0x646   :  { %1983 = vmatpush.msrb.mxu1 %v4785_v39  ;;  %2140 = vmatpush.msrb.mxu2 %v4904_v38 }
 0x647   :  { %1687 = vmatmul.f32.gmra.mxu2 %v4656_v55  ;;  %1728 = vmatmul.f32.gmra.mxu3 %v4656_v55 }
 0x648   :  { %1984 = vmatpush.msrb.mxu1 %v4798_v60  ;;  %2224 = vmatpush.msrb.mxu0 %v4807_v40  ;;  %v1635_v60 = vpop.f32.mrf.mxu1 }
 0x64a   :  { %2105 = vmatpush.msra.mxu1 %v4777_v51  ;;  %2225 = vmatpush.msrb.mxu0 %v4824_v63 }
 0x64c   :  { %2106 = vmatpush.msra.mxu1 %v4783_v26  ;;  %2226 = vmatpush.msrb.mxu0 %v4828_v21 }
 0x64d   :  { %v5005_v18 = vpop.f32.mrf.mxu0 }
 0x64e   :  { %2107 = vmatpush.msra.mxu1 %v4803_v43  ;;  %2227 = vmatpush.msrb.mxu0 %v4847_v33 }
 0x650   :  { %2108 = vmatpush.msra.mxu1 %v4807_v40  ;;  %2228 = vmatpush.msrb.mxu0 %v4851_v36 }
 0x652   :  { %v5014_v28 = vpop.f32.mrf.mxu2  ;;  %v5016_v55 = vpop.f32.mrf.mxu3  ;;  %2109 = vmatpush.msra.mxu1 %v4824_v63  ;;  %2229 = vmatpush.msrb.mxu0 %v4870_v50 }
 0x654   :  { %2110 = vmatpush.msra.mxu1 %v4828_v21  ;;  %2230 = vmatpush.msrb.mxu0 %v4872_v3 }
 0x655   :  { %v5020_v41 = vpop.f32.mrf.mxu0 }
 0x656   :  { %2111 = vmatpush.msra.mxu1 %v4847_v33  ;;  %2231 = vmatpush.msrb.mxu0 %v4893_v0 }
 0x658   :  { %2112 = vmatpush.msra.mxu1 %v4851_v36  ;;  %2232 = vmatpush.msrb.mxu0 %v4895_v47 }
 0x65a   :  { %v1506_v59 = vpop.f32.mrf.mxu2  ;;  %v5033_v13 = vpop.f32.mrf.mxu3  ;;  %2113 = vmatpush.msra.mxu1 %v4870_v50  ;;  %2233 = vmatpush.msrb.mxu0 %v4915_v34 }
 0x65b   :  { %v1630_v14 = vadd.f32 %v1629_v22, %v1506_v59 }
 0x65c   :  { %2114 = vmatpush.msra.mxu1 %v4872_v3  ;;  %2234 = vmatpush.msrb.mxu0 %v4917_v8 }
 0x65d   :  { %v1743_v2 = vadd.f32 %v5036_v32, %v1630_v14  ;;  %v5041_v20 = vpop.f32.mrf.mxu0 }
 0x65e   :  { %2115 = vmatpush.msra.mxu1 %v4893_v0  ;;  %2235 = vmatpush.msrb.mxu0 %v4932_v27 }
 0x660   :  { %2116 = vmatpush.msra.mxu1 %v4895_v47  ;;  %2236 = vmatpush.msrb.mxu0 %v4940_v4 }
 0x662   :  { %v1509_v22 = vpop.f32.mrf.mxu2  ;;  %v5049_v59 = vpop.f32.mrf.mxu3  ;;  %2117 = vmatpush.msra.mxu1 %v4915_v34 }
 0x663   :  { %v1633_v38 = vadd.f32 %v1632_v54, %v1509_v22 }
 0x664   :  { %2118 = vmatpush.msra.mxu1 %v4917_v8 }
 0x665   :  { %v1746_v14 = vadd.f32 %v5036_v32, %v1633_v38  ;;  %v5054_v39 = vpop.f32.mrf.mxu0  ;;  %v1638_v38 = vpop.f32.mrf.mxu1 }
 0x666   :  { %2119 = vmatpush.msra.mxu1 %v4932_v27 }
 0x668   :  { %2120 = vmatpush.msra.mxu1 %v4940_v4 }
 0x66a   :  { %v1512_v54 = vpop.f32.mrf.mxu2  ;;  %v5062_v22 = vpop.f32.mrf.mxu3 }
 0x66b   :  { %v1636_v61 = vadd.f32 %v1635_v60, %v1512_v54 }
 0x66d   :  { %v1749_v5 = vadd.f32 %v5036_v32, %v1636_v61  ;;  %v5066_v37 = vpop.f32.mrf.mxu0  ;;  %v1641_v60 = vpop.f32.mrf.mxu1 }
 0x672   :  { %v1515_v1 = vpop.f32.mrf.mxu2  ;;  %v5070_v31 = vpop.f32.mrf.mxu3 }
 0x673   :  { %v1639_v34 = vadd.f32 %v1638_v38, %v1515_v1 }
 0x675   :  { %v1752_v47 = vadd.f32 %v5036_v32, %v1639_v34  ;;  %v5073_v52 = vpop.f32.mrf.mxu0 }
 0x677   :  { %v5077_v8 = vsel %vm150_vm1, %v1749_v5, %v1752_v47  ;;  %v5081_v61 = vsel %vm150_vm1, %v1752_v47, %v1749_v5 }
 0x678   :  { %6108 = vst [vmem:[#allocation36_spill] sm:$0xff] %v5077_v8  ;;  %v1644_v8 = vpop.f32.mrf.mxu1 }
 0x679   :  { %6109 = vst [vmem:[#allocation35_spill] sm:$0xff] %v5081_v61 }
 0x67a   :  { %v1518_v27 = vpop.f32.mrf.mxu2  ;;  %v5083_v10 = vpop.f32.mrf.mxu3 }
 0x67b   :  { %v1642_v4 = vadd.f32 %v1641_v60, %v1518_v27 }
 0x67d   :  { %v1755_v0 = vadd.f32 %v5036_v32, %v1642_v4  ;;  %v5086_v1 = vpop.f32.mrf.mxu0 }
 0x67f   :  { %v5090_v34 = vsel %vm150_vm1, %v1746_v14, %v1755_v0  ;;  %v5094_v38 = vsel %vm150_vm1, %v1755_v0, %v1746_v14  ;;  %v1627_v0 = vadd.f32 %v4990_v16, %v5014_v28 }
 0x680   :  { %6110 = vst [vmem:[#allocation31_spill] sm:$0xff] %v5090_v34  ;;  %v1647_v60 = vpop.f32.mrf.mxu1 }
 0x681   :  { %6111 = vst [vmem:[#allocation42_spill] sm:$0xff] %v5094_v38 }
 0x682   :  { %v1521_v12 = vpop.f32.mrf.mxu2  ;;  %v5096_v5 = vpop.f32.mrf.mxu3 }
 0x683   :  { %v1645_v47 = vadd.f32 %v1644_v8, %v1521_v12  ;;  %v1740_v8 = vadd.f32 %v5036_v32, %v1627_v0 }
 0x685   :  { %v1758_v61 = vadd.f32 %v5036_v32, %v1645_v47  ;;  %v5109_v14 = vpop.f32.mrf.mxu0 }
 0x687   :  { %v5101_v27 = vsel %vm150_vm1, %v1743_v2, %v1758_v61  ;;  %v5105_v4 = vsel %vm150_vm1, %v1758_v61, %v1743_v2 }
 0x688   :  { %6112 = vst [vmem:[#allocation40_spill] sm:$0xff] %v5101_v27  ;;  %v5118_v27 = vld [vmem:[%s5795_s9] sm:$0x7] }
 0x689   :  { %6113 = vst [vmem:[#allocation39_spill] sm:$0xff] %v5105_v4  ;;  %v5125_v16 = vperm.slane %v5118_v27, 0 }
 0x68a   :  { %v1524_v38 = vpop.f32.mrf.mxu2  ;;  %v5111_v34 = vpop.f32.mrf.mxu3 }
 0x68b   :  { %v1648_v12 = vadd.f32 %v1647_v60, %v1524_v38  ;;  %6115 = vst [vmem:[#allocation43_spill] sm:$0xff] %v5125_v16 }
 0x68d   :  { %v1761_v47 = vadd.f32 %v5036_v32, %v1648_v12  ;;  %v1870_v38 = vpop.f32.mrf.mxu0 }
 0x68e   :  { %v1871_v60 = vadd.f32 %v1870_v38, %v5125_v16 }
 0x68f   :  { %v5122_v2 = vsel %vm150_vm1, %v1761_v47, %v1740_v8  ;;  %v1850_v32 = vsel %vm150_vm1, %v1740_v8, %v1761_v47 }
 0x690   :  { %6114 = vst [vmem:[#allocation44_spill] sm:$0xff] %v5122_v2  ;;  %v1913_v0 = vadd.f32 %v1871_v60, %v1850_v32  ;;  %v5138_v2 = vperm.slane %v5029_v6, 2 }
 0x692   :  { %v5127_v28 = vpop.f32.mrf.mxu2  ;;  %v5129_v61 = vpop.f32.mrf.mxu3  ;;  %v2877_v54 = vmul.f32 -1.442695, %v1913_v0 }
 0x694   :  { %2984 = vpow2.f32 %v2877_v54 }
 0x69a   :  { %v1670_v12 = vpop.f32.mrf.mxu2  ;;  %v1711_v4 = vpop.f32.mrf.mxu3 }
 0x69b   :  { %v1671_v3 = vadd.f32 %v1670_v12, %v5033_v13  ;;  %v1712_v56 = vadd.f32 %v1711_v4, %v5020_v41  ;;  %v2985_v41 = vpop.eup %2984 }
 0x69c   :  { %v1917_v12 = vadd.f32 1.0, %v2985_v41 }
 0x69d   :  { %v5143_v7 = vadd.f32 %v5135_v44, %v1671_v3  ;;  %v5146_v38 = vadd.f32 %v5138_v2, %v1712_v56 }
 0x69e   :  { %2986 = vrcp.f32 %v1917_v12  ;;  %vm1923_vm0 = vweird.f32 %v1917_v12 }
 0x69f   :  { %6116 = vst [vmem:[#allocation47_spill] sm:$0xff] %v5143_v7 }
 0x6a0   :  { %6117 = vst [vmem:[#allocation46_spill] sm:$0xff] %v5146_v38 }
 0x6a2   :  { %v1673_v8 = vpop.f32.mrf.mxu2  ;;  %v1714_v47 = vpop.f32.mrf.mxu3 }
 0x6a3   :  { %v1674_v60 = vadd.f32 %v1673_v8, %v5049_v59  ;;  %v1715_v32 = vadd.f32 %v1714_v47, %v5041_v20 }
 0x6a5   :  { %v5151_v6 = vadd.f32 %v5135_v44, %v1674_v60  ;;  %v5154_v13 = vadd.f32 %v5138_v2, %v1715_v32  ;;  %v2987_v32 = vpop.eup %2986 }
 0x6a6   :  { %vm1924_vm1 = vweird.f32 %v2987_v32 }
 0x6a7   :  { %6118 = vst [vmem:[#allocation45_spill] sm:$0xff] %v5151_v6  ;;  %vm5223_vm4 = vmor %vm1923_vm0, %vm1924_vm1 }
 0x6a8   :  { %6119 = vst [vmem:[#allocation50_spill] sm:$0xff] %v5154_v13 }
 0x6aa   :  { %v1676_v3 = vpop.f32.mrf.mxu2  ;;  %v1717_v4 = vpop.f32.mrf.mxu3 }
 0x6ab   :  { %v1677_v56 = vadd.f32 %v1676_v3, %v5062_v22  ;;  %v1718_v0 = vadd.f32 %v1717_v4, %v5054_v39  ;;  %v1919_v4 = vmul.f32 %v2987_v32, %v1917_v12 }
 0x6ad   :  { %v5159_v54 = vadd.f32 %v5135_v44, %v1677_v56  ;;  %v5162_v59 = vadd.f32 %v5138_v2, %v1718_v0 }
 0x6af   :  { %6120 = vst [vmem:[#allocation49_spill] sm:$0xff] %v5159_v54 }
 0x6b0   :  { %6121 = vst [vmem:[#allocation57_spill] sm:$0xff] %v5162_v59 }
 0x6b2   :  { %v1679_v20 = vpop.f32.mrf.mxu2  ;;  %v1720_v8 = vpop.f32.mrf.mxu3 }
 0x6b3   :  { %v1680_v47 = vadd.f32 %v1679_v20, %v5070_v31  ;;  %v1721_v60 = vadd.f32 %v1720_v8, %v5066_v37  ;;  %v1929_v37 = vand.u32 2147483648, %v1917_v12 }
 0x6b5   :  { %v5167_v41 = vadd.f32 %v5135_v44, %v1680_v47  ;;  %v5170_v22 = vadd.f32 %v5138_v2, %v1721_v60  ;;  %v1920_v47 = vsub.f32 1.0, %v1919_v4 }
 0x6b7   :  { %6122 = vst [vmem:[#allocation20_spill] sm:$0xff] %v5167_v41  ;;  %v1921_v4 = vmul.f32 %v2987_v32, %v1920_v47  ;;  %v1927_v47 = vand.u32 2147483647, %v1917_v12 }
 0x6b8   :  { %6123 = vst [vmem:[#allocation52_spill] sm:$0xff] %v5170_v22  ;;  %v5221_v22 = vperm.slane %v5118_v27, 2 }
 0x6b9   :  { %v1922_v31 = vadd.f32 %v2987_v32, %v1921_v4  ;;  %vm1928_vm5 = vcmp.eq.f32.partialorder %v1927_v47, 8.507059e+37 }
 0x6ba   :  { %v1682_v56 = vpop.f32.mrf.mxu2  ;;  %v1723_v0 = vpop.f32.mrf.mxu3 }
 0x6bb   :  { %v1683_v20 = vadd.f32 %v1682_v56, %v5083_v10  ;;  %v1724_v8 = vadd.f32 %v1723_v0, %v5073_v52  ;;  %v1910_v10 = vpop.f32.mrf.mxu0 }
 0x6bc   :  { %v1911_v12 = vadd.f32 %v1910_v10, %v5221_v22 }
 0x6bd   :  { %v5191_v60 = vadd.f32 %v5135_v44, %v1683_v20  ;;  %v5194_v3 = vadd.f32 %v5138_v2, %v1724_v8 }
 0x6bf   :  { %6124 = vst [vmem:[#allocation51_spill] sm:$0xff] %v5191_v60 }
 0x6c0   :  { %6125 = vst [vmem:[#allocation54_spill] sm:$0xff] %v5194_v3 }
 0x6c2   :  { %v1685_v56 = vpop.f32.mrf.mxu2  ;;  %v1726_v0 = vpop.f32.mrf.mxu3 }
 0x6c3   :  { %v1686_v20 = vadd.f32 %v1685_v56, %v5096_v5  ;;  %v1727_v8 = vadd.f32 %v1726_v0, %v5086_v1  ;;  %v1926_v56 = vsel %vm5223_vm4, %v2987_v32, %v1922_v31  ;;  %v5246_v0 = vperm.slane %v5118_v27, 1  ;;  %v1890_v1 = vpop.f32.mrf.mxu1 }
 0x6c4   :  { %v1930_v5 = vor.u32 1.1754944e-38, %v1929_v37 }
 0x6c5   :  { %v5215_v39 = vadd.f32 %v5135_v44, %v1686_v20  ;;  %v5218_v52 = vadd.f32 %v5138_v2, %v1727_v8  ;;  %6130 = vst [vmem:[#allocation30_spill] sm:$0xff] %v5246_v0  ;;  %v1668_v20 = vadd.f32 %v5127_v28, %v5016_v55  ;;  %v1709_v8 = vadd.f32 %v5129_v61, %v5005_v18 }
 0x6c6   :  { %v1931_v4 = vsel %vm1928_vm5, %v1930_v5, %v1926_v56  ;;  %v1891_v27 = vadd.f32 %v1890_v1, %v5246_v0 }
 0x6c7   :  { %6126 = vst [vmem:[#allocation56_spill] sm:$0xff] %v5215_v39  ;;  %v5257_v31 = vadd.f32 %v5135_v44, %v1668_v20  ;;  %v5260_v55 = vadd.f32 %v5138_v2, %v1709_v8  ;;  %v1953_v61 = vmul.f32 %v1931_v4, %v1911_v12 }
 0x6c8   :  { %6127 = vst [vmem:[#allocation55_spill] sm:$0xff] %v5218_v52 }
 0x6c9   :  { %6131 = vst [vmem:[#allocation58_spill] sm:$0xff] %v5257_v31 }
 0x6ca   :  { %v1688_v41 = vpop.f32.mrf.mxu2  ;;  %v1729_v54 = vpop.f32.mrf.mxu3  ;;  %6132 = vst [vmem:[#allocation59_spill] sm:$0xff] %v5260_v55 }
 0x6cb   :  { %v1689_v59 = vadd.f32 %v1688_v41, %v5111_v34  ;;  %v1730_v32 = vadd.f32 %v1729_v54, %v5109_v14 }
 0x6cd   :  { %v5263_v18 = vadd.f32 %v5135_v44, %v1689_v59  ;;  %v5266_v28 = vadd.f32 %v5138_v2, %v1730_v32 }
 0x6cf   :  { %6133 = vst [vmem:[#allocation60_spill] sm:$0xff] %v5263_v18  ;;  %v1852_v34 = vsel %vm3863_vm3, %v5260_v55, %v5266_v28  ;;  %v1851_v44 = vsel %vm3841_vm2, %v5257_v31, %v5263_v18 }
 0x6d0   :  { %6134 = vst [vmem:[#allocation61_spill] sm:$0xff] %v5266_v28  ;;  %v1954_v54 = vadd.f32 %v1953_v61, %v1852_v34  ;;  %v1933_v41 = vadd.f32 %v1891_v27, %v1851_v44 }
 0x6d2   :  { %v2878_v37 = vmul.f32 -1.442695, %v1933_v41 }
 0x6d4   :  { %2988 = vpow2.f32 %v2878_v37 }
 0x6da   :  { %v2989_v10 = vpop.eup %2988 }
 0x6db   :  { %v1937_v47 = vadd.f32 1.0, %v2989_v10  ;;  %v6148_v10 = vld [vmem:[#allocation19_spill] sm:$0xff] }
 0x6dd   :  { %2990 = vrcp.f32 %v1937_v47  ;;  %v1949_v4 = vand.u32 2147483648, %v1937_v47  ;;  %v1947_v20 = vand.u32 2147483647, %v1937_v47  ;;  %vm1943_vm7 = vweird.f32 %v1937_v47 }
 0x6de   :  { %2992 = vtanh.f32 %v1954_v54  ;;  %v6147_v54 = vld [vmem:[#allocation21_spill] sm:$0xff] }
 0x6df   :  { %v1950_v59 = vor.u32 1.1754944e-38, %v1949_v4  ;;  %vm1948_vm9 = vcmp.eq.f32.partialorder %v1947_v20, 8.507059e+37  ;;  %v6153_v4 = vld [vmem:[#allocation24_spill] sm:$0xff]  ;;  %v6155_v20 = vld [vmem:[#allocation53_spill] sm:$0xff] }
 0x6e3   :  { %v2991_v1 = vpop.eup %2990 }
 0x6e4   :  { %v1939_v5 = vmul.f32 %v2991_v1, %v1937_v47  ;;  %vm1944_vm6 = vweird.f32 %v2991_v1  ;;  %v2993_v34 = vpop.eup %2992  ;;  %v6149_v47 = vld [vmem:[#allocation25_spill] sm:$0xff] }
 0x6e5   :  { %vm1945_vm8 = vmor %vm1943_vm7, %vm1944_vm6 }
 0x6e6   :  { %v1940_v12 = vsub.f32 1.0, %v1939_v5  ;;  %v6151_v5 = vld [vmem:[#allocation29_spill] sm:$0xff] }
 0x6e8   :  { %v1941_v56 = vmul.f32 %v2991_v1, %v1940_v12  ;;  %v6152_v12 = vld [vmem:[#allocation48_spill] sm:$0xff] }
 0x6ea   :  { %v1942_v8 = vadd.f32 %v2991_v1, %v1941_v56  ;;  %v6154_v56 = vld [vmem:[#allocation41_spill] sm:$0xff] }
 0x6ec   :  { %v1946_v32 = vsel %vm1945_vm8, %v2991_v1, %v1942_v8  ;;  %v6150_v1 = vld [vmem:[#allocation23_spill] sm:$0xff] }
 0x6ed   :  { %v1951_v27 = vsel %vm1948_vm9, %v1950_v59, %v1946_v32  ;;  %v6156_v32 = vld [vmem:[#allocation40_spill] sm:$0xff] }
 0x6ee   :  { %v1956_v61 = vsub.f32 1.0, %v1951_v27  ;;  %v1958_v41 = vmul.f32 0.0, %v1951_v27 }
 0x6f0   :  { %v1957_v44 = vmul.f32 %v2993_v34, %v1956_v61 }
 0x6f2   :  { %v5284_v37 = vadd.f32 %v1958_v41, %v1957_v44  ;;  %v6157_v41 = vsel %vm3841_vm2, %v5143_v7, %v5215_v39 }
 0x6f4   :  { %1985 = vmatmul.f32.vlgmr.msrb.gmra.mxu1 %v5284_v37  ;;  %2005 = vmatmul.f32.vlgmr.msra.gmra.mxu2 %v5284_v37 }
 0x6f5   :  { %2025 = vmatmul.f32.vlgmr.msrb.gmra.mxu3 %v5284_v37  ;;  %2241 = vmatpush.msrb.mxu1 %v4780_v30  ;;  %v6145_v30 = vld [vmem:[#allocation28_spill] sm:$0xff] }
 0x6f6   :  { %2311 = vmatpush.msra.mxu2 %v4665_v11  ;;  %2331 = vmatpush.msrb.mxu3 %v4777_v51  ;;  %v6135_v11 = vld [vmem:[#allocation34_spill] sm:$0xff]  ;;  %v6143_v51 = vld [vmem:[#allocation16_spill] sm:$0xff] }
 0x6f7   :  { %2242 = vmatpush.msrb.mxu1 %v4790_v57 }
 0x6f8   :  { %2312 = vmatpush.msra.mxu2 %v4671_v48  ;;  %2332 = vmatpush.msrb.mxu3 %v4783_v26  ;;  %v6136_v48 = vld [vmem:[#allocation26_spill] sm:$0xff]  ;;  %v6146_v26 = vld [vmem:[#allocation17_spill] sm:$0xff] }
 0x6f9   :  { %2243 = vmatpush.msrb.mxu1 %v4796_v24 }
 0x6fa   :  { %2313 = vmatpush.msra.mxu2 %v4676_v53  ;;  %2333 = vmatpush.msrb.mxu3 %v4803_v43  ;;  %v6137_v53 = vld [vmem:[#allocation38_spill] sm:$0xff] }
 0x6fb   :  { %2244 = vmatpush.msrb.mxu1 %v4812_v58 }
 0x6fc   :  { %2314 = vmatpush.msra.mxu2 %v4683_v15  ;;  %2334 = vmatpush.msrb.mxu3 %v4807_v40  ;;  %v6138_v15 = vld [vmem:[#allocation33_spill] sm:$0xff] }
 0x6fd   :  { %2245 = vmatpush.msrb.mxu1 %v4818_v62 }
 0x6fe   :  { %2315 = vmatpush.msra.mxu2 %v4691_v35  ;;  %2335 = vmatpush.msrb.mxu3 %v4824_v63  ;;  %v6139_v35 = vld [vmem:[#allocation18_spill] sm:$0xff] }
 0x6ff   :  { %2246 = vmatpush.msrb.mxu1 %v4831_v46 }
 0x700   :  { %2316 = vmatpush.msra.mxu2 %v4703_v45  ;;  %2336 = vmatpush.msrb.mxu3 %v4828_v21  ;;  %v6140_v45 = vld [vmem:[#allocation22_spill] sm:$0xff] }
 0x701   :  { %2247 = vmatpush.msrb.mxu1 %v4837_v25 }
 0x702   :  { %2317 = vmatpush.msra.mxu2 %v4710_v19  ;;  %2337 = vmatpush.msrb.mxu3 %v4847_v33  ;;  %v6141_v19 = vld [vmem:[#allocation37_spill] sm:$0xff] }
 0x703   :  { %2248 = vmatpush.msrb.mxu1 %v4842_v29 }
 0x704   :  { %2318 = vmatpush.msra.mxu2 %v4715_v23  ;;  %2338 = vmatpush.msrb.mxu3 %v4851_v36  ;;  %v6142_v23 = vld [vmem:[#allocation27_spill] sm:$0xff] }
 0x705   :  { %2249 = vmatpush.msrb.mxu1 %v4854_v49 }
 0x706   :  { %2319 = vmatpush.msra.mxu2 %v4730_v9  ;;  %2339 = vmatpush.msrb.mxu3 %v4870_v50  ;;  %v6144_v9 = vld [vmem:[#allocation15_spill] sm:$0xff] }
 0x707   :  { %2250 = vmatpush.msrb.mxu1 %v6135_v11 }
 0x708   :  { %2320 = vmatpush.msra.mxu2 %v6136_v48  ;;  %2340 = vmatpush.msrb.mxu3 %v6137_v53 }
 0x709   :  { %2251 = vmatpush.msrb.mxu1 %v6138_v15 }
 0x70a   :  { %2321 = vmatpush.msra.mxu2 %v6139_v35  ;;  %2341 = vmatpush.msrb.mxu3 %v6140_v45 }
 0x70b   :  { %2252 = vmatpush.msrb.mxu1 %v6141_v19 }
 0x70c   :  { %2322 = vmatpush.msra.mxu2 %v6142_v23  ;;  %2342 = vmatpush.msrb.mxu3 %v6143_v51 }
 0x70d   :  { %2253 = vmatpush.msrb.mxu1 %v6144_v9 }
 0x70e   :  { %2323 = vmatpush.msra.mxu2 %v6145_v30  ;;  %2343 = vmatpush.msrb.mxu3 %v6146_v26 }
 0x70f   :  { %2254 = vmatpush.msrb.mxu1 %v6147_v54 }
 0x710   :  { %2324 = vmatpush.msra.mxu2 %v6148_v10  ;;  %2344 = vmatpush.msrb.mxu3 %v6149_v47 }
 0x711   :  { %2255 = vmatpush.msrb.mxu1 %v6150_v1 }
 0x712   :  { %2325 = vmatpush.msra.mxu2 %v6151_v5  ;;  %2345 = vmatpush.msrb.mxu3 %v6152_v12 }
 0x713   :  { %2256 = vmatpush.msrb.mxu1 %v6153_v4 }
 0x714   :  { %2326 = vmatpush.msra.mxu2 %v6154_v56  ;;  %2346 = vmatpush.msrb.mxu3 %v6155_v20 }
 0x771   :  { %v1986_v8 = vpop.f32.mrf.mxu1 }
 0x772   :  { %v1987_v59 = vadd.f32 %v1986_v8, %v5125_v16 }
 0x774   :  { %v2029_v27 = vadd.f32 %v1987_v59, %v6156_v32 }
 0x776   :  { %v2879_v61 = vmul.f32 -1.442695, %v2029_v27 }
 0x777   :  { %v2006_v34 = vpop.f32.mrf.mxu2 }
 0x778   :  { %2994 = vpow2.f32 %v2879_v61  ;;  %v2007_v44 = vadd.f32 %v2006_v34, %v5246_v0  ;;  %v2026_v14 = vpop.f32.mrf.mxu3 }
 0x77a   :  { %v2049_v48 = vadd.f32 %v2007_v44, %v6157_v41 }
 0x77c   :  { %v2880_v35 = vmul.f32 -1.442695, %v2049_v48  ;;  %v2027_v48 = vadd.f32 %v2026_v14, %v5221_v22 }
 0x77e   :  { %v2995_v23 = vpop.eup %2994  ;;  %2996 = vpow2.f32 %v2880_v35 }
 0x77f   :  { %v2033_v30 = vadd.f32 1.0, %v2995_v23 }
 0x781   :  { %2998 = vrcp.f32 %v2033_v30  ;;  %v2045_v32 = vand.u32 2147483648, %v2033_v30  ;;  %v2043_v61 = vand.u32 2147483647, %v2033_v30  ;;  %vm2039_vm11 = vweird.f32 %v2033_v30 }
 0x783   :  { %v2046_v44 = vor.u32 1.1754944e-38, %v2045_v32  ;;  %vm2044_vm13 = vcmp.eq.f32.partialorder %v2043_v61, 8.507059e+37 }
 0x784   :  { %v2997_v10 = vpop.eup %2996 }
 0x785   :  { %v2053_v5 = vadd.f32 1.0, %v2997_v10 }
 0x787   :  { %v2999_v56 = vpop.eup %2998  ;;  %3000 = vrcp.f32 %v2053_v5  ;;  %vm2059_vm15 = vweird.f32 %v2053_v5 }
 0x788   :  { %v2035_v8 = vmul.f32 %v2999_v56, %v2033_v30  ;;  %vm2040_vm10 = vweird.f32 %v2999_v56  ;;  %v6158_v30 = vsel %vm3863_vm3, %v5146_v38, %v5218_v52  ;;  %v6170_v38 = vld [vmem:[#allocation49_spill] sm:$0xff]  ;;  %v6171_v52 = vld [vmem:[#allocation20_spill] sm:$0xff] }
 0x789   :  { %vm2041_vm12 = vmor %vm2039_vm11, %vm2040_vm10  ;;  %v6172_v7 = vsel %vm3841_vm2, %v6170_v38, %v6171_v52 }
 0x78a   :  { %v2036_v59 = vsub.f32 1.0, %v2035_v8  ;;  %v2065_v8 = vand.u32 2147483648, %v2053_v5 }
 0x78c   :  { %v2037_v27 = vmul.f32 %v2999_v56, %v2036_v59  ;;  %v2063_v59 = vand.u32 2147483647, %v2053_v5 }
 0x78d   :  { %v3001_v34 = vpop.eup %3000 }
 0x78e   :  { %v2055_v2 = vmul.f32 %v3001_v34, %v2053_v5  ;;  %v2038_v55 = vadd.f32 %v2999_v56, %v2037_v27  ;;  %vm2060_vm14 = vweird.f32 %v3001_v34  ;;  %vm2064_vm0 = vcmp.eq.f32.partialorder %v2063_v59, 8.507059e+37  ;;  %v5363_v5 = vld [vmem:[#allocation9 + $0x170] sm:$0xff] }
 0x78f   :  { %vm2061_vm1 = vmor %vm2059_vm15, %vm2060_vm14 }
 0x790   :  { %v2056_v41 = vsub.f32 1.0, %v2055_v2  ;;  %v2042_v35 = vsel %vm2041_vm12, %v2999_v56, %v2038_v55  ;;  %v2066_v2 = vor.u32 1.1754944e-38, %v2065_v8 }
 0x791   :  { %v2047_v23 = vsel %vm2044_vm13, %v2046_v44, %v2042_v35  ;;  %v5379_v35 = vld [vmem:[#allocation9 + $0x120] sm:$0xff] }
 0x792   :  { %v2057_v10 = vmul.f32 %v3001_v34, %v2056_v41  ;;  %v2069_v28 = vmul.f32 %v2047_v23, %v2027_v48  ;;  %v5374_v48 = vld [vmem:[#allocation9 + $0x138] sm:$0xff] }
 0x794   :  { %v2058_v31 = vadd.f32 %v3001_v34, %v2057_v10  ;;  %v2070_v27 = vadd.f32 %v2069_v28, %v6158_v30  ;;  %v5357_v28 = vld [vmem:[#allocation9 + $0x178] sm:$0xff] }
 0x796   :  { %v2062_v32 = vsel %vm2061_vm1, %v3001_v34, %v2058_v31  ;;  %3002 = vtanh.f32 %v2070_v27  ;;  %v5360_v31 = vld [vmem:[#allocation9 + $0x168] sm:$0xff]  ;;  %v5370_v34 = vld [vmem:[#allocation9 + $0x158] sm:$0xff] }
 0x797   :  { %v2067_v55 = vsel %vm2064_vm0, %v2066_v2, %v2062_v32 }
 0x798   :  { %v2072_v14 = vsub.f32 1.0, %v2067_v55  ;;  %v2074_v44 = vmul.f32 %v2067_v55, %v5284_v37  ;;  %v5367_v37 = vld [vmem:[#allocation9 + $0x150] sm:$0xff] }
 0x79c   :  { %v3003_v56 = vpop.eup %3002 }
 0x79d   :  { %v2073_v61 = vmul.f32 %v3003_v56, %v2072_v14 }
 0x79f   :  { %v5352_v41 = vadd.f32 %v2074_v44, %v2073_v61 }
 0x7a1   :  { %2101 = vmatmul.f32.vlgmr.msra.gmra.mxu0 %v5352_v41  ;;  %2121 = vmatmul.f32.vlgmr.msra.gmra.mxu1 %v5352_v41 }
 0x7a2   :  { %2141 = vmatmul.f32.vlgmr.msrb.gmra.mxu2 %v5352_v41  ;;  %2351 = vmatpush.msra.mxu0 %v5357_v28 }
 0x7a3   :  { %2421 = vmatpush.msra.mxu1 %v5360_v31  ;;  %2441 = vmatpush.msrb.mxu2 %v5363_v5 }
 0x7a4   :  { %2352 = vmatpush.msra.mxu0 %v4790_v57  ;;  %v5384_v57 = vld [vmem:[#allocation9 + $0x108] sm:$0xff] }
 0x7a5   :  { %2422 = vmatpush.msra.mxu1 %v5367_v37  ;;  %2442 = vmatpush.msrb.mxu2 %v5370_v34 }
 0x7a6   :  { %2353 = vmatpush.msra.mxu0 %v4796_v24  ;;  %v5389_v24 = vld [vmem:[#allocation9 + $0xf0] sm:$0xff] }
 0x7a7   :  { %2423 = vmatpush.msra.mxu1 %v5374_v48  ;;  %2443 = vmatpush.msrb.mxu2 %v4803_v43  ;;  %v5394_v43 = vld [vmem:[#allocation9 + $0xd8] sm:$0xff] }
 0x7a8   :  { %2354 = vmatpush.msra.mxu0 %v4812_v58  ;;  %v5404_v58 = vld [vmem:[#allocation9 + $0xa8] sm:$0xff] }
 0x7a9   :  { %2424 = vmatpush.msra.mxu1 %v5379_v35  ;;  %2444 = vmatpush.msrb.mxu2 %v4807_v40  ;;  %v5399_v40 = vld [vmem:[#allocation9 + $0xc0] sm:$0xff] }
 0x7aa   :  { %2355 = vmatpush.msra.mxu0 %v4818_v62  ;;  %v5409_v62 = vld [vmem:[#allocation9 + $0x90] sm:$0xff] }
 0x7ab   :  { %2425 = vmatpush.msra.mxu1 %v5384_v57  ;;  %2445 = vmatpush.msrb.mxu2 %v4824_v63  ;;  %v5414_v63 = vld [vmem:[#allocation9 + $0x78] sm:$0xff] }
 0x7ac   :  { %2356 = vmatpush.msra.mxu0 %v4831_v46  ;;  %v5424_v46 = vld [vmem:[#allocation9 + $0x48] sm:$0xff] }
 0x7ad   :  { %2426 = vmatpush.msra.mxu1 %v5389_v24  ;;  %2446 = vmatpush.msrb.mxu2 %v4828_v21  ;;  %v5419_v21 = vld [vmem:[#allocation9 + $0x60] sm:$0xff] }
 0x7ae   :  { %2357 = vmatpush.msra.mxu0 %v4837_v25  ;;  %v5429_v25 = vld [vmem:[#allocation9 + $0x30] sm:$0xff] }
 0x7af   :  { %2427 = vmatpush.msra.mxu1 %v5394_v43  ;;  %2447 = vmatpush.msrb.mxu2 %v4847_v33  ;;  %6159 = vst [vmem:[#allocation34_spill] sm:$0xff] %v5429_v25  ;;  %v5439_v33 = vld [vmem:[#allocation9] sm:$0xff] }
 0x7b0   :  { %2358 = vmatpush.msra.mxu0 %v4842_v29  ;;  %v5434_v29 = vld [vmem:[#allocation9 + $0x18] sm:$0xff]  ;;  %6161 = vst [vmem:[#allocation38_spill] sm:$0xff] %v5439_v33 }
 0x7b1   :  { %2428 = vmatpush.msra.mxu1 %v5399_v40  ;;  %2448 = vmatpush.msrb.mxu2 %v4851_v36  ;;  %6160 = vst [vmem:[#allocation26_spill] sm:$0xff] %v5434_v29 }
 0x7b2   :  { %2359 = vmatpush.msra.mxu0 %v4854_v49 }
 0x7b3   :  { %2429 = vmatpush.msra.mxu1 %v5404_v58  ;;  %2449 = vmatpush.msrb.mxu2 %v4870_v50 }
 0x7b4   :  { %2360 = vmatpush.msra.mxu0 %v6135_v11 }
 0x7b5   :  { %2430 = vmatpush.msra.mxu1 %v5409_v62  ;;  %2450 = vmatpush.msrb.mxu2 %v6137_v53  ;;  %v6162_v53 = vld [vmem:[#allocation31_spill] sm:$0xff] }
 0x7b6   :  { %2361 = vmatpush.msra.mxu0 %v6138_v15 }
 0x7b7   :  { %2431 = vmatpush.msra.mxu1 %v5414_v63  ;;  %2451 = vmatpush.msrb.mxu2 %v6140_v45  ;;  %v6163_v45 = vsel %vm3841_vm2, %v5151_v6, %v5191_v60  ;;  %v6173_v60 = vld [vmem:[#allocation36_spill] sm:$0xff] }
 0x7b8   :  { %2362 = vmatpush.msra.mxu0 %v6141_v19 }
 0x7b9   :  { %2432 = vmatpush.msra.mxu1 %v5419_v21  ;;  %2452 = vmatpush.msrb.mxu2 %v6143_v51 }
 0x7ba   :  { %2363 = vmatpush.msra.mxu0 %v6144_v9 }
 0x7bb   :  { %2433 = vmatpush.msra.mxu1 %v5424_v46  ;;  %2453 = vmatpush.msrb.mxu2 %v6146_v26 }
 0x7bc   :  { %2364 = vmatpush.msra.mxu0 %v6147_v54 }
 0x7bd   :  { %2434 = vmatpush.msra.mxu1 %v5429_v25  ;;  %2454 = vmatpush.msrb.mxu2 %v6149_v47 }
 0x7be   :  { %2365 = vmatpush.msra.mxu0 %v6150_v1 }
 0x7bf   :  { %2435 = vmatpush.msra.mxu1 %v5434_v29  ;;  %2455 = vmatpush.msrb.mxu2 %v6152_v12 }
 0x7c0   :  { %2366 = vmatpush.msra.mxu0 %v6153_v4 }
 0x7c1   :  { %2436 = vmatpush.msra.mxu1 %v5439_v33  ;;  %2456 = vmatpush.msrb.mxu2 %v6155_v20 }
 0x81e   :  { %v2102_v36 = vpop.f32.mrf.mxu0  ;;  %v2122_v49 = vpop.f32.mrf.mxu1 }
 0x81f   :  { %v2103_v50 = vadd.f32 %v2102_v36, %v5125_v16  ;;  %v2123_v11 = vadd.f32 %v2122_v49, %v5246_v0 }
 0x821   :  { %v2145_v15 = vadd.f32 %v2103_v50, %v6162_v53  ;;  %v2165_v19 = vadd.f32 %v2123_v11, %v6163_v45  ;;  %v6164_v53 = vsel %vm3863_vm3, %v5154_v13, %v5194_v3 }
 0x823   :  { %v2881_v51 = vmul.f32 -1.442695, %v2145_v15  ;;  %v2882_v9 = vmul.f32 -1.442695, %v2165_v19 }
 0x825   :  { %3004 = vpow2.f32 %v2881_v51  ;;  %v2142_v32 = vpop.f32.mrf.mxu2 }
 0x826   :  { %3006 = vpow2.f32 %v2882_v9  ;;  %v2143_v56 = vadd.f32 %v2142_v32, %v5221_v22  ;;  %v5506_v32 = vld [vmem:[#allocation9 + $0xd0] sm:$0xff] }
 0x82b   :  { %v3005_v26 = vpop.eup %3004 }
 0x82c   :  { %v3007_v54 = vpop.eup %3006  ;;  %v2149_v47 = vadd.f32 1.0, %v3005_v26 }
 0x82d   :  { %v2169_v1 = vadd.f32 1.0, %v3007_v54 }
 0x82e   :  { %3008 = vrcp.f32 %v2149_v47  ;;  %v2161_v59 = vand.u32 2147483648, %v2149_v47  ;;  %v2159_v27 = vand.u32 2147483647, %v2149_v47  ;;  %vm2155_vm5 = vweird.f32 %v2149_v47 }
 0x82f   :  { %3010 = vrcp.f32 %v2169_v1  ;;  %v2181_v49 = vand.u32 2147483648, %v2169_v1  ;;  %vm2175_vm9 = vweird.f32 %v2169_v1  ;;  %v2179_v11 = vand.u32 2147483647, %v2169_v1 }
 0x830   :  { %v2162_v14 = vor.u32 1.1754944e-38, %v2161_v59  ;;  %vm2160_vm7 = vcmp.eq.f32.partialorder %v2159_v27, 8.507059e+37  ;;  %v5492_v59 = vld [vmem:[#allocation9 + $0x100] sm:$0xff]  ;;  %v5499_v27 = vld [vmem:[#allocation9 + $0xe8] sm:$0xff] }
 0x831   :  { %v2182_v19 = vor.u32 1.1754944e-38, %v2181_v49  ;;  %vm2180_vm11 = vcmp.eq.f32.partialorder %v2179_v11, 8.507059e+37  ;;  %v5531_v49 = vld [vmem:[#allocation9 + $0x80] sm:$0xff]  ;;  %v5538_v11 = vld [vmem:[#allocation9 + $0x68] sm:$0xff] }
 0x834   :  { %v3009_v12 = vpop.eup %3008 }
 0x835   :  { %v3011_v4 = vpop.eup %3010  ;;  %v2151_v20 = vmul.f32 %v3009_v12, %v2149_v47  ;;  %vm2156_vm4 = vweird.f32 %v3009_v12 }
 0x836   :  { %v2171_v23 = vmul.f32 %v3011_v4, %v2169_v1  ;;  %vm2157_vm6 = vmor %vm2155_vm5, %vm2156_vm4  ;;  %vm2176_vm8 = vweird.f32 %v3011_v4  ;;  %v5466_v1 = vld [vmem:[#allocation9 + $0x160] sm:$0xff] }
 0x837   :  { %v2152_v10 = vsub.f32 1.0, %v2151_v20  ;;  %vm2177_vm10 = vmor %vm2175_vm9, %vm2176_vm8  ;;  %v5478_v20 = vld [vmem:[#allocation9 + $0x130] sm:$0xff] }
 0x838   :  { %v2172_v8 = vsub.f32 1.0, %v2171_v23  ;;  %v5482_v23 = vld [vmem:[#allocation9 + $0x128] sm:$0xff] }
 0x839   :  { %v2153_v30 = vmul.f32 %v3009_v12, %v2152_v10  ;;  %v5485_v10 = vld [vmem:[#allocation9 + $0x118] sm:$0xff] }
 0x83a   :  { %v2173_v2 = vmul.f32 %v3011_v4, %v2172_v8  ;;  %v5489_v8 = vld [vmem:[#allocation9 + $0x110] sm:$0xff] }
 0x83b   :  { %v2154_v55 = vadd.f32 %v3009_v12, %v2153_v30  ;;  %v5496_v30 = vld [vmem:[#allocation9 + $0xf8] sm:$0xff] }
 0x83c   :  { %v2174_v36 = vadd.f32 %v3011_v4, %v2173_v2  ;;  %v5503_v2 = vld [vmem:[#allocation9 + $0xe0] sm:$0xff] }
 0x83d   :  { %v2158_v61 = vsel %vm2157_vm6, %v3009_v12, %v2154_v55  ;;  %v5510_v55 = vld [vmem:[#allocation9 + $0xc8] sm:$0xff] }
 0x83e   :  { %v2163_v44 = vsel %vm2160_vm7, %v2162_v14, %v2158_v61  ;;  %v2178_v45 = vsel %vm2177_vm10, %v3011_v4, %v2174_v36  ;;  %v5475_v4 = vld [vmem:[#allocation9 + $0x140] sm:$0xff]  ;;  %v5513_v14 = vld [vmem:[#allocation9 + $0xb8] sm:$0xff]  ;;  %v5527_v36 = vld [vmem:[#allocation9 + $0x88] sm:$0xff] }
 0x83f   :  { %v2185_v50 = vmul.f32 %v2163_v44, %v2143_v56  ;;  %v2183_v51 = vsel %vm2180_vm11, %v2182_v19, %v2178_v45  ;;  %v5517_v56 = vld [vmem:[#allocation9 + $0xb0] sm:$0xff]  ;;  %v5520_v61 = vld [vmem:[#allocation9 + $0xa0] sm:$0xff]  ;;  %v5524_v44 = vld [vmem:[#allocation9 + $0x98] sm:$0xff] }
 0x840   :  { %v2188_v9 = vsub.f32 1.0, %v2183_v51  ;;  %v2190_v47 = vmul.f32 %v2183_v51, %v5352_v41  ;;  %v5471_v41 = vld [vmem:[#allocation9 + $0x148] sm:$0xff]  ;;  %v5548_v45 = vld [vmem:[#allocation9 + $0x40] sm:$0xff]  ;;  %v5552_v19 = vld [vmem:[#allocation9 + $0x38] sm:$0xff] }
 0x841   :  { %v2186_v15 = vadd.f32 %v2185_v50, %v6164_v53  ;;  %v5534_v50 = vld [vmem:[#allocation9 + $0x70] sm:$0xff]  ;;  %v5541_v53 = vld [vmem:[#allocation9 + $0x58] sm:$0xff]  ;;  %6165 = vst [vmem:[#allocation33_spill] sm:$0xff] %v5552_v19  ;;  %v5555_v51 = vld [vmem:[#allocation9 + $0x28] sm:$0xff] }
 0x842   :  { %6166 = vst [vmem:[#allocation18_spill] sm:$0xff] %v5555_v51 }
 0x843   :  { %3012 = vtanh.f32 %v2186_v15  ;;  %v5545_v15 = vld [vmem:[#allocation9 + $0x50] sm:$0xff] }
 0x849   :  { %v3013_v26 = vpop.eup %3012 }
 0x84a   :  { %v2189_v54 = vmul.f32 %v3013_v26, %v2188_v9  ;;  %v5559_v9 = vld [vmem:[#allocation9 + $0x20] sm:$0xff]  ;;  %v5562_v26 = vld [vmem:[#allocation9 + $0x10] sm:$0xff] }
 0x84b   :  { %6167 = vst [vmem:[#allocation22_spill] sm:$0xff] %v5559_v9 }
 0x84c   :  { %v5458_v12 = vadd.f32 %v2190_v47, %v2189_v54  ;;  %6168 = vst [vmem:[#allocation37_spill] sm:$0xff] %v5562_v26  ;;  %v5566_v54 = vld [vmem:[#allocation9 + $0x8] sm:$0xff] }
 0x84d   :  { %6169 = vst [vmem:[#allocation27_spill] sm:$0xff] %v5566_v54 }
 0x84e   :  { %2217 = vmatmul.f32.vlgmr.msra.gmra.mxu3 %v5458_v12  ;;  %2237 = vmatmul.f32.vlgmr.msrb.gmra.mxu0 %v5458_v12 }
 0x84f   :  { %2257 = vmatmul.f32.vlgmr.msrb.gmra.mxu1 %v5458_v12  ;;  %2461 = vmatpush.msra.mxu3 %v5357_v28 }
 0x850   :  { %2531 = vmatpush.msrb.mxu0 %v5360_v31  ;;  %2551 = vmatpush.msrb.mxu1 %v5363_v5 }
 0x851   :  { %2462 = vmatpush.msra.mxu3 %v5466_v1 }
 0x852   :  { %2532 = vmatpush.msrb.mxu0 %v5367_v37  ;;  %2552 = vmatpush.msrb.mxu1 %v5370_v34 }
 0x853   :  { %2463 = vmatpush.msra.mxu3 %v5471_v41 }
 0x854   :  { %2533 = vmatpush.msrb.mxu0 %v5374_v48  ;;  %2553 = vmatpush.msrb.mxu1 %v5475_v4 }
 0x855   :  { %2464 = vmatpush.msra.mxu3 %v5478_v20 }
 0x856   :  { %2534 = vmatpush.msrb.mxu0 %v5379_v35  ;;  %2554 = vmatpush.msrb.mxu1 %v5482_v23 }
 0x857   :  { %2465 = vmatpush.msra.mxu3 %v5485_v10 }
 0x858   :  { %2535 = vmatpush.msrb.mxu0 %v5384_v57  ;;  %2555 = vmatpush.msrb.mxu1 %v5489_v8 }
 0x859   :  { %2466 = vmatpush.msra.mxu3 %v5492_v59 }
 0x85a   :  { %2536 = vmatpush.msrb.mxu0 %v5389_v24  ;;  %2556 = vmatpush.msrb.mxu1 %v5496_v30 }
 0x85b   :  { %2467 = vmatpush.msra.mxu3 %v5499_v27 }
 0x85c   :  { %2537 = vmatpush.msrb.mxu0 %v5394_v43  ;;  %2557 = vmatpush.msrb.mxu1 %v5503_v2 }
 0x85d   :  { %2468 = vmatpush.msra.mxu3 %v5506_v32 }
 0x85e   :  { %2538 = vmatpush.msrb.mxu0 %v5399_v40  ;;  %2558 = vmatpush.msrb.mxu1 %v5510_v55 }
 0x85f   :  { %2469 = vmatpush.msra.mxu3 %v5513_v14 }
 0x860   :  { %2539 = vmatpush.msrb.mxu0 %v5404_v58  ;;  %2559 = vmatpush.msrb.mxu1 %v5517_v56 }
 0x861   :  { %2470 = vmatpush.msra.mxu3 %v5520_v61 }
 0x862   :  { %2540 = vmatpush.msrb.mxu0 %v5409_v62  ;;  %2560 = vmatpush.msrb.mxu1 %v5524_v44 }
 0x863   :  { %2471 = vmatpush.msra.mxu3 %v5527_v36 }
 0x864   :  { %2541 = vmatpush.msrb.mxu0 %v5414_v63  ;;  %2561 = vmatpush.msrb.mxu1 %v5531_v49 }
 0x865   :  { %2472 = vmatpush.msra.mxu3 %v5534_v50 }
 0x866   :  { %2542 = vmatpush.msrb.mxu0 %v5419_v21  ;;  %2562 = vmatpush.msrb.mxu1 %v5538_v11 }
 0x867   :  { %2473 = vmatpush.msra.mxu3 %v5541_v53 }
 0x868   :  { %2543 = vmatpush.msrb.mxu0 %v5424_v46  ;;  %2563 = vmatpush.msrb.mxu1 %v5545_v15 }
 0x869   :  { %2474 = vmatpush.msra.mxu3 %v5548_v45 }
 0x86a   :  { %2544 = vmatpush.msrb.mxu0 %v5429_v25  ;;  %2564 = vmatpush.msrb.mxu1 %v5552_v19 }
 0x86b   :  { %2475 = vmatpush.msra.mxu3 %v5555_v51 }
 0x86c   :  { %2545 = vmatpush.msrb.mxu0 %v5434_v29  ;;  %2565 = vmatpush.msrb.mxu1 %v5559_v9 }
 0x86d   :  { %2476 = vmatpush.msra.mxu3 %v5562_v26 }
 0x86e   :  { %2546 = vmatpush.msrb.mxu0 %v5439_v33  ;;  %2566 = vmatpush.msrb.mxu1 %v5566_v54 }
 0x8cb   :  { %v2238_v47 = vpop.f32.mrf.mxu0 }
 0x8cc   :  { %v2239_v18 = vadd.f32 %v2238_v47, %v5246_v0 }
 0x8ce   :  { %v2281_v39 = vadd.f32 %v2239_v18, %v6172_v7 }
 0x8d0   :  { %v2884_v13 = vmul.f32 -1.442695, %v2281_v39 }
 0x8d1   :  { %v2218_v3 = vpop.f32.mrf.mxu3 }
 0x8d2   :  { %3014 = vpow2.f32 %v2884_v13  ;;  %v2219_v6 = vadd.f32 %v2218_v3, %v5125_v16 }
 0x8d4   :  { %v2261_v33 = vadd.f32 %v2219_v6, %v6173_v60  ;;  %v2258_v6 = vpop.f32.mrf.mxu1 }
 0x8d6   :  { %v2883_v26 = vmul.f32 -1.442695, %v2261_v33 }
 0x8d8   :  { %v3015_v9 = vpop.eup %3014  ;;  %3016 = vpow2.f32 %v2883_v26 }
 0x8d9   :  { %v2285_v54 = vadd.f32 1.0, %v3015_v9  ;;  %v2259_v9 = vadd.f32 %v2258_v6, %v5221_v22 }
 0x8db   :  { %3018 = vrcp.f32 %v2285_v54  ;;  %v2297_v19 = vand.u32 2147483648, %v2285_v54  ;;  %vm2291_vm0 = vweird.f32 %v2285_v54 }
 0x8de   :  { %v3017_v29 = vpop.eup %3016 }
 0x8df   :  { %v2265_v47 = vadd.f32 1.0, %v3017_v29 }
 0x8e1   :  { %3020 = vrcp.f32 %v2265_v47  ;;  %v3019_v17 = vpop.eup %3018  ;;  %v2277_v18 = vand.u32 2147483648, %v2265_v47  ;;  %v2275_v3 = vand.u32 2147483647, %v2265_v47  ;;  %vm2271_vm13 = vweird.f32 %v2265_v47 }
 0x8e2   :  { %v2287_v0 = vmul.f32 %v3019_v17, %v2285_v54  ;;  %vm2292_vm1 = vweird.f32 %v3019_v17 }
 0x8e3   :  { %v2278_v33 = vor.u32 1.1754944e-38, %v2277_v18  ;;  %vm2276_vm15 = vcmp.eq.f32.partialorder %v2275_v3, 8.507059e+37  ;;  %vm2293_vm4 = vmor %vm2291_vm0, %vm2292_vm1  ;;  %v2298_v18 = vor.u32 1.1754944e-38, %v2297_v19 }
 0x8e4   :  { %v2288_v7 = vsub.f32 1.0, %v2287_v0 }
 0x8e6   :  { %v2289_v52 = vmul.f32 %v3019_v17, %v2288_v7  ;;  %v6174_v7 = vld [vmem:[#allocation57_spill] sm:$0xff] }
 0x8e7   :  { %v3021_v51 = vpop.eup %3020 }
 0x8e8   :  { %v2267_v38 = vmul.f32 %v3021_v51, %v2265_v47  ;;  %vm2272_vm12 = vweird.f32 %v3021_v51  ;;  %v2290_v16 = vadd.f32 %v3019_v17, %v2289_v52 }
 0x8e9   :  { %vm2273_vm14 = vmor %vm2271_vm13, %vm2272_vm12 }
 0x8ea   :  { %v2268_v39 = vsub.f32 1.0, %v2267_v38  ;;  %v2295_v38 = vand.u32 2147483647, %v2285_v54  ;;  %v2294_v25 = vsel %vm2293_vm4, %v3019_v17, %v2290_v16  ;;  %v6177_v17 = vld [vmem:[#allocation34_spill] sm:$0xff]  ;;  %v6178_v16 = vld [vmem:[#allocation33_spill] sm:$0xff] }
 0x8ec   :  { %v2269_v13 = vmul.f32 %v3021_v51, %v2268_v39  ;;  %v6175_v39 = vld [vmem:[#allocation52_spill] sm:$0xff]  ;;  %vm2296_vm5 = vcmp.eq.f32.partialorder %v2295_v38, 8.507059e+37 }
 0x8ee   :  { %v2270_v60 = vadd.f32 %v3021_v51, %v2269_v13  ;;  %v6176_v13 = vsel %vm3863_vm3, %v6174_v7, %v6175_v39 }
 0x8f0   :  { %v2274_v29 = vsel %vm2273_vm14, %v3021_v51, %v2270_v60  ;;  %v2299_v51 = vsel %vm2296_vm5, %v2298_v18, %v2294_v25  ;;  %v6189_v25 = vld [vmem:[#allocation20_spill] sm:$0xff] }
 0x8f1   :  { %v2279_v26 = vsel %vm2276_vm15, %v2278_v33, %v2274_v29  ;;  %v2304_v3 = vsub.f32 1.0, %v2299_v51  ;;  %v2306_v52 = vmul.f32 %v2299_v51, %v5458_v12  ;;  %v6190_v12 = vld [vmem:[#allocation49_spill] sm:$0xff] }
 0x8f2   :  { %v2301_v0 = vmul.f32 %v2279_v26, %v2259_v9 }
 0x8f4   :  { %v2302_v47 = vadd.f32 %v2301_v0, %v6176_v13 }
 0x8f6   :  { %3022 = vtanh.f32 %v2302_v47 }
 0x8fc   :  { %v3023_v6 = vpop.eup %3022 }
 0x8fd   :  { %v2305_v60 = vmul.f32 %v3023_v6, %v2304_v3 }
 0x8ff   :  { %v5584_v33 = vadd.f32 %v2306_v52, %v2305_v60 }
 0x901   :  { %2327 = vmatmul.f32.vlgmr.msra.gmra.mxu2 %v5584_v33  ;;  %2347 = vmatmul.f32.vlgmr.msrb.gmra.mxu3 %v5584_v33 }
 0x902   :  { %2367 = vmatmul.f32.vlgmr.msra.gmra.mxu0 %v5584_v33  ;;  %2571 = vmatpush.msra.mxu2 %v5357_v28 }
 0x903   :  { %2641 = vmatpush.msrb.mxu3 %v5360_v31  ;;  %2661 = vmatpush.msra.mxu0 %v5363_v5  ;;  %v6179_v31 = vld [vmem:[#allocation18_spill] sm:$0xff] }
 0x904   :  { %2572 = vmatpush.msra.mxu2 %v5466_v1  ;;  %v6180_v5 = vld [vmem:[#allocation26_spill] sm:$0xff] }
 0x905   :  { %2642 = vmatpush.msrb.mxu3 %v5367_v37  ;;  %2662 = vmatpush.msra.mxu0 %v5370_v34  ;;  %v6181_v37 = vld [vmem:[#allocation22_spill] sm:$0xff]  ;;  %v6182_v34 = vld [vmem:[#allocation37_spill] sm:$0xff] }
 0x906   :  { %2573 = vmatpush.msra.mxu2 %v5471_v41 }
 0x907   :  { %2643 = vmatpush.msrb.mxu3 %v5374_v48  ;;  %2663 = vmatpush.msra.mxu0 %v5475_v4  ;;  %v6183_v48 = vld [vmem:[#allocation38_spill] sm:$0xff]  ;;  %v6191_v4 = vsel %vm3841_vm2, %v6189_v25, %v6190_v12 }
 0x908   :  { %2574 = vmatpush.msra.mxu2 %v5478_v20 }
 0x909   :  { %2644 = vmatpush.msrb.mxu3 %v5379_v35  ;;  %2664 = vmatpush.msra.mxu0 %v5482_v23  ;;  %v6184_v35 = vld [vmem:[#allocation27_spill] sm:$0xff] }
 0x90a   :  { %2575 = vmatpush.msra.mxu2 %v5485_v10 }
 0x90b   :  { %2645 = vmatpush.msrb.mxu3 %v5384_v57  ;;  %2665 = vmatpush.msra.mxu0 %v5489_v8 }
 0x90c   :  { %2576 = vmatpush.msra.mxu2 %v5492_v59 }
 0x90d   :  { %2646 = vmatpush.msrb.mxu3 %v5389_v24  ;;  %2666 = vmatpush.msra.mxu0 %v5496_v30 }
 0x90e   :  { %2577 = vmatpush.msra.mxu2 %v5499_v27 }
 0x90f   :  { %2647 = vmatpush.msrb.mxu3 %v5394_v43  ;;  %2667 = vmatpush.msra.mxu0 %v5503_v2  ;;  %v6185_v43 = vld [vmem:[#allocation43_spill] sm:$0xff] }
 0x910   :  { %2578 = vmatpush.msra.mxu2 %v5506_v32 }
 0x911   :  { %2648 = vmatpush.msrb.mxu3 %v5399_v40  ;;  %2668 = vmatpush.msra.mxu0 %v5510_v55 }
 0x912   :  { %2579 = vmatpush.msra.mxu2 %v5513_v14 }
 0x913   :  { %2649 = vmatpush.msrb.mxu3 %v5404_v58  ;;  %2669 = vmatpush.msra.mxu0 %v5517_v56  ;;  %v6186_v58 = vld [vmem:[#allocation30_spill] sm:$0xff] }
 0x914   :  { %2580 = vmatpush.msra.mxu2 %v5520_v61 }
 0x915   :  { %2650 = vmatpush.msrb.mxu3 %v5409_v62  ;;  %2670 = vmatpush.msra.mxu0 %v5524_v44 }
 0x916   :  { %2581 = vmatpush.msra.mxu2 %v5527_v36 }
 0x917   :  { %2651 = vmatpush.msrb.mxu3 %v5414_v63  ;;  %2671 = vmatpush.msra.mxu0 %v5531_v49  ;;  %v6187_v63 = vld [vmem:[#allocation35_spill] sm:$0xff] }
 0x918   :  { %2582 = vmatpush.msra.mxu2 %v5534_v50 }
 0x919   :  { %2652 = vmatpush.msrb.mxu3 %v5419_v21  ;;  %2672 = vmatpush.msra.mxu0 %v5538_v11 }
 0x91a   :  { %2583 = vmatpush.msra.mxu2 %v5541_v53 }
 0x91b   :  { %2653 = vmatpush.msrb.mxu3 %v5424_v46  ;;  %2673 = vmatpush.msra.mxu0 %v5545_v15  ;;  %v2755_v46 = vld [vmem:[%s5796_s10 + $0x38] sm:$0xff] }
 0x91c   :  { %2584 = vmatpush.msra.mxu2 %v5548_v45 }
 0x91d   :  { %2654 = vmatpush.msrb.mxu3 %v6177_v17  ;;  %2674 = vmatpush.msra.mxu0 %v6178_v16 }
 0x91e   :  { %2585 = vmatpush.msra.mxu2 %v6179_v31 }
 0x91f   :  { %2655 = vmatpush.msrb.mxu3 %v6180_v5  ;;  %2675 = vmatpush.msra.mxu0 %v6181_v37  ;;  %v6192_v5 = vsel %vm3863_vm3, %v6175_v39, %v6174_v7 }
 0x920   :  { %2586 = vmatpush.msra.mxu2 %v6182_v34 }
 0x921   :  { %2656 = vmatpush.msrb.mxu3 %v6183_v48  ;;  %2676 = vmatpush.msra.mxu0 %v6184_v35 }
 0x97f   :  { %v2368_v38 = vpop.f32.mrf.mxu0 }
 0x980   :  { %v2369_v51 = vadd.f32 %v2368_v38, %v5221_v22 }
 0x984   :  { %v2328_v57 = vpop.f32.mrf.mxu2  ;;  %v2348_v24 = vpop.f32.mrf.mxu3 }
 0x985   :  { %v2329_v40 = vadd.f32 %v2328_v57, %v6185_v43  ;;  %v2349_v62 = vadd.f32 %v2348_v24, %v6186_v58 }
 0x987   :  { %v2371_v21 = vadd.f32 %v2329_v40, %v6187_v63  ;;  %v2391_v23 = vadd.f32 %v2349_v62, %v6191_v4 }
 0x989   :  { %v2885_v8 = vmul.f32 -1.442695, %v2371_v21  ;;  %v2886_v30 = vmul.f32 -1.442695, %v2391_v23 }
 0x98b   :  { %3024 = vpow2.f32 %v2885_v8 }
 0x98c   :  { %3026 = vpow2.f32 %v2886_v30 }
 0x991   :  { %v3025_v2 = vpop.eup %3024 }
 0x992   :  { %v3027_v55 = vpop.eup %3026  ;;  %v2375_v56 = vadd.f32 1.0, %v3025_v2 }
 0x993   :  { %v2395_v44 = vadd.f32 1.0, %v3027_v55 }
 0x994   :  { %3028 = vrcp.f32 %v2375_v56  ;;  %v2387_v9 = vand.u32 2147483648, %v2375_v56  ;;  %v2385_v0 = vand.u32 2147483647, %v2375_v56  ;;  %vm2381_vm7 = vweird.f32 %v2375_v56 }
 0x995   :  { %3030 = vrcp.f32 %v2395_v44  ;;  %v2407_v17 = vand.u32 2147483648, %v2395_v44  ;;  %vm2401_vm11 = vweird.f32 %v2395_v44  ;;  %v2405_v16 = vand.u32 2147483647, %v2395_v44 }
 0x996   :  { %v2388_v18 = vor.u32 1.1754944e-38, %v2387_v9  ;;  %vm2386_vm9 = vcmp.eq.f32.partialorder %v2385_v0, 8.507059e+37  ;;  %v6198_v0 = vld [vmem:[#allocation50_spill] sm:$0xff] }
 0x997   :  { %v2408_v35 = vor.u32 1.1754944e-38, %v2407_v17  ;;  %vm2406_vm13 = vcmp.eq.f32.partialorder %v2405_v16, 8.507059e+37 }
 0x99a   :  { %v3029_v49 = vpop.eup %3028 }
 0x99b   :  { %v3031_v11 = vpop.eup %3030  ;;  %v2377_v15 = vmul.f32 %v3029_v49, %v2375_v56  ;;  %vm2382_vm6 = vweird.f32 %v3029_v49 }
 0x99c   :  { %v2397_v19 = vmul.f32 %v3031_v11, %v2395_v44  ;;  %vm2383_vm8 = vmor %vm2381_vm7, %vm2382_vm6  ;;  %vm2402_vm10 = vweird.f32 %v3031_v11 }
 0x99d   :  { %v2378_v54 = vsub.f32 1.0, %v2377_v15  ;;  %vm2403_vm12 = vmor %vm2401_vm11, %vm2402_vm10 }
 0x99e   :  { %v2398_v29 = vsub.f32 1.0, %v2397_v19 }
 0x99f   :  { %v2379_v26 = vmul.f32 %v3029_v49, %v2378_v54 }
 0x9a0   :  { %v2399_v13 = vmul.f32 %v3031_v11, %v2398_v29 }
 0x9a1   :  { %v2380_v47 = vadd.f32 %v3029_v49, %v2379_v26  ;;  %v6197_v26 = vld [vmem:[#allocation54_spill] sm:$0xff] }
 0x9a2   :  { %v2400_v60 = vadd.f32 %v3031_v11, %v2399_v13  ;;  %v6199_v38 = vsel %vm3863_vm3, %v6197_v26, %v6198_v0  ;;  %v2763_v0 = vld [vmem:[%s5796_s10 + $0x78] sm:$0xff] }
 0x9a3   :  { %v2384_v3 = vsel %vm2383_vm8, %v3029_v49, %v2380_v47 }
 0x9a4   :  { %v2389_v6 = vsel %vm2386_vm9, %v2388_v18, %v2384_v3  ;;  %v2404_v48 = vsel %vm2403_vm12, %v3031_v11, %v2400_v60 }
 0x9a5   :  { %v2411_v52 = vmul.f32 %v2389_v6, %v2369_v51  ;;  %v2409_v57 = vsel %vm2406_vm13, %v2408_v35, %v2404_v48  ;;  %v6200_v35 = vld [vmem:[#allocation39_spill] sm:$0xff] }
 0x9a6   :  { %v2414_v24 = vsub.f32 1.0, %v2409_v57  ;;  %v2416_v63 = vmul.f32 %v2409_v57, %v5584_v33 }
 0x9a7   :  { %v2412_v37 = vadd.f32 %v2411_v52, %v6192_v5 }
 0x9a9   :  { %3032 = vtanh.f32 %v2412_v37 }
 0x9af   :  { %v3033_v40 = vpop.eup %3032 }
 0x9b0   :  { %v2415_v62 = vmul.f32 %v3033_v40, %v2414_v24  ;;  %v6201_v24 = vld [vmem:[#allocation56_spill] sm:$0xff]  ;;  %v6202_v40 = vld [vmem:[#allocation47_spill] sm:$0xff] }
 0x9b2   :  { %v5652_v21 = vadd.f32 %v2416_v63, %v2415_v62  ;;  %v6203_v62 = vsel %vm3841_vm2, %v6201_v24, %v6202_v40  ;;  %v6210_v24 = vld [vmem:[#allocation44_spill] sm:$0xff] }
 0x9b4   :  { %2437 = vmatmul.f32.vlgmr.msra.gmra.mxu1 %v5652_v21  ;;  %2457 = vmatmul.f32.vlgmr.msrb.gmra.mxu2 %v5652_v21 }
 0x9b5   :  { %2477 = vmatmul.f32.vlgmr.msra.gmra.mxu3 %v5652_v21  ;;  %2681 = vmatpush.msra.mxu1 %v5357_v28 }
 0x9b6   :  { %2768 = vmatpush.msrb.mxu2 %v2763_v0 }
 0x9b7   :  { %2682 = vmatpush.msra.mxu1 %v5466_v1 }
 0x9b9   :  { %2683 = vmatpush.msra.mxu1 %v5471_v41  ;;  %v6193_v41 = vld [vmem:[#allocation42_spill] sm:$0xff] }
 0x9bb   :  { %2684 = vmatpush.msra.mxu1 %v5478_v20 }
 0x9bd   :  { %2685 = vmatpush.msra.mxu1 %v5485_v10 }
 0x9bf   :  { %2686 = vmatpush.msra.mxu1 %v5492_v59 }
 0x9c1   :  { %2687 = vmatpush.msra.mxu1 %v5499_v27 }
 0x9c3   :  { %2688 = vmatpush.msra.mxu1 %v5506_v32  ;;  %v6194_v32 = vld [vmem:[#allocation51_spill] sm:$0xff] }
 0x9c5   :  { %2689 = vmatpush.msra.mxu1 %v5513_v14  ;;  %v6195_v14 = vld [vmem:[#allocation45_spill] sm:$0xff] }
 0x9c7   :  { %2690 = vmatpush.msra.mxu1 %v5520_v61  ;;  %v6196_v61 = vsel %vm3841_vm2, %v6194_v32, %v6195_v14 }
 0x9c9   :  { %2691 = vmatpush.msra.mxu1 %v5527_v36 }
 0x9cb   :  { %2692 = vmatpush.msra.mxu1 %v5534_v50 }
 0x9cd   :  { %2693 = vmatpush.msra.mxu1 %v5541_v53 }
 0x9cf   :  { %2694 = vmatpush.msra.mxu1 %v5548_v45 }
 0x9d1   :  { %2695 = vmatpush.msra.mxu1 %v6179_v31 }
 0x9d3   :  { %2696 = vmatpush.msra.mxu1 %v6182_v34 }
 0xa31   :  { %v2438_v28 = vpop.f32.mrf.mxu1 }
 0xa32   :  { %v2439_v1 = vadd.f32 %v2438_v28, %v6185_v43 }
 0xa34   :  { %v2481_v20 = vadd.f32 %v2439_v1, %v6193_v41 }
 0xa36   :  { %v2887_v10 = vmul.f32 -1.442695, %v2481_v20 }
 0xa37   :  { %v2458_v59 = vpop.f32.mrf.mxu2 }
 0xa38   :  { %3034 = vpow2.f32 %v2887_v10  ;;  %v2459_v27 = vadd.f32 %v2458_v59, %v6186_v58  ;;  %v2478_v8 = vpop.f32.mrf.mxu3 }
 0xa39   :  { %v2479_v44 = vadd.f32 %v2478_v8, %v5221_v22 }
 0xa3a   :  { %v2501_v36 = vadd.f32 %v2459_v27, %v6196_v61 }
 0xa3c   :  { %v2888_v50 = vmul.f32 -1.442695, %v2501_v36 }
 0xa3e   :  { %v3035_v53 = vpop.eup %3034  ;;  %3036 = vpow2.f32 %v2888_v50 }
 0xa3f   :  { %v2485_v45 = vadd.f32 1.0, %v3035_v53 }
 0xa41   :  { %3038 = vrcp.f32 %v2485_v45  ;;  %v2497_v25 = vand.u32 2147483648, %v2485_v45  ;;  %v2495_v4 = vand.u32 2147483647, %v2485_v45  ;;  %vm2491_vm15 = vweird.f32 %v2485_v45 }
 0xa43   :  { %v2498_v55 = vor.u32 1.1754944e-38, %v2497_v25  ;;  %vm2496_vm0 = vcmp.eq.f32.partialorder %v2495_v4, 8.507059e+37 }
 0xa44   :  { %v3037_v7 = vpop.eup %3036 }
 0xa45   :  { %v2505_v39 = vadd.f32 1.0, %v3037_v7 }
 0xa47   :  { %v3039_v33 = vpop.eup %3038  ;;  %3040 = vrcp.f32 %v2505_v39  ;;  %v2517_v19 = vand.u32 2147483648, %v2505_v39  ;;  %v2515_v9 = vand.u32 2147483647, %v2505_v39  ;;  %vm2511_vm5 = vweird.f32 %v2505_v39 }
 0xa48   :  { %v2487_v31 = vmul.f32 %v3039_v33, %v2485_v45  ;;  %vm2492_vm14 = vweird.f32 %v3039_v33 }
 0xa49   :  { %vm2493_vm1 = vmor %vm2491_vm15, %vm2492_vm14  ;;  %v2518_v47 = vor.u32 1.1754944e-38, %v2517_v19  ;;  %vm2516_vm7 = vcmp.eq.f32.partialorder %v2515_v9, 8.507059e+37 }
 0xa4a   :  { %v2488_v34 = vsub.f32 1.0, %v2487_v31 }
 0xa4c   :  { %v2489_v12 = vmul.f32 %v3039_v33, %v2488_v34 }
 0xa4d   :  { %v3041_v23 = vpop.eup %3040 }
 0xa4e   :  { %v2507_v30 = vmul.f32 %v3041_v23, %v2505_v39  ;;  %v2490_v2 = vadd.f32 %v3039_v33, %v2489_v12  ;;  %vm2512_vm4 = vweird.f32 %v3041_v23 }
 0xa4f   :  { %vm2513_vm6 = vmor %vm2511_vm5, %vm2512_vm4 }
 0xa50   :  { %v2508_v56 = vsub.f32 1.0, %v2507_v30  ;;  %v2494_v49 = vsel %vm2493_vm1, %v3039_v33, %v2490_v2  ;;  %v6204_v2 = vld [vmem:[#allocation55_spill] sm:$0xff] }
 0xa51   :  { %v2499_v11 = vsel %vm2496_vm0, %v2498_v55, %v2494_v49  ;;  %v6205_v55 = vld [vmem:[#allocation46_spill] sm:$0xff] }
 0xa52   :  { %v2509_v15 = vmul.f32 %v3041_v23, %v2508_v56  ;;  %v2521_v54 = vmul.f32 %v2499_v11, %v2479_v44  ;;  %v6206_v56 = vsel %vm3863_vm3, %v6204_v2, %v6205_v55  ;;  %v2797_v2 = vld [vmem:[#allocation10 + $0x40] sm:$0xff] }
 0xa54   :  { %v2510_v29 = vadd.f32 %v3041_v23, %v2509_v15  ;;  %v2522_v13 = vadd.f32 %v2521_v54, %v6199_v38  ;;  %v2762_v38 = vld [vmem:[%s5796_s10 + $0x70] sm:$0xff] }
 0xa55   :  { %2769 = vmatpush.msrb.mxu2 %v2762_v38  ;;  %v2794_v38 = vld [vmem:[#allocation10 + $0x28] sm:$0xff] }
 0xa56   :  { %v2514_v18 = vsel %vm2513_vm6, %v3041_v23, %v2510_v29  ;;  %3042 = vtanh.f32 %v2522_v13  ;;  %v2761_v13 = vld [vmem:[%s5796_s10 + $0x68] sm:$0xff] }
 0xa57   :  { %v2519_v51 = vsel %vm2516_vm7, %v2518_v47, %v2514_v18  ;;  %2770 = vmatpush.msrb.mxu2 %v2761_v13  ;;  %v2760_v47 = vld [vmem:[%s5796_s10 + $0x60] sm:$0xff]  ;;  %v2759_v18 = vld [vmem:[%s5796_s10 + $0x58] sm:$0xff] }
 0xa58   :  { %v2524_v3 = vsub.f32 1.0, %v2519_v51  ;;  %v2526_v52 = vmul.f32 %v2519_v51, %v5652_v21  ;;  %v6212_v13 = vld [vmem:[#allocation59_spill] sm:$0xff] }
 0xa59   :  { %2771 = vmatpush.msrb.mxu2 %v2760_v47 }
 0xa5b   :  { %2772 = vmatpush.msrb.mxu2 %v2759_v18 }
 0xa5c   :  { %v3043_v6 = vpop.eup %3042 }
 0xa5d   :  { %v2525_v60 = vmul.f32 %v3043_v6, %v2524_v3  ;;  %v2758_v6 = vld [vmem:[%s5796_s10 + $0x50] sm:$0xff] }
 0xa5e   :  { %2773 = vmatpush.msrb.mxu2 %v2758_v6 }
 0xa5f   :  { %v2527_v17 = vadd.f32 %v2526_v52, %v2525_v60  ;;  %v6207_v60 = vld [vmem:[#allocation60_spill] sm:$0xff]  ;;  %v6208_v52 = vld [vmem:[#allocation58_spill] sm:$0xff] }
 0xa61   :  { %2547 = vmatmul.f32.vlgmr.msrb.gmra.mxu0 %v2527_v17  ;;  %2567 = vmatmul.f32.vlgmr.msrb.gmra.mxu1 %v2527_v17 }
 0xa62   :  { %2587 = vmatmul.f32.vlgmr.msra.gmra.mxu2 %v2527_v17 }
 0xade   :  { %v2548_v16 = vpop.f32.mrf.mxu0  ;;  %v2568_v5 = vpop.f32.mrf.mxu1 }
 0xadf   :  { %v2549_v37 = vadd.f32 %v2548_v16, %v6185_v43  ;;  %v2569_v48 = vadd.f32 %v2568_v5, %v6186_v58  ;;  %v2757_v5 = vld [vmem:[%s5796_s10 + $0x48] sm:$0xff] }
 0xae0   :  { %2774 = vmatpush.msrb.mxu2 %v2757_v5 }
 0xae1   :  { %v2591_v57 = vadd.f32 %v2549_v37, %v6200_v35  ;;  %v2611_v63 = vadd.f32 %v2569_v48, %v6203_v62  ;;  %v2753_v62 = vld [vmem:[%s5796_s10 + $0x28] sm:$0xff] }
 0xae3   :  { %v2889_v28 = vmul.f32 -1.442695, %v2591_v57  ;;  %v2890_v21 = vmul.f32 -1.442695, %v2611_v63  ;;  %v2754_v57 = vld [vmem:[%s5796_s10 + $0x30] sm:$0xff] }
 0xae5   :  { %3044 = vpow2.f32 %v2889_v28  ;;  %v2588_v39 = vpop.f32.mrf.mxu2 }
 0xae6   :  { %3046 = vpow2.f32 %v2890_v21  ;;  %v2589_v34 = vadd.f32 %v2588_v39, %v5221_v22  ;;  %v2751_v21 = vld [vmem:[%s5796_s10 + $0x18] sm:$0xff] }
 0xaeb   :  { %v3045_v1 = vpop.eup %3044 }
 0xaec   :  { %v3047_v41 = vpop.eup %3046  ;;  %v2595_v20 = vadd.f32 1.0, %v3045_v1 }
 0xaed   :  { %v2615_v10 = vadd.f32 1.0, %v3047_v41  ;;  %v2750_v41 = vld [vmem:[%s5796_s10 + $0x10] sm:$0xff] }
 0xaee   :  { %3048 = vrcp.f32 %v2595_v20  ;;  %v2607_v50 = vand.u32 2147483648, %v2595_v20  ;;  %v2605_v45 = vand.u32 2147483647, %v2595_v20  ;;  %vm2601_vm9 = vweird.f32 %v2595_v20 }
 0xaef   :  { %3050 = vrcp.f32 %v2615_v10  ;;  %v2627_v23 = vand.u32 2147483648, %v2615_v10  ;;  %vm2621_vm13 = vweird.f32 %v2615_v10  ;;  %v2625_v30 = vand.u32 2147483647, %v2615_v10 }
 0xaf0   :  { %v2608_v31 = vor.u32 1.1754944e-38, %v2607_v50  ;;  %vm2606_vm11 = vcmp.eq.f32.partialorder %v2605_v45, 8.507059e+37 }
 0xaf1   :  { %v2628_v11 = vor.u32 1.1754944e-38, %v2627_v23  ;;  %vm2626_vm15 = vcmp.eq.f32.partialorder %v2625_v30, 8.507059e+37 }
 0xaf4   :  { %v3049_v59 = vpop.eup %3048 }
 0xaf5   :  { %v3051_v27 = vpop.eup %3050  ;;  %v2597_v32 = vmul.f32 %v3049_v59, %v2595_v20  ;;  %vm2602_vm8 = vweird.f32 %v3049_v59  ;;  %v2749_v20 = vld [vmem:[%s5796_s10 + $0x8] sm:$0xff] }
 0xaf6   :  { %v2617_v14 = vmul.f32 %v3051_v27, %v2615_v10  ;;  %vm2603_vm10 = vmor %vm2601_vm9, %vm2602_vm8  ;;  %vm2622_vm12 = vweird.f32 %v3051_v27 }
 0xaf7   :  { %v2598_v61 = vsub.f32 1.0, %v2597_v32  ;;  %vm2623_vm14 = vmor %vm2621_vm13, %vm2622_vm12  ;;  %v2804_v32 = vld [vmem:[#allocation10 + $0x78] sm:$0xff] }
 0xaf8   :  { %v2618_v36 = vsub.f32 1.0, %v2617_v14  ;;  %v2803_v14 = vld [vmem:[#allocation10 + $0x70] sm:$0xff]  ;;  %2809 = vmatpush.msra.mxu3 %v2804_v32 }
 0xaf9   :  { %v2599_v53 = vmul.f32 %v3049_v59, %v2598_v61 }
 0xafa   :  { %v2619_v7 = vmul.f32 %v3051_v27, %v2618_v36  ;;  %v2802_v36 = vld [vmem:[#allocation10 + $0x68] sm:$0xff]  ;;  %2810 = vmatpush.msra.mxu3 %v2803_v14 }
 0xafb   :  { %v2600_v33 = vadd.f32 %v3049_v59, %v2599_v53  ;;  %v2801_v53 = vld [vmem:[#allocation10 + $0x60] sm:$0xff] }
 0xafc   :  { %v2620_v4 = vadd.f32 %v3051_v27, %v2619_v7  ;;  %2811 = vmatpush.msra.mxu3 %v2802_v36  ;;  %v2800_v7 = vld [vmem:[#allocation10 + $0x58] sm:$0xff] }
 0xafd   :  { %v2604_v25 = vsel %vm2603_vm10, %v3049_v59, %v2600_v33  ;;  %v2748_v59 = vld [vmem:[%s5796_s10] sm:$0xff] }
 0xafe   :  { %v2609_v12 = vsel %vm2606_vm11, %v2608_v31, %v2604_v25  ;;  %v2624_v49 = vsel %vm2623_vm14, %v3051_v27, %v2620_v4  ;;  %2812 = vmatpush.msra.mxu3 %v2801_v53  ;;  %v2799_v31 = vld [vmem:[#allocation10 + $0x50] sm:$0xff] }
 0xaff   :  { %v2631_v8 = vmul.f32 %v2609_v12, %v2589_v34  ;;  %v2629_v15 = vsel %vm2626_vm15, %v2628_v11, %v2624_v49  ;;  %v2798_v12 = vld [vmem:[#allocation10 + $0x48] sm:$0xff] }
 0xb00   :  { %v2634_v19 = vsub.f32 1.0, %v2629_v15  ;;  %v2636_v29 = vmul.f32 %v2629_v15, %v2527_v17  ;;  %v6209_v17 = vsel %vm3841_vm2, %v6207_v60, %v6208_v52  ;;  %2813 = vmatpush.msra.mxu3 %v2800_v7  ;;  %v2792_v60 = vld [vmem:[#allocation10 + $0x18] sm:$0xff] }
 0xb01   :  { %v2632_v44 = vadd.f32 %v2631_v8, %v6206_v56 }
 0xb02   :  { %2814 = vmatpush.msra.mxu3 %v2799_v31 }
 0xb03   :  { %3052 = vtanh.f32 %v2632_v44  ;;  %v2796_v44 = vld [vmem:[#allocation10 + $0x38] sm:$0xff] }
 0xb04   :  { %2815 = vmatpush.msra.mxu3 %v2798_v12 }
 0xb06   :  { %2816 = vmatpush.msra.mxu3 %v2797_v2 }
 0xb08   :  { %2817 = vmatpush.msra.mxu3 %v2796_v44 }
 0xb09   :  { %v3053_v54 = vpop.eup %3052 }
 0xb0a   :  { %v2635_v9 = vmul.f32 %v3053_v54, %v2634_v19  ;;  %v2795_v54 = vld [vmem:[#allocation10 + $0x30] sm:$0xff] }
 0xb0b   :  { %2818 = vmatpush.msra.mxu3 %v2795_v54 }
 0xb0c   :  { %v5702_v26 = vadd.f32 %v2636_v29, %v2635_v9 }
 0xb0d   :  { %2819 = vmatpush.msra.mxu3 %v2794_v38 }
 0xb0e   :  { %2657 = vmatmul.f32.vlgmr.msrb.gmra.mxu3 %v5702_v26  ;;  %2677 = vmatmul.f32.vlgmr.msra.gmra.mxu0 %v5702_v26 }
 0xb0f   :  { %2697 = vmatmul.f32.vlgmr.msra.gmra.mxu1 %v5702_v26 }
 0xb8b   :  { %v2678_v51 = vpop.f32.mrf.mxu0 }
 0xb8c   :  { %v2679_v3 = vadd.f32 %v2678_v51, %v6186_v58  ;;  %v2756_v58 = vld [vmem:[%s5796_s10 + $0x40] sm:$0xff]  ;;  %v2698_v30 = vpop.f32.mrf.mxu1 }
 0xb8d   :  { %2775 = vmatpush.msrb.mxu2 %v2756_v58  ;;  %v2699_v49 = vadd.f32 %v2698_v30, %v5221_v22  ;;  %v6211_v22 = vld [vmem:[#allocation61_spill] sm:$0xff] }
 0xb8e   :  { %v2721_v16 = vadd.f32 %v2679_v3, %v6209_v17  ;;  %v6213_v47 = vsel %vm3863_vm3, %v6211_v22, %v6212_v13  ;;  %v2793_v3 = vld [vmem:[#allocation10 + $0x20] sm:$0xff]  ;;  %v2791_v58 = vld [vmem:[#allocation10 + $0x10] sm:$0xff] }
 0xb8f   :  { %2776 = vmatpush.msrb.mxu2 %v2755_v46  ;;  %2820 = vmatpush.msra.mxu3 %v2793_v3  ;;  %v2902_v46 = vld [vmem:[%s5797_s11] ss:$0 sm:$0xff] }
 0xb90   :  { %v2892_v37 = vmul.f32 -1.442695, %v2721_v16 }
 0xb91   :  { %v2658_v48 = vpop.f32.mrf.mxu3  ;;  %2777 = vmatpush.msrb.mxu2 %v2754_v57  ;;  %2821 = vmatpush.msra.mxu3 %v2792_v60 }
 0xb92   :  { %3054 = vpow2.f32 %v2892_v37  ;;  %v2659_v35 = vadd.f32 %v2658_v48, %v6185_v43  ;;  %v2752_v43 = vld [vmem:[%s5796_s10 + $0x20] sm:$0xff]  ;;  %v2790_v48 = vld [vmem:[#allocation10 + $0x8] sm:$0xff] }
 0xb93   :  { %2778 = vmatpush.msrb.mxu2 %v2753_v62  ;;  %2822 = vmatpush.msra.mxu3 %v2791_v58 }
 0xb94   :  { %v2701_v40 = vadd.f32 %v2659_v35, %v6210_v24  ;;  %v2789_v35 = vld [vmem:[#allocation10] sm:$0xff] }
 0xb95   :  { %2779 = vmatpush.msrb.mxu2 %v2752_v43  ;;  %2823 = vmatpush.msra.mxu3 %v2790_v48 }
 0xb96   :  { %v2891_v63 = vmul.f32 -1.442695, %v2701_v40 }
 0xb97   :  { %2780 = vmatpush.msrb.mxu2 %v2751_v21  ;;  %2824 = vmatpush.msra.mxu3 %v2789_v35 }
 0xb98   :  { %v3055_v28 = vpop.eup %3054  ;;  %3056 = vpow2.f32 %v2891_v63 }
 0xb99   :  { %v5754_v1 = vadd.f32 1.0, %v3055_v28  ;;  %2781 = vmatpush.msrb.mxu2 %v2750_v41 }
 0xb9b   :  { %3058 = vrcp.f32 %v5754_v1  ;;  %2782 = vmatpush.msrb.mxu2 %v2749_v20  ;;  %v2737_v9 = vand.u32 2147483648, %v5754_v1  ;;  %vm2731_vm6 = vweird.f32 %v5754_v1  ;;  %v2735_v0 = vand.u32 2147483647, %v5754_v1 }
 0xb9d   :  { %2783 = vmatpush.msrb.mxu2 %v2748_v59  ;;  %v2738_v6 = vor.u32 1.1754944e-38, %v2737_v9  ;;  %vm2736_vm8 = vcmp.eq.f32.partialorder %v2735_v0, 8.507059e+37 }
 0xb9e   :  { %v3057_v10 = vpop.eup %3056 }
 0xb9f   :  { %v2705_v27 = vadd.f32 1.0, %v3057_v10 }
 0xba1   :  { %3060 = vrcp.f32 %v2705_v27  ;;  %v3059_v61 = vpop.eup %3058  ;;  %v2717_v25 = vand.u32 2147483648, %v2705_v27  ;;  %v2715_v23 = vand.u32 2147483647, %v2705_v27  ;;  %vm2711_vm1 = vweird.f32 %v2705_v27 }
 0xba2   :  { %v2727_v50 = vmul.f32 %v3059_v61, %v5754_v1  ;;  %vm2732_vm5 = vweird.f32 %v3059_v61 }
 0xba3   :  { %v2718_v56 = vor.u32 1.1754944e-38, %v2717_v25  ;;  %vm2716_vm4 = vcmp.eq.f32.partialorder %v2715_v23, 8.507059e+37  ;;  %vm2733_vm7 = vmor %vm2731_vm6, %vm2732_vm5 }
 0xba4   :  { %v2728_v33 = vsub.f32 1.0, %v2727_v50 }
 0xba6   :  { %v2729_v8 = vmul.f32 %v3059_v61, %v2728_v33 }
 0xba7   :  { %v3061_v45 = vpop.eup %3060 }
 0xba8   :  { %v2707_v39 = vmul.f32 %v3061_v45, %v2705_v27  ;;  %vm2712_vm2 = vweird.f32 %v3061_v45  ;;  %v2730_v19 = vadd.f32 %v3059_v61, %v2729_v8 }
 0xba9   :  { %vm2713_vm0 = vmor %vm2711_vm1, %vm2712_vm2 }
 0xbaa   :  { %v2708_v34 = vsub.f32 1.0, %v2707_v39  ;;  %v2734_v51 = vsel %vm2733_vm7, %v3059_v61, %v2730_v19 }
 0xbab   :  { %v2739_v52 = vsel %vm2736_vm8, %v2738_v6, %v2734_v51 }
 0xbac   :  { %v2709_v4 = vmul.f32 %v3061_v45, %v2708_v34  ;;  %v2744_v17 = vsub.f32 1.0, %v2739_v52  ;;  %v2746_v42 = vmul.f32 %v2739_v52, %v5702_v26  ;;  %v2903_v26 = vld [vmem:[%s5799_s13] ss:$0 sm:$0xff] }
 0xbae   :  { %v2710_v55 = vadd.f32 %v3061_v45, %v2709_v4 }
 0xbb0   :  { %v2714_v11 = vsel %vm2713_vm0, %v3061_v45, %v2710_v55 }
 0xbb1   :  { %v2719_v15 = vsel %vm2716_vm4, %v2718_v56, %v2714_v11 }
 0xbb2   :  { %v2741_v29 = vmul.f32 %v2719_v15, %v2699_v49 }
 0xbb4   :  { %v2742_v18 = vadd.f32 %v2741_v29, %v6213_v47 }
 0xbb6   :  { %3062 = vtanh.f32 %v2742_v18 }
 0xbbc   :  { %v3063_v16 = vpop.eup %3062 }
 0xbbd   :  { %v2745_v5 = vmul.f32 %v3063_v16, %v2744_v17 }
 0xbbf   :  { %v2747_v37 = vadd.f32 %v2746_v42, %v2745_v5 }
 0xbc1   :  { %2784 = vmatmul.f32.vlgmr.msrb.gmra.mxu2 %v2747_v37 }
 0xc44   :  { %v2785_v57 = vpop.f32.mrf.mxu2 }
 0xc45   :  { %v2786_v24 = vadd.f32 %v2902_v46, %v2785_v57 }
 0xc47   :  { %v2788_v40 = vmax.f32 %v2786_v24, 0.0 }
 0xc49   :  { %2825 = vmatmul.f32.vlgmr.msra.gmra.mxu3 %v2788_v40 }
 0xccc   :  { %v2826_v62 = vpop.f32.mrf.mxu3 }
 0xccd   :  { %v2827_v63 = vadd.f32 %v2903_v26, %v2826_v62 }
 0xccf   :  { %2829 = vst [vmem:[%s5800_s14] sm:$0xff] %v2827_v63 }
 0xcd0   :  { %2834 = vsyncpa [#allocation6], 1 }
 0xcd1   :  { %2835 = vsyncpa [#allocation8], 1 }
 0xcd2   :  { %2836 = vsyncpa [#allocation11], 1 }

</bundles_post_ra>
